<compile_context>
chip_gen: v7x
topology: tpu7x:2x2x1
jax: 0.10.0
libtpu: 0.0.40
codegen_flags: <defaults>
</compile_context>

<pallas_src>
import functools

import jax
import jax.numpy as jnp
import numpy as np
from jax.experimental import pallas as pl
from jax.experimental.pallas import tpu as pltpu


_LANE = 128      # hidden dims padded to a multiple of this (lane width)
_SUBLANE = 8     # batch padded to a multiple of this (sublane count)


def _round_up(x, m):
    return ((x + m - 1) // m) * m


# ----------------------------------------------------------------------------
# Fused decoder kernel (single invocation, no grid).
#   refs = [x_ref] + [w_ih_p, w_hh_p, b_p] * num_layers + [out_ref]
#     x_ref   : (T*Bp, D0)      time-major rows (t-major), batch padded to Bp
#     w_ih_p  : (D_l, 4*Hp_l)   W_ih^T, gate blocks at 128-aligned columns, zero padded
#     w_hh_p  : (Hp_l, 4*Hp_l)  W_hh^T, zero padded
#     b_p     : (1, 4*Hp_l)     b_ih + b_hh, zero in padded gate lanes
#     out_ref : (T*Bp, Hp_last)
# ----------------------------------------------------------------------------
def decoder_kernel(*refs, num_layers, seq_len, batch_p, h_pads):
    x_ref = refs[0]
    out_ref = refs[-1]
    w_refs = refs[1:-1]

    xf = x_ref[...]                                             # (T*Bp, D0) f32
    for layer in range(num_layers):
        w_ih = w_refs[3 * layer][...]                           # (D_l, 4*Hp)
        w_hh = w_refs[3 * layer + 1][...]                       # (Hp, 4*Hp)
        b = w_refs[3 * layer + 2][...]                          # (1, 4*Hp)
        hp = h_pads[layer]

        # Hoisted input projection: ONE big matmul over all T*Bp rows, outside the
        # serial recurrence.
        gx = jnp.dot(xf, w_ih, preferred_element_type=jnp.float32) + b   # (T*Bp, 4*Hp)

        h = jnp.zeros((batch_p, hp), jnp.float32)
        c = jnp.zeros((batch_p, hp), jnp.float32)
        ys = []
        # Unrolled time loop: batch_p == 8 sublanes and hp % 128 == 0, so every slice
        # below is static and tile-aligned.
        for t in range(seq_len):
            gates = gx[t * batch_p:(t + 1) * batch_p, :] + jnp.dot(
                h, w_hh, preferred_element_type=jnp.float32)             # (Bp, 4*Hp)
            # PyTorch gate order i, f, g, o; each slice is 128-lane aligned.
            i_g = jax.nn.sigmoid(gates[:, 0 * hp:1 * hp])
            f_g = jax.nn.sigmoid(gates[:, 1 * hp:2 * hp])
            g_g = jnp.tanh(gates[:, 2 * hp:3 * hp])
            o_g = jax.nn.sigmoid(gates[:, 3 * hp:4 * hp])
            c = f_g * c + i_g * g_g
            h = o_g * jnp.tanh(c)
            ys.append(h)

        y = jnp.concatenate(ys, axis=0)                         # (T*Bp, Hp), tile-aligned
        if layer < num_layers - 1:
            y = jax.nn.sigmoid(y)                               # h_activ between layers
        xf = y                                                  # feeds next layer (VMEM)

    out_ref[...] = xf                                           # single lane-dense store


# ----------------------------------------------------------------------------
# Wrapper
# ----------------------------------------------------------------------------
@functools.partial(jax.jit, static_argnames=("out_hidden_dim", "seq_len"))
def decoder_forward(x_btd, packed_params, out_hidden_dim, seq_len=None):
    """x_btd: (B, T, input_dim) batch-first (PyTorch layout). Returns (B, T, h_dims[-1])."""
    del seq_len                                                 # unused, matches forward()
    B, T, D = x_btd.shape
    Bp = _round_up(B, _SUBLANE)
    num_layers = len(packed_params)
    h_pads = tuple(int(p[1].shape[0]) for p in packed_params)   # w_hh_p is (Hp, 4*Hp)
    hp_last = h_pads[-1]

    # Layout prep (tiny: <16 KiB here, fused by XLA into one copy):
    # batch-first -> time-major, pad batch to 8 sublanes, flatten to 2-D t-major rows.
    x_tm = jnp.transpose(x_btd.astype(jnp.float32), (1, 0, 2))  # (T, B, D)
    x_tm = jnp.pad(x_tm, ((0, 0), (0, Bp - B), (0, 0)))         # (T, Bp, D)
    xf = x_tm.reshape(T * Bp, D)

    flat_params = []
    for w_ih_p, w_hh_p, b_p in packed_params:
        flat_params += [w_ih_p, w_hh_p, b_p]

    kernel = functools.partial(
        decoder_kernel, num_layers=num_layers, seq_len=T, batch_p=Bp, h_pads=h_pads)

    out = pl.pallas_call(
        kernel,
        out_shape=jax.ShapeDtypeStruct((T * Bp, hp_last), jnp.float32),
        # No grid: single invocation; every operand is whole-array VMEM-resident
        # (weights loaded once -- no per-step block re-fetch / double-buffer bookkeeping).
        in_specs=[pl.BlockSpec(memory_space=pltpu.MemorySpace.VMEM)] * (1 + 3 * num_layers),
        out_specs=pl.BlockSpec(memory_space=pltpu.MemorySpace.VMEM),
    )(xf, *flat_params)

    out = out.reshape(T, Bp, hp_last)[:, :B, :out_hidden_dim]   # drop batch/lane padding
    return jnp.transpose(out, (1, 0, 2))                        # (B, T, H_last)


# ----------------------------------------------------------------------------
# Parameters: raw PyTorch-style init + kernel-layout packing
# ----------------------------------------------------------------------------
def init_decoder_params(key, input_dim, h_dims):
    """Raw PyTorch-layout LSTM params, uniform(-1/sqrt(H), 1/sqrt(H)) like nn.LSTM."""
    layer_dims = [input_dim] + list(h_dims) + [h_dims[-1]]
    params = []
    for idx in range(len(layer_dims) - 1):
        d_in, h = layer_dims[idx], layer_dims[idx + 1]
        bound = 1.0 / np.sqrt(h)
        key, k1, k2, k3, k4 = jax.random.split(key, 5)
        w_ih = jax.random.uniform(k1, (4 * h, d_in), jnp.float32, -bound, bound)
        w_hh = jax.random.uniform(k2, (4 * h, h), jnp.float32, -bound, bound)
        b_ih = jax.random.uniform(k3, (4 * h,), jnp.float32, -bound, bound)
        b_hh = jax.random.uniform(k4, (4 * h,), jnp.float32, -bound, bound)
        params.append((w_ih, w_hh, b_ih, b_hh))
    # NOTE: Decoder.__init__ also builds `output_layer = Linear(...)`, but forward()
    # never applies it, so it is intentionally omitted here.
    return params


def pack_decoder_params(raw_params):
    """Transpose + pad raw params into the kernel layout.

    Hidden dims are padded to multiples of 128 lanes and each gate block (i,f,g,o) is
    placed at a 128-aligned column offset.  Padded rows/cols/bias lanes are ZERO, which
    guarantees (a) padded lanes of h/c stay exactly 0 through the recurrence
    (sigmoid(0)*tanh(0) = 0), and (b) the sigmoid(0)=0.5 in padded lanes of inter-layer
    activations hits all-zero weight rows in the next layer, so real lanes are never
    contaminated.
    """
    packed = []
    d_in_padded = raw_params[0][0].shape[1]        # layer 0: rows = real input dim
    for w_ih, w_hh, b_ih, b_hh in raw_params:
        four_h, d_in = w_ih.shape
        h = four_h // 4
        hp = _round_up(h, _LANE)
        w_ih_t = w_ih.T                            # (d_in, 4h)
        w_hh_t = w_hh.T                            # (h, 4h)
        b = b_ih + b_hh                            # (4h,)
        w_ih_p = jnp.zeros((d_in_padded, 4 * hp), jnp.float32)
        w_hh_p = jnp.zeros((hp, 4 * hp), jnp.float32)
        b_p = jnp.zeros((1, 4 * hp), jnp.float32)
        for g in range(4):
            w_ih_p = w_ih_p.at[:d_in, g * hp:g * hp + h].set(w_ih_t[:, g * h:(g + 1) * h])
            w_hh_p = w_hh_p.at[:h, g * hp:g * hp + h].set(w_hh_t[:, g * h:(g + 1) * h])
            b_p = b_p.at[0, g * hp:g * hp + h].set(b[g * h:(g + 1) * h])
        packed.append((w_ih_p, w_hh_p, b_p))
        d_in_padded = hp                           # next layer consumes padded activations
    return packed


# ----------------------------------------------------------------------------
# Pure-JAX reference (lax.scan) for correctness checking
# ----------------------------------------------------------------------------
def _lstm_layer_ref(x_tbd, w_ih, w_hh, b_ih, b_hh):
    h_dim = w_hh.shape[1]
    w_ih_t, w_hh_t = w_ih.T, w_hh.T
    b = (b_ih + b_hh)[None, :]
    B = x_tbd.shape[1]

    def step(carry, x_t):
        h, c = carry
        gates = (jnp.dot(x_t, w_ih_t, precision=jax.lax.Precision.HIGHEST)
                 + jnp.dot(h, w_hh_t, precision=jax.lax.Precision.HIGHEST) + b)
        i = jax.nn.sigmoid(gates[:, :h_dim])
        f = jax.nn.sigmoid(gates[:, h_dim:2 * h_dim])
        g = jnp.tanh(gates[:, 2 * h_dim:3 * h_dim])
        o = jax.nn.sigmoid(gates[:, 3 * h_dim:])
        c = f * c + i * g
        h = o * jnp.tanh(c)
        return (h, c), h

    init = (jnp.zeros((B, h_dim), jnp.float32), jnp.zeros((B, h_dim), jnp.float32))
    _, ys = jax.lax.scan(step, init, x_tbd)
    return ys


def decoder_forward_ref(x_btd, raw_params):
    x = jnp.transpose(x_btd, (1, 0, 2))
    n = len(raw_params)
    for idx, (w_ih, w_hh, b_ih, b_hh) in enumerate(raw_params):
        x = _lstm_layer_ref(x, w_ih, w_hh, b_ih, b_hh)
        if idx < n - 1:
            x = jax.nn.sigmoid(x)
    return jnp.transpose(x, (1, 0, 2))


if __name__ == "__main__":
    B, T = 2, 8
    input_dim = 32
    h_dims = [64, 32]          # layer_dims = [32, 64, 32, 32] -> 3 LSTM layers

    key = jax.random.PRNGKey(0)
    key, pkey, xkey = jax.random.split(key, 3)
    raw_params = init_decoder_params(pkey, input_dim, h_dims)
    packed_params = pack_decoder_params(raw_params)
    x = jax.random.normal(xkey, (B, T, input_dim), jnp.float32)

    out = decoder_forward(x, packed_params, out_hidden_dim=h_dims[-1], seq_len=T)
    out = jax.block_until_ready(out)

    ref = jax.block_until_ready(decoder_forward_ref(x, raw_params))
    np.testing.assert_allclose(np.asarray(out), np.asarray(ref), rtol=1e-2, atol=1e-2)
    assert out.shape == (B, T, h_dims[-1])

    print("KERNEL_OK")
</pallas_src>

<mosaic_0001>
module attributes {stable_mosaic.version = 11 : i64} {
  func.func @decoder_kernel(%arg0: memref<64x32xf32, #tpu.memory_space<vmem>>, %arg1: memref<32x512xf32, #tpu.memory_space<vmem>>, %arg2: memref<128x512xf32, #tpu.memory_space<vmem>>, %arg3: memref<1x512xf32, #tpu.memory_space<vmem>>, %arg4: memref<128x512xf32, #tpu.memory_space<vmem>>, %arg5: memref<128x512xf32, #tpu.memory_space<vmem>>, %arg6: memref<1x512xf32, #tpu.memory_space<vmem>>, %arg7: memref<128x512xf32, #tpu.memory_space<vmem>>, %arg8: memref<128x512xf32, #tpu.memory_space<vmem>>, %arg9: memref<1x512xf32, #tpu.memory_space<vmem>>, %arg10: memref<64x128xf32, #tpu.memory_space<vmem>>) attributes {dimension_semantics = [], scalar_prefetch = 0 : i64, scratch_operands = 0 : i64, tpu.core_type = #tpu.core_type<tc>} {
    %c0 = arith.constant 0 : index
    %c0_0 = arith.constant 0 : index
    %0 = vector.load %arg0[%c0, %c0_0] : memref<64x32xf32, #tpu.memory_space<vmem>>, vector<64x32xf32>
    %c0_1 = arith.constant 0 : index
    %c0_2 = arith.constant 0 : index
    %1 = vector.load %arg1[%c0_1, %c0_2] : memref<32x512xf32, #tpu.memory_space<vmem>>, vector<32x512xf32>
    %c0_3 = arith.constant 0 : index
    %c0_4 = arith.constant 0 : index
    %2 = vector.load %arg2[%c0_3, %c0_4] : memref<128x512xf32, #tpu.memory_space<vmem>>, vector<128x512xf32>
    %c0_5 = arith.constant 0 : index
    %c0_6 = arith.constant 0 : index
    %3 = vector.load %arg3[%c0_5, %c0_6] : memref<1x512xf32, #tpu.memory_space<vmem>>, vector<1x512xf32>
    %cst = arith.constant dense<0.000000e+00> : vector<64x512xf32>
    %4 = tpu.matmul %0, %1, %cst {dimension_numbers = #tpu.dot_dimension_numbers<[1], [0], [0], [1], [0, 0, 1, 1], [], []>} : vector<64x32xf32>, vector<32x512xf32>, vector<64x512xf32> -> vector<64x512xf32>
    %5 = vector.broadcast %3 : vector<1x512xf32> to vector<64x512xf32>
    %6 = arith.addf %4, %5 : vector<64x512xf32>
    %cst_7 = arith.constant 0.000000e+00 : f32
    %7 = vector.broadcast %cst_7 : f32 to vector<8x128xf32>
    %cst_8 = arith.constant 0.000000e+00 : f32
    %8 = vector.broadcast %cst_8 : f32 to vector<8x128xf32>
    %9 = vector.extract_strided_slice %6 {offsets = [0, 0], sizes = [8, 512], strides = [1, 1]} : vector<64x512xf32> to vector<8x512xf32>
    %cst_9 = arith.constant dense<0.000000e+00> : vector<8x512xf32>
    %10 = tpu.matmul %7, %2, %cst_9 {dimension_numbers = #tpu.dot_dimension_numbers<[1], [0], [0], [1], [0, 0, 1, 1], [], []>} : vector<8x128xf32>, vector<128x512xf32>, vector<8x512xf32> -> vector<8x512xf32>
    %11 = arith.addf %9, %10 : vector<8x512xf32>
    %12 = vector.extract_strided_slice %11 {offsets = [0, 0], sizes = [8, 128], strides = [1, 1]} : vector<8x512xf32> to vector<8x128xf32>
    %13 = arith.negf %12 : vector<8x128xf32>
    %14 = math.exp %13 : vector<8x128xf32>
    %cst_10 = arith.constant 1.000000e+00 : f32
    %15 = vector.broadcast %cst_10 : f32 to vector<8x128xf32>
    %16 = arith.addf %15, %14 : vector<8x128xf32>
    %17 = arith.divf %15, %16 : vector<8x128xf32>
    %18 = vector.extract_strided_slice %11 {offsets = [0, 128], sizes = [8, 128], strides = [1, 1]} : vector<8x512xf32> to vector<8x128xf32>
    %19 = arith.negf %18 : vector<8x128xf32>
    %20 = math.exp %19 : vector<8x128xf32>
    %cst_11 = arith.constant 1.000000e+00 : f32
    %21 = vector.broadcast %cst_11 : f32 to vector<8x128xf32>
    %22 = arith.addf %21, %20 : vector<8x128xf32>
    %23 = arith.divf %21, %22 : vector<8x128xf32>
    %24 = vector.extract_strided_slice %11 {offsets = [0, 256], sizes = [8, 128], strides = [1, 1]} : vector<8x512xf32> to vector<8x128xf32>
    %25 = math.tanh %24 : vector<8x128xf32>
    %26 = vector.extract_strided_slice %11 {offsets = [0, 384], sizes = [8, 128], strides = [1, 1]} : vector<8x512xf32> to vector<8x128xf32>
    %27 = arith.negf %26 : vector<8x128xf32>
    %28 = math.exp %27 : vector<8x128xf32>
    %cst_12 = arith.constant 1.000000e+00 : f32
    %29 = vector.broadcast %cst_12 : f32 to vector<8x128xf32>
    %30 = arith.addf %29, %28 : vector<8x128xf32>
    %31 = arith.divf %29, %30 : vector<8x128xf32>
    %32 = arith.mulf %23, %8 : vector<8x128xf32>
    %33 = arith.mulf %17, %25 : vector<8x128xf32>
    %34 = arith.addf %32, %33 : vector<8x128xf32>
    %35 = math.tanh %34 : vector<8x128xf32>
    %36 = arith.mulf %31, %35 : vector<8x128xf32>
    %37 = vector.extract_strided_slice %6 {offsets = [8, 0], sizes = [8, 512], strides = [1, 1]} : vector<64x512xf32> to vector<8x512xf32>
    %cst_13 = arith.constant dense<0.000000e+00> : vector<8x512xf32>
    %38 = tpu.matmul %36, %2, %cst_13 {dimension_numbers = #tpu.dot_dimension_numbers<[1], [0], [0], [1], [0, 0, 1, 1], [], []>} : vector<8x128xf32>, vector<128x512xf32>, vector<8x512xf32> -> vector<8x512xf32>
    %39 = arith.addf %37, %38 : vector<8x512xf32>
    %40 = vector.extract_strided_slice %39 {offsets = [0, 0], sizes = [8, 128], strides = [1, 1]} : vector<8x512xf32> to vector<8x128xf32>
    %41 = arith.negf %40 : vector<8x128xf32>
    %42 = math.exp %41 : vector<8x128xf32>
    %cst_14 = arith.constant 1.000000e+00 : f32
    %43 = vector.broadcast %cst_14 : f32 to vector<8x128xf32>
    %44 = arith.addf %43, %42 : vector<8x128xf32>
    %45 = arith.divf %43, %44 : vector<8x128xf32>
    %46 = vector.extract_strided_slice %39 {offsets = [0, 128], sizes = [8, 128], strides = [1, 1]} : vector<8x512xf32> to vector<8x128xf32>
    %47 = arith.negf %46 : vector<8x128xf32>
    %48 = math.exp %47 : vector<8x128xf32>
    %cst_15 = arith.constant 1.000000e+00 : f32
    %49 = vector.broadcast %cst_15 : f32 to vector<8x128xf32>
    %50 = arith.addf %49, %48 : vector<8x128xf32>
    %51 = arith.divf %49, %50 : vector<8x128xf32>
    %52 = vector.extract_strided_slice %39 {offsets = [0, 256], sizes = [8, 128], strides = [1, 1]} : vector<8x512xf32> to vector<8x128xf32>
    %53 = math.tanh %52 : vector<8x128xf32>
    %54 = vector.extract_strided_slice %39 {offsets = [0, 384], sizes = [8, 128], strides = [1, 1]} : vector<8x512xf32> to vector<8x128xf32>
    %55 = arith.negf %54 : vector<8x128xf32>
    %56 = math.exp %55 : vector<8x128xf32>
    %cst_16 = arith.constant 1.000000e+00 : f32
    %57 = vector.broadcast %cst_16 : f32 to vector<8x128xf32>
    %58 = arith.addf %57, %56 : vector<8x128xf32>
    %59 = arith.divf %57, %58 : vector<8x128xf32>
    %60 = arith.mulf %51, %34 : vector<8x128xf32>
    %61 = arith.mulf %45, %53 : vector<8x128xf32>
    %62 = arith.addf %60, %61 : vector<8x128xf32>
    %63 = math.tanh %62 : vector<8x128xf32>
    %64 = arith.mulf %59, %63 : vector<8x128xf32>
    %65 = vector.extract_strided_slice %6 {offsets = [16, 0], sizes = [8, 512], strides = [1, 1]} : vector<64x512xf32> to vector<8x512xf32>
    %cst_17 = arith.constant dense<0.000000e+00> : vector<8x512xf32>
    %66 = tpu.matmul %64, %2, %cst_17 {dimension_numbers = #tpu.dot_dimension_numbers<[1], [0], [0], [1], [0, 0, 1, 1], [], []>} : vector<8x128xf32>, vector<128x512xf32>, vector<8x512xf32> -> vector<8x512xf32>
    %67 = arith.addf %65, %66 : vector<8x512xf32>
    %68 = vector.extract_strided_slice %67 {offsets = [0, 0], sizes = [8, 128], strides = [1, 1]} : vector<8x512xf32> to vector<8x128xf32>
    %69 = arith.negf %68 : vector<8x128xf32>
    %70 = math.exp %69 : vector<8x128xf32>
    %cst_18 = arith.constant 1.000000e+00 : f32
    %71 = vector.broadcast %cst_18 : f32 to vector<8x128xf32>
    %72 = arith.addf %71, %70 : vector<8x128xf32>
    %73 = arith.divf %71, %72 : vector<8x128xf32>
    %74 = vector.extract_strided_slice %67 {offsets = [0, 128], sizes = [8, 128], strides = [1, 1]} : vector<8x512xf32> to vector<8x128xf32>
    %75 = arith.negf %74 : vector<8x128xf32>
    %76 = math.exp %75 : vector<8x128xf32>
    %cst_19 = arith.constant 1.000000e+00 : f32
    %77 = vector.broadcast %cst_19 : f32 to vector<8x128xf32>
    %78 = arith.addf %77, %76 : vector<8x128xf32>
    %79 = arith.divf %77, %78 : vector<8x128xf32>
    %80 = vector.extract_strided_slice %67 {offsets = [0, 256], sizes = [8, 128], strides = [1, 1]} : vector<8x512xf32> to vector<8x128xf32>
    %81 = math.tanh %80 : vector<8x128xf32>
    %82 = vector.extract_strided_slice %67 {offsets = [0, 384], sizes = [8, 128], strides = [1, 1]} : vector<8x512xf32> to vector<8x128xf32>
    %83 = arith.negf %82 : vector<8x128xf32>
    %84 = math.exp %83 : vector<8x128xf32>
    %cst_20 = arith.constant 1.000000e+00 : f32
    %85 = vector.broadcast %cst_20 : f32 to vector<8x128xf32>
    %86 = arith.addf %85, %84 : vector<8x128xf32>
    %87 = arith.divf %85, %86 : vector<8x128xf32>
    %88 = arith.mulf %79, %62 : vector<8x128xf32>
    %89 = arith.mulf %73, %81 : vector<8x128xf32>
    %90 = arith.addf %88, %89 : vector<8x128xf32>
    %91 = math.tanh %90 : vector<8x128xf32>
    %92 = arith.mulf %87, %91 : vector<8x128xf32>
    %93 = vector.extract_strided_slice %6 {offsets = [24, 0], sizes = [8, 512], strides = [1, 1]} : vector<64x512xf32> to vector<8x512xf32>
    %cst_21 = arith.constant dense<0.000000e+00> : vector<8x512xf32>
    %94 = tpu.matmul %92, %2, %cst_21 {dimension_numbers = #tpu.dot_dimension_numbers<[1], [0], [0], [1], [0, 0, 1, 1], [], []>} : vector<8x128xf32>, vector<128x512xf32>, vector<8x512xf32> -> vector<8x512xf32>
    %95 = arith.addf %93, %94 : vector<8x512xf32>
    %96 = vector.extract_strided_slice %95 {offsets = [0, 0], sizes = [8, 128], strides = [1, 1]} : vector<8x512xf32> to vector<8x128xf32>
    %97 = arith.negf %96 : vector<8x128xf32>
    %98 = math.exp %97 : vector<8x128xf32>
    %cst_22 = arith.constant 1.000000e+00 : f32
    %99 = vector.broadcast %cst_22 : f32 to vector<8x128xf32>
    %100 = arith.addf %99, %98 : vector<8x128xf32>
    %101 = arith.divf %99, %100 : vector<8x128xf32>
    %102 = vector.extract_strided_slice %95 {offsets = [0, 128], sizes = [8, 128], strides = [1, 1]} : vector<8x512xf32> to vector<8x128xf32>
    %103 = arith.negf %102 : vector<8x128xf32>
    %104 = math.exp %103 : vector<8x128xf32>
    %cst_23 = arith.constant 1.000000e+00 : f32
    %105 = vector.broadcast %cst_23 : f32 to vector<8x128xf32>
    %106 = arith.addf %105, %104 : vector<8x128xf32>
    %107 = arith.divf %105, %106 : vector<8x128xf32>
    %108 = vector.extract_strided_slice %95 {offsets = [0, 256], sizes = [8, 128], strides = [1, 1]} : vector<8x512xf32> to vector<8x128xf32>
    %109 = math.tanh %108 : vector<8x128xf32>
    %110 = vector.extract_strided_slice %95 {offsets = [0, 384], sizes = [8, 128], strides = [1, 1]} : vector<8x512xf32> to vector<8x128xf32>
    %111 = arith.negf %110 : vector<8x128xf32>
    %112 = math.exp %111 : vector<8x128xf32>
    %cst_24 = arith.constant 1.000000e+00 : f32
    %113 = vector.broadcast %cst_24 : f32 to vector<8x128xf32>
    %114 = arith.addf %113, %112 : vector<8x128xf32>
    %115 = arith.divf %113, %114 : vector<8x128xf32>
    %116 = arith.mulf %107, %90 : vector<8x128xf32>
    %117 = arith.mulf %101, %109 : vector<8x128xf32>
    %118 = arith.addf %116, %117 : vector<8x128xf32>
    %119 = math.tanh %118 : vector<8x128xf32>
    %120 = arith.mulf %115, %119 : vector<8x128xf32>
    %121 = vector.extract_strided_slice %6 {offsets = [32, 0], sizes = [8, 512], strides = [1, 1]} : vector<64x512xf32> to vector<8x512xf32>
    %cst_25 = arith.constant dense<0.000000e+00> : vector<8x512xf32>
    %122 = tpu.matmul %120, %2, %cst_25 {dimension_numbers = #tpu.dot_dimension_numbers<[1], [0], [0], [1], [0, 0, 1, 1], [], []>} : vector<8x128xf32>, vector<128x512xf32>, vector<8x512xf32> -> vector<8x512xf32>
    %123 = arith.addf %121, %122 : vector<8x512xf32>
    %124 = vector.extract_strided_slice %123 {offsets = [0, 0], sizes = [8, 128], strides = [1, 1]} : vector<8x512xf32> to vector<8x128xf32>
    %125 = arith.negf %124 : vector<8x128xf32>
    %126 = math.exp %125 : vector<8x128xf32>
    %cst_26 = arith.constant 1.000000e+00 : f32
    %127 = vector.broadcast %cst_26 : f32 to vector<8x128xf32>
    %128 = arith.addf %127, %126 : vector<8x128xf32>
    %129 = arith.divf %127, %128 : vector<8x128xf32>
    %130 = vector.extract_strided_slice %123 {offsets = [0, 128], sizes = [8, 128], strides = [1, 1]} : vector<8x512xf32> to vector<8x128xf32>
    %131 = arith.negf %130 : vector<8x128xf32>
    %132 = math.exp %131 : vector<8x128xf32>
    %cst_27 = arith.constant 1.000000e+00 : f32
    %133 = vector.broadcast %cst_27 : f32 to vector<8x128xf32>
    %134 = arith.addf %133, %132 : vector<8x128xf32>
    %135 = arith.divf %133, %134 : vector<8x128xf32>
    %136 = vector.extract_strided_slice %123 {offsets = [0, 256], sizes = [8, 128], strides = [1, 1]} : vector<8x512xf32> to vector<8x128xf32>
    %137 = math.tanh %136 : vector<8x128xf32>
    %138 = vector.extract_strided_slice %123 {offsets = [0, 384], sizes = [8, 128], strides = [1, 1]} : vector<8x512xf32> to vector<8x128xf32>
    %139 = arith.negf %138 : vector<8x128xf32>
    %140 = math.exp %139 : vector<8x128xf32>
    %cst_28 = arith.constant 1.000000e+00 : f32
    %141 = vector.broadcast %cst_28 : f32 to vector<8x128xf32>
    %142 = arith.addf %141, %140 : vector<8x128xf32>
    %143 = arith.divf %141, %142 : vector<8x128xf32>
    %144 = arith.mulf %135, %118 : vector<8x128xf32>
    %145 = arith.mulf %129, %137 : vector<8x128xf32>
    %146 = arith.addf %144, %145 : vector<8x128xf32>
    %147 = math.tanh %146 : vector<8x128xf32>
    %148 = arith.mulf %143, %147 : vector<8x128xf32>
    %149 = vector.extract_strided_slice %6 {offsets = [40, 0], sizes = [8, 512], strides = [1, 1]} : vector<64x512xf32> to vector<8x512xf32>
    %cst_29 = arith.constant dense<0.000000e+00> : vector<8x512xf32>
    %150 = tpu.matmul %148, %2, %cst_29 {dimension_numbers = #tpu.dot_dimension_numbers<[1], [0], [0], [1], [0, 0, 1, 1], [], []>} : vector<8x128xf32>, vector<128x512xf32>, vector<8x512xf32> -> vector<8x512xf32>
    %151 = arith.addf %149, %150 : vector<8x512xf32>
    %152 = vector.extract_strided_slice %151 {offsets = [0, 0], sizes = [8, 128], strides = [1, 1]} : vector<8x512xf32> to vector<8x128xf32>
    %153 = arith.negf %152 : vector<8x128xf32>
    %154 = math.exp %153 : vector<8x128xf32>
    %cst_30 = arith.constant 1.000000e+00 : f32
    %155 = vector.broadcast %cst_30 : f32 to vector<8x128xf32>
    %156 = arith.addf %155, %154 : vector<8x128xf32>
    %157 = arith.divf %155, %156 : vector<8x128xf32>
    %158 = vector.extract_strided_slice %151 {offsets = [0, 128], sizes = [8, 128], strides = [1, 1]} : vector<8x512xf32> to vector<8x128xf32>
    %159 = arith.negf %158 : vector<8x128xf32>
    %160 = math.exp %159 : vector<8x128xf32>
    %cst_31 = arith.constant 1.000000e+00 : f32
    %161 = vector.broadcast %cst_31 : f32 to vector<8x128xf32>
    %162 = arith.addf %161, %160 : vector<8x128xf32>
    %163 = arith.divf %161, %162 : vector<8x128xf32>
    %164 = vector.extract_strided_slice %151 {offsets = [0, 256], sizes = [8, 128], strides = [1, 1]} : vector<8x512xf32> to vector<8x128xf32>
    %165 = math.tanh %164 : vector<8x128xf32>
    %166 = vector.extract_strided_slice %151 {offsets = [0, 384], sizes = [8, 128], strides = [1, 1]} : vector<8x512xf32> to vector<8x128xf32>
    %167 = arith.negf %166 : vector<8x128xf32>
    %168 = math.exp %167 : vector<8x128xf32>
    %cst_32 = arith.constant 1.000000e+00 : f32
    %169 = vector.broadcast %cst_32 : f32 to vector<8x128xf32>
    %170 = arith.addf %169, %168 : vector<8x128xf32>
    %171 = arith.divf %169, %170 : vector<8x128xf32>
    %172 = arith.mulf %163, %146 : vector<8x128xf32>
    %173 = arith.mulf %157, %165 : vector<8x128xf32>
    %174 = arith.addf %172, %173 : vector<8x128xf32>
    %175 = math.tanh %174 : vector<8x128xf32>
    %176 = arith.mulf %171, %175 : vector<8x128xf32>
    %177 = vector.extract_strided_slice %6 {offsets = [48, 0], sizes = [8, 512], strides = [1, 1]} : vector<64x512xf32> to vector<8x512xf32>
    %cst_33 = arith.constant dense<0.000000e+00> : vector<8x512xf32>
    %178 = tpu.matmul %176, %2, %cst_33 {dimension_numbers = #tpu.dot_dimension_numbers<[1], [0], [0], [1], [0, 0, 1, 1], [], []>} : vector<8x128xf32>, vector<128x512xf32>, vector<8x512xf32> -> vector<8x512xf32>
    %179 = arith.addf %177, %178 : vector<8x512xf32>
    %180 = vector.extract_strided_slice %179 {offsets = [0, 0], sizes = [8, 128], strides = [1, 1]} : vector<8x512xf32> to vector<8x128xf32>
    %181 = arith.negf %180 : vector<8x128xf32>
    %182 = math.exp %181 : vector<8x128xf32>
    %cst_34 = arith.constant 1.000000e+00 : f32
    %183 = vector.broadcast %cst_34 : f32 to vector<8x128xf32>
    %184 = arith.addf %183, %182 : vector<8x128xf32>
    %185 = arith.divf %183, %184 : vector<8x128xf32>
    %186 = vector.extract_strided_slice %179 {offsets = [0, 128], sizes = [8, 128], strides = [1, 1]} : vector<8x512xf32> to vector<8x128xf32>
    %187 = arith.negf %186 : vector<8x128xf32>
    %188 = math.exp %187 : vector<8x128xf32>
    %cst_35 = arith.constant 1.000000e+00 : f32
    %189 = vector.broadcast %cst_35 : f32 to vector<8x128xf32>
    %190 = arith.addf %189, %188 : vector<8x128xf32>
    %191 = arith.divf %189, %190 : vector<8x128xf32>
    %192 = vector.extract_strided_slice %179 {offsets = [0, 256], sizes = [8, 128], strides = [1, 1]} : vector<8x512xf32> to vector<8x128xf32>
    %193 = math.tanh %192 : vector<8x128xf32>
    %194 = vector.extract_strided_slice %179 {offsets = [0, 384], sizes = [8, 128], strides = [1, 1]} : vector<8x512xf32> to vector<8x128xf32>
    %195 = arith.negf %194 : vector<8x128xf32>
    %196 = math.exp %195 : vector<8x128xf32>
    %cst_36 = arith.constant 1.000000e+00 : f32
    %197 = vector.broadcast %cst_36 : f32 to vector<8x128xf32>
    %198 = arith.addf %197, %196 : vector<8x128xf32>
    %199 = arith.divf %197, %198 : vector<8x128xf32>
    %200 = arith.mulf %191, %174 : vector<8x128xf32>
    %201 = arith.mulf %185, %193 : vector<8x128xf32>
    %202 = arith.addf %200, %201 : vector<8x128xf32>
    %203 = math.tanh %202 : vector<8x128xf32>
    %204 = arith.mulf %199, %203 : vector<8x128xf32>
    %205 = vector.extract_strided_slice %6 {offsets = [56, 0], sizes = [8, 512], strides = [1, 1]} : vector<64x512xf32> to vector<8x512xf32>
    %cst_37 = arith.constant dense<0.000000e+00> : vector<8x512xf32>
    %206 = tpu.matmul %204, %2, %cst_37 {dimension_numbers = #tpu.dot_dimension_numbers<[1], [0], [0], [1], [0, 0, 1, 1], [], []>} : vector<8x128xf32>, vector<128x512xf32>, vector<8x512xf32> -> vector<8x512xf32>
    %207 = arith.addf %205, %206 : vector<8x512xf32>
    %208 = vector.extract_strided_slice %207 {offsets = [0, 0], sizes = [8, 128], strides = [1, 1]} : vector<8x512xf32> to vector<8x128xf32>
    %209 = arith.negf %208 : vector<8x128xf32>
    %210 = math.exp %209 : vector<8x128xf32>
    %cst_38 = arith.constant 1.000000e+00 : f32
    %211 = vector.broadcast %cst_38 : f32 to vector<8x128xf32>
    %212 = arith.addf %211, %210 : vector<8x128xf32>
    %213 = arith.divf %211, %212 : vector<8x128xf32>
    %214 = vector.extract_strided_slice %207 {offsets = [0, 128], sizes = [8, 128], strides = [1, 1]} : vector<8x512xf32> to vector<8x128xf32>
    %215 = arith.negf %214 : vector<8x128xf32>
    %216 = math.exp %215 : vector<8x128xf32>
    %cst_39 = arith.constant 1.000000e+00 : f32
    %217 = vector.broadcast %cst_39 : f32 to vector<8x128xf32>
    %218 = arith.addf %217, %216 : vector<8x128xf32>
    %219 = arith.divf %217, %218 : vector<8x128xf32>
    %220 = vector.extract_strided_slice %207 {offsets = [0, 256], sizes = [8, 128], strides = [1, 1]} : vector<8x512xf32> to vector<8x128xf32>
    %221 = math.tanh %220 : vector<8x128xf32>
    %222 = vector.extract_strided_slice %207 {offsets = [0, 384], sizes = [8, 128], strides = [1, 1]} : vector<8x512xf32> to vector<8x128xf32>
    %223 = arith.negf %222 : vector<8x128xf32>
    %224 = math.exp %223 : vector<8x128xf32>
    %cst_40 = arith.constant 1.000000e+00 : f32
    %225 = vector.broadcast %cst_40 : f32 to vector<8x128xf32>
    %226 = arith.addf %225, %224 : vector<8x128xf32>
    %227 = arith.divf %225, %226 : vector<8x128xf32>
    %228 = arith.mulf %219, %202 : vector<8x128xf32>
    %229 = arith.mulf %213, %221 : vector<8x128xf32>
    %230 = arith.addf %228, %229 : vector<8x128xf32>
    %231 = math.tanh %230 : vector<8x128xf32>
    %232 = arith.mulf %227, %231 : vector<8x128xf32>
    %233 = tpu.concatenate %36, %64, %92, %120, %148, %176, %204, %232 in 0 : vector<8x128xf32>, vector<8x128xf32>, vector<8x128xf32>, vector<8x128xf32>, vector<8x128xf32>, vector<8x128xf32>, vector<8x128xf32>, vector<8x128xf32> -> vector<64x128xf32>
    %234 = arith.negf %233 : vector<64x128xf32>
    %235 = math.exp %234 : vector<64x128xf32>
    %cst_41 = arith.constant 1.000000e+00 : f32
    %236 = vector.broadcast %cst_41 : f32 to vector<64x128xf32>
    %237 = arith.addf %236, %235 : vector<64x128xf32>
    %238 = arith.divf %236, %237 : vector<64x128xf32>
    %c0_42 = arith.constant 0 : index
    %c0_43 = arith.constant 0 : index
    %239 = vector.load %arg4[%c0_42, %c0_43] : memref<128x512xf32, #tpu.memory_space<vmem>>, vector<128x512xf32>
    %c0_44 = arith.constant 0 : index
    %c0_45 = arith.constant 0 : index
    %240 = vector.load %arg5[%c0_44, %c0_45] : memref<128x512xf32, #tpu.memory_space<vmem>>, vector<128x512xf32>
    %c0_46 = arith.constant 0 : index
    %c0_47 = arith.constant 0 : index
    %241 = vector.load %arg6[%c0_46, %c0_47] : memref<1x512xf32, #tpu.memory_space<vmem>>, vector<1x512xf32>
    %cst_48 = arith.constant dense<0.000000e+00> : vector<64x512xf32>
    %242 = tpu.matmul %238, %239, %cst_48 {dimension_numbers = #tpu.dot_dimension_numbers<[1], [0], [0], [1], [0, 0, 1, 1], [], []>} : vector<64x128xf32>, vector<128x512xf32>, vector<64x512xf32> -> vector<64x512xf32>
    %243 = vector.broadcast %241 : vector<1x512xf32> to vector<64x512xf32>
    %244 = arith.addf %242, %243 : vector<64x512xf32>
    %cst_49 = arith.constant 0.000000e+00 : f32
    %245 = vector.broadcast %cst_49 : f32 to vector<8x128xf32>
    %cst_50 = arith.constant 0.000000e+00 : f32
    %246 = vector.broadcast %cst_50 : f32 to vector<8x128xf32>
    %247 = vector.extract_strided_slice %244 {offsets = [0, 0], sizes = [8, 512], strides = [1, 1]} : vector<64x512xf32> to vector<8x512xf32>
    %cst_51 = arith.constant dense<0.000000e+00> : vector<8x512xf32>
    %248 = tpu.matmul %245, %240, %cst_51 {dimension_numbers = #tpu.dot_dimension_numbers<[1], [0], [0], [1], [0, 0, 1, 1], [], []>} : vector<8x128xf32>, vector<128x512xf32>, vector<8x512xf32> -> vector<8x512xf32>
    %249 = arith.addf %247, %248 : vector<8x512xf32>
    %250 = vector.extract_strided_slice %249 {offsets = [0, 0], sizes = [8, 128], strides = [1, 1]} : vector<8x512xf32> to vector<8x128xf32>
    %251 = arith.negf %250 : vector<8x128xf32>
    %252 = math.exp %251 : vector<8x128xf32>
    %cst_52 = arith.constant 1.000000e+00 : f32
    %253 = vector.broadcast %cst_52 : f32 to vector<8x128xf32>
    %254 = arith.addf %253, %252 : vector<8x128xf32>
    %255 = arith.divf %253, %254 : vector<8x128xf32>
    %256 = vector.extract_strided_slice %249 {offsets = [0, 128], sizes = [8, 128], strides = [1, 1]} : vector<8x512xf32> to vector<8x128xf32>
    %257 = arith.negf %256 : vector<8x128xf32>
    %258 = math.exp %257 : vector<8x128xf32>
    %cst_53 = arith.constant 1.000000e+00 : f32
    %259 = vector.broadcast %cst_53 : f32 to vector<8x128xf32>
    %260 = arith.addf %259, %258 : vector<8x128xf32>
    %261 = arith.divf %259, %260 : vector<8x128xf32>
    %262 = vector.extract_strided_slice %249 {offsets = [0, 256], sizes = [8, 128], strides = [1, 1]} : vector<8x512xf32> to vector<8x128xf32>
    %263 = math.tanh %262 : vector<8x128xf32>
    %264 = vector.extract_strided_slice %249 {offsets = [0, 384], sizes = [8, 128], strides = [1, 1]} : vector<8x512xf32> to vector<8x128xf32>
    %265 = arith.negf %264 : vector<8x128xf32>
    %266 = math.exp %265 : vector<8x128xf32>
    %cst_54 = arith.constant 1.000000e+00 : f32
    %267 = vector.broadcast %cst_54 : f32 to vector<8x128xf32>
    %268 = arith.addf %267, %266 : vector<8x128xf32>
    %269 = arith.divf %267, %268 : vector<8x128xf32>
    %270 = arith.mulf %261, %246 : vector<8x128xf32>
    %271 = arith.mulf %255, %263 : vector<8x128xf32>
    %272 = arith.addf %270, %271 : vector<8x128xf32>
    %273 = math.tanh %272 : vector<8x128xf32>
    %274 = arith.mulf %269, %273 : vector<8x128xf32>
    %275 = vector.extract_strided_slice %244 {offsets = [8, 0], sizes = [8, 512], strides = [1, 1]} : vector<64x512xf32> to vector<8x512xf32>
    %cst_55 = arith.constant dense<0.000000e+00> : vector<8x512xf32>
    %276 = tpu.matmul %274, %240, %cst_55 {dimension_numbers = #tpu.dot_dimension_numbers<[1], [0], [0], [1], [0, 0, 1, 1], [], []>} : vector<8x128xf32>, vector<128x512xf32>, vector<8x512xf32> -> vector<8x512xf32>
    %277 = arith.addf %275, %276 : vector<8x512xf32>
    %278 = vector.extract_strided_slice %277 {offsets = [0, 0], sizes = [8, 128], strides = [1, 1]} : vector<8x512xf32> to vector<8x128xf32>
    %279 = arith.negf %278 : vector<8x128xf32>
    %280 = math.exp %279 : vector<8x128xf32>
    %cst_56 = arith.constant 1.000000e+00 : f32
    %281 = vector.broadcast %cst_56 : f32 to vector<8x128xf32>
    %282 = arith.addf %281, %280 : vector<8x128xf32>
    %283 = arith.divf %281, %282 : vector<8x128xf32>
    %284 = vector.extract_strided_slice %277 {offsets = [0, 128], sizes = [8, 128], strides = [1, 1]} : vector<8x512xf32> to vector<8x128xf32>
    %285 = arith.negf %284 : vector<8x128xf32>
    %286 = math.exp %285 : vector<8x128xf32>
    %cst_57 = arith.constant 1.000000e+00 : f32
    %287 = vector.broadcast %cst_57 : f32 to vector<8x128xf32>
    %288 = arith.addf %287, %286 : vector<8x128xf32>
    %289 = arith.divf %287, %288 : vector<8x128xf32>
    %290 = vector.extract_strided_slice %277 {offsets = [0, 256], sizes = [8, 128], strides = [1, 1]} : vector<8x512xf32> to vector<8x128xf32>
    %291 = math.tanh %290 : vector<8x128xf32>
    %292 = vector.extract_strided_slice %277 {offsets = [0, 384], sizes = [8, 128], strides = [1, 1]} : vector<8x512xf32> to vector<8x128xf32>
    %293 = arith.negf %292 : vector<8x128xf32>
    %294 = math.exp %293 : vector<8x128xf32>
    %cst_58 = arith.constant 1.000000e+00 : f32
    %295 = vector.broadcast %cst_58 : f32 to vector<8x128xf32>
    %296 = arith.addf %295, %294 : vector<8x128xf32>
    %297 = arith.divf %295, %296 : vector<8x128xf32>
    %298 = arith.mulf %289, %272 : vector<8x128xf32>
    %299 = arith.mulf %283, %291 : vector<8x128xf32>
    %300 = arith.addf %298, %299 : vector<8x128xf32>
    %301 = math.tanh %300 : vector<8x128xf32>
    %302 = arith.mulf %297, %301 : vector<8x128xf32>
    %303 = vector.extract_strided_slice %244 {offsets = [16, 0], sizes = [8, 512], strides = [1, 1]} : vector<64x512xf32> to vector<8x512xf32>
    %cst_59 = arith.constant dense<0.000000e+00> : vector<8x512xf32>
    %304 = tpu.matmul %302, %240, %cst_59 {dimension_numbers = #tpu.dot_dimension_numbers<[1], [0], [0], [1], [0, 0, 1, 1], [], []>} : vector<8x128xf32>, vector<128x512xf32>, vector<8x512xf32> -> vector<8x512xf32>
    %305 = arith.addf %303, %304 : vector<8x512xf32>
    %306 = vector.extract_strided_slice %305 {offsets = [0, 0], sizes = [8, 128], strides = [1, 1]} : vector<8x512xf32> to vector<8x128xf32>
    %307 = arith.negf %306 : vector<8x128xf32>
    %308 = math.exp %307 : vector<8x128xf32>
    %cst_60 = arith.constant 1.000000e+00 : f32
    %309 = vector.broadcast %cst_60 : f32 to vector<8x128xf32>
    %310 = arith.addf %309, %308 : vector<8x128xf32>
    %311 = arith.divf %309, %310 : vector<8x128xf32>
    %312 = vector.extract_strided_slice %305 {offsets = [0, 128], sizes = [8, 128], strides = [1, 1]} : vector<8x512xf32> to vector<8x128xf32>
    %313 = arith.negf %312 : vector<8x128xf32>
    %314 = math.exp %313 : vector<8x128xf32>
    %cst_61 = arith.constant 1.000000e+00 : f32
    %315 = vector.broadcast %cst_61 : f32 to vector<8x128xf32>
    %316 = arith.addf %315, %314 : vector<8x128xf32>
    %317 = arith.divf %315, %316 : vector<8x128xf32>
    %318 = vector.extract_strided_slice %305 {offsets = [0, 256], sizes = [8, 128], strides = [1, 1]} : vector<8x512xf32> to vector<8x128xf32>
    %319 = math.tanh %318 : vector<8x128xf32>
    %320 = vector.extract_strided_slice %305 {offsets = [0, 384], sizes = [8, 128], strides = [1, 1]} : vector<8x512xf32> to vector<8x128xf32>
    %321 = arith.negf %320 : vector<8x128xf32>
    %322 = math.exp %321 : vector<8x128xf32>
    %cst_62 = arith.constant 1.000000e+00 : f32
    %323 = vector.broadcast %cst_62 : f32 to vector<8x128xf32>
    %324 = arith.addf %323, %322 : vector<8x128xf32>
    %325 = arith.divf %323, %324 : vector<8x128xf32>
    %326 = arith.mulf %317, %300 : vector<8x128xf32>
    %327 = arith.mulf %311, %319 : vector<8x128xf32>
    %328 = arith.addf %326, %327 : vector<8x128xf32>
    %329 = math.tanh %328 : vector<8x128xf32>
    %330 = arith.mulf %325, %329 : vector<8x128xf32>
    %331 = vector.extract_strided_slice %244 {offsets = [24, 0], sizes = [8, 512], strides = [1, 1]} : vector<64x512xf32> to vector<8x512xf32>
    %cst_63 = arith.constant dense<0.000000e+00> : vector<8x512xf32>
    %332 = tpu.matmul %330, %240, %cst_63 {dimension_numbers = #tpu.dot_dimension_numbers<[1], [0], [0], [1], [0, 0, 1, 1], [], []>} : vector<8x128xf32>, vector<128x512xf32>, vector<8x512xf32> -> vector<8x512xf32>
    %333 = arith.addf %331, %332 : vector<8x512xf32>
    %334 = vector.extract_strided_slice %333 {offsets = [0, 0], sizes = [8, 128], strides = [1, 1]} : vector<8x512xf32> to vector<8x128xf32>
    %335 = arith.negf %334 : vector<8x128xf32>
    %336 = math.exp %335 : vector<8x128xf32>
    %cst_64 = arith.constant 1.000000e+00 : f32
    %337 = vector.broadcast %cst_64 : f32 to vector<8x128xf32>
    %338 = arith.addf %337, %336 : vector<8x128xf32>
    %339 = arith.divf %337, %338 : vector<8x128xf32>
    %340 = vector.extract_strided_slice %333 {offsets = [0, 128], sizes = [8, 128], strides = [1, 1]} : vector<8x512xf32> to vector<8x128xf32>
    %341 = arith.negf %340 : vector<8x128xf32>
    %342 = math.exp %341 : vector<8x128xf32>
    %cst_65 = arith.constant 1.000000e+00 : f32
    %343 = vector.broadcast %cst_65 : f32 to vector<8x128xf32>
    %344 = arith.addf %343, %342 : vector<8x128xf32>
    %345 = arith.divf %343, %344 : vector<8x128xf32>
    %346 = vector.extract_strided_slice %333 {offsets = [0, 256], sizes = [8, 128], strides = [1, 1]} : vector<8x512xf32> to vector<8x128xf32>
    %347 = math.tanh %346 : vector<8x128xf32>
    %348 = vector.extract_strided_slice %333 {offsets = [0, 384], sizes = [8, 128], strides = [1, 1]} : vector<8x512xf32> to vector<8x128xf32>
    %349 = arith.negf %348 : vector<8x128xf32>
    %350 = math.exp %349 : vector<8x128xf32>
    %cst_66 = arith.constant 1.000000e+00 : f32
    %351 = vector.broadcast %cst_66 : f32 to vector<8x128xf32>
    %352 = arith.addf %351, %350 : vector<8x128xf32>
    %353 = arith.divf %351, %352 : vector<8x128xf32>
    %354 = arith.mulf %345, %328 : vector<8x128xf32>
    %355 = arith.mulf %339, %347 : vector<8x128xf32>
    %356 = arith.addf %354, %355 : vector<8x128xf32>
    %357 = math.tanh %356 : vector<8x128xf32>
    %358 = arith.mulf %353, %357 : vector<8x128xf32>
    %359 = vector.extract_strided_slice %244 {offsets = [32, 0], sizes = [8, 512], strides = [1, 1]} : vector<64x512xf32> to vector<8x512xf32>
    %cst_67 = arith.constant dense<0.000000e+00> : vector<8x512xf32>
    %360 = tpu.matmul %358, %240, %cst_67 {dimension_numbers = #tpu.dot_dimension_numbers<[1], [0], [0], [1], [0, 0, 1, 1], [], []>} : vector<8x128xf32>, vector<128x512xf32>, vector<8x512xf32> -> vector<8x512xf32>
    %361 = arith.addf %359, %360 : vector<8x512xf32>
    %362 = vector.extract_strided_slice %361 {offsets = [0, 0], sizes = [8, 128], strides = [1, 1]} : vector<8x512xf32> to vector<8x128xf32>
    %363 = arith.negf %362 : vector<8x128xf32>
    %364 = math.exp %363 : vector<8x128xf32>
    %cst_68 = arith.constant 1.000000e+00 : f32
    %365 = vector.broadcast %cst_68 : f32 to vector<8x128xf32>
    %366 = arith.addf %365, %364 : vector<8x128xf32>
    %367 = arith.divf %365, %366 : vector<8x128xf32>
    %368 = vector.extract_strided_slice %361 {offsets = [0, 128], sizes = [8, 128], strides = [1, 1]} : vector<8x512xf32> to vector<8x128xf32>
    %369 = arith.negf %368 : vector<8x128xf32>
    %370 = math.exp %369 : vector<8x128xf32>
    %cst_69 = arith.constant 1.000000e+00 : f32
    %371 = vector.broadcast %cst_69 : f32 to vector<8x128xf32>
    %372 = arith.addf %371, %370 : vector<8x128xf32>
    %373 = arith.divf %371, %372 : vector<8x128xf32>
    %374 = vector.extract_strided_slice %361 {offsets = [0, 256], sizes = [8, 128], strides = [1, 1]} : vector<8x512xf32> to vector<8x128xf32>
    %375 = math.tanh %374 : vector<8x128xf32>
    %376 = vector.extract_strided_slice %361 {offsets = [0, 384], sizes = [8, 128], strides = [1, 1]} : vector<8x512xf32> to vector<8x128xf32>
    %377 = arith.negf %376 : vector<8x128xf32>
    %378 = math.exp %377 : vector<8x128xf32>
    %cst_70 = arith.constant 1.000000e+00 : f32
    %379 = vector.broadcast %cst_70 : f32 to vector<8x128xf32>
    %380 = arith.addf %379, %378 : vector<8x128xf32>
    %381 = arith.divf %379, %380 : vector<8x128xf32>
    %382 = arith.mulf %373, %356 : vector<8x128xf32>
    %383 = arith.mulf %367, %375 : vector<8x128xf32>
    %384 = arith.addf %382, %383 : vector<8x128xf32>
    %385 = math.tanh %384 : vector<8x128xf32>
    %386 = arith.mulf %381, %385 : vector<8x128xf32>
    %387 = vector.extract_strided_slice %244 {offsets = [40, 0], sizes = [8, 512], strides = [1, 1]} : vector<64x512xf32> to vector<8x512xf32>
    %cst_71 = arith.constant dense<0.000000e+00> : vector<8x512xf32>
    %388 = tpu.matmul %386, %240, %cst_71 {dimension_numbers = #tpu.dot_dimension_numbers<[1], [0], [0], [1], [0, 0, 1, 1], [], []>} : vector<8x128xf32>, vector<128x512xf32>, vector<8x512xf32> -> vector<8x512xf32>
    %389 = arith.addf %387, %388 : vector<8x512xf32>
    %390 = vector.extract_strided_slice %389 {offsets = [0, 0], sizes = [8, 128], strides = [1, 1]} : vector<8x512xf32> to vector<8x128xf32>
    %391 = arith.negf %390 : vector<8x128xf32>
    %392 = math.exp %391 : vector<8x128xf32>
    %cst_72 = arith.constant 1.000000e+00 : f32
    %393 = vector.broadcast %cst_72 : f32 to vector<8x128xf32>
    %394 = arith.addf %393, %392 : vector<8x128xf32>
    %395 = arith.divf %393, %394 : vector<8x128xf32>
    %396 = vector.extract_strided_slice %389 {offsets = [0, 128], sizes = [8, 128], strides = [1, 1]} : vector<8x512xf32> to vector<8x128xf32>
    %397 = arith.negf %396 : vector<8x128xf32>
    %398 = math.exp %397 : vector<8x128xf32>
    %cst_73 = arith.constant 1.000000e+00 : f32
    %399 = vector.broadcast %cst_73 : f32 to vector<8x128xf32>
    %400 = arith.addf %399, %398 : vector<8x128xf32>
    %401 = arith.divf %399, %400 : vector<8x128xf32>
    %402 = vector.extract_strided_slice %389 {offsets = [0, 256], sizes = [8, 128], strides = [1, 1]} : vector<8x512xf32> to vector<8x128xf32>
    %403 = math.tanh %402 : vector<8x128xf32>
    %404 = vector.extract_strided_slice %389 {offsets = [0, 384], sizes = [8, 128], strides = [1, 1]} : vector<8x512xf32> to vector<8x128xf32>
    %405 = arith.negf %404 : vector<8x128xf32>
    %406 = math.exp %405 : vector<8x128xf32>
    %cst_74 = arith.constant 1.000000e+00 : f32
    %407 = vector.broadcast %cst_74 : f32 to vector<8x128xf32>
    %408 = arith.addf %407, %406 : vector<8x128xf32>
    %409 = arith.divf %407, %408 : vector<8x128xf32>
    %410 = arith.mulf %401, %384 : vector<8x128xf32>
    %411 = arith.mulf %395, %403 : vector<8x128xf32>
    %412 = arith.addf %410, %411 : vector<8x128xf32>
    %413 = math.tanh %412 : vector<8x128xf32>
    %414 = arith.mulf %409, %413 : vector<8x128xf32>
    %415 = vector.extract_strided_slice %244 {offsets = [48, 0], sizes = [8, 512], strides = [1, 1]} : vector<64x512xf32> to vector<8x512xf32>
    %cst_75 = arith.constant dense<0.000000e+00> : vector<8x512xf32>
    %416 = tpu.matmul %414, %240, %cst_75 {dimension_numbers = #tpu.dot_dimension_numbers<[1], [0], [0], [1], [0, 0, 1, 1], [], []>} : vector<8x128xf32>, vector<128x512xf32>, vector<8x512xf32> -> vector<8x512xf32>
    %417 = arith.addf %415, %416 : vector<8x512xf32>
    %418 = vector.extract_strided_slice %417 {offsets = [0, 0], sizes = [8, 128], strides = [1, 1]} : vector<8x512xf32> to vector<8x128xf32>
    %419 = arith.negf %418 : vector<8x128xf32>
    %420 = math.exp %419 : vector<8x128xf32>
    %cst_76 = arith.constant 1.000000e+00 : f32
    %421 = vector.broadcast %cst_76 : f32 to vector<8x128xf32>
    %422 = arith.addf %421, %420 : vector<8x128xf32>
    %423 = arith.divf %421, %422 : vector<8x128xf32>
    %424 = vector.extract_strided_slice %417 {offsets = [0, 128], sizes = [8, 128], strides = [1, 1]} : vector<8x512xf32> to vector<8x128xf32>
    %425 = arith.negf %424 : vector<8x128xf32>
    %426 = math.exp %425 : vector<8x128xf32>
    %cst_77 = arith.constant 1.000000e+00 : f32
    %427 = vector.broadcast %cst_77 : f32 to vector<8x128xf32>
    %428 = arith.addf %427, %426 : vector<8x128xf32>
    %429 = arith.divf %427, %428 : vector<8x128xf32>
    %430 = vector.extract_strided_slice %417 {offsets = [0, 256], sizes = [8, 128], strides = [1, 1]} : vector<8x512xf32> to vector<8x128xf32>
    %431 = math.tanh %430 : vector<8x128xf32>
    %432 = vector.extract_strided_slice %417 {offsets = [0, 384], sizes = [8, 128], strides = [1, 1]} : vector<8x512xf32> to vector<8x128xf32>
    %433 = arith.negf %432 : vector<8x128xf32>
    %434 = math.exp %433 : vector<8x128xf32>
    %cst_78 = arith.constant 1.000000e+00 : f32
    %435 = vector.broadcast %cst_78 : f32 to vector<8x128xf32>
    %436 = arith.addf %435, %434 : vector<8x128xf32>
    %437 = arith.divf %435, %436 : vector<8x128xf32>
    %438 = arith.mulf %429, %412 : vector<8x128xf32>
    %439 = arith.mulf %423, %431 : vector<8x128xf32>
    %440 = arith.addf %438, %439 : vector<8x128xf32>
    %441 = math.tanh %440 : vector<8x128xf32>
    %442 = arith.mulf %437, %441 : vector<8x128xf32>
    %443 = vector.extract_strided_slice %244 {offsets = [56, 0], sizes = [8, 512], strides = [1, 1]} : vector<64x512xf32> to vector<8x512xf32>
    %cst_79 = arith.constant dense<0.000000e+00> : vector<8x512xf32>
    %444 = tpu.matmul %442, %240, %cst_79 {dimension_numbers = #tpu.dot_dimension_numbers<[1], [0], [0], [1], [0, 0, 1, 1], [], []>} : vector<8x128xf32>, vector<128x512xf32>, vector<8x512xf32> -> vector<8x512xf32>
    %445 = arith.addf %443, %444 : vector<8x512xf32>
    %446 = vector.extract_strided_slice %445 {offsets = [0, 0], sizes = [8, 128], strides = [1, 1]} : vector<8x512xf32> to vector<8x128xf32>
    %447 = arith.negf %446 : vector<8x128xf32>
    %448 = math.exp %447 : vector<8x128xf32>
    %cst_80 = arith.constant 1.000000e+00 : f32
    %449 = vector.broadcast %cst_80 : f32 to vector<8x128xf32>
    %450 = arith.addf %449, %448 : vector<8x128xf32>
    %451 = arith.divf %449, %450 : vector<8x128xf32>
    %452 = vector.extract_strided_slice %445 {offsets = [0, 128], sizes = [8, 128], strides = [1, 1]} : vector<8x512xf32> to vector<8x128xf32>
    %453 = arith.negf %452 : vector<8x128xf32>
    %454 = math.exp %453 : vector<8x128xf32>
    %cst_81 = arith.constant 1.000000e+00 : f32
    %455 = vector.broadcast %cst_81 : f32 to vector<8x128xf32>
    %456 = arith.addf %455, %454 : vector<8x128xf32>
    %457 = arith.divf %455, %456 : vector<8x128xf32>
    %458 = vector.extract_strided_slice %445 {offsets = [0, 256], sizes = [8, 128], strides = [1, 1]} : vector<8x512xf32> to vector<8x128xf32>
    %459 = math.tanh %458 : vector<8x128xf32>
    %460 = vector.extract_strided_slice %445 {offsets = [0, 384], sizes = [8, 128], strides = [1, 1]} : vector<8x512xf32> to vector<8x128xf32>
    %461 = arith.negf %460 : vector<8x128xf32>
    %462 = math.exp %461 : vector<8x128xf32>
    %cst_82 = arith.constant 1.000000e+00 : f32
    %463 = vector.broadcast %cst_82 : f32 to vector<8x128xf32>
    %464 = arith.addf %463, %462 : vector<8x128xf32>
    %465 = arith.divf %463, %464 : vector<8x128xf32>
    %466 = arith.mulf %457, %440 : vector<8x128xf32>
    %467 = arith.mulf %451, %459 : vector<8x128xf32>
    %468 = arith.addf %466, %467 : vector<8x128xf32>
    %469 = math.tanh %468 : vector<8x128xf32>
    %470 = arith.mulf %465, %469 : vector<8x128xf32>
    %471 = tpu.concatenate %274, %302, %330, %358, %386, %414, %442, %470 in 0 : vector<8x128xf32>, vector<8x128xf32>, vector<8x128xf32>, vector<8x128xf32>, vector<8x128xf32>, vector<8x128xf32>, vector<8x128xf32>, vector<8x128xf32> -> vector<64x128xf32>
    %472 = arith.negf %471 : vector<64x128xf32>
    %473 = math.exp %472 : vector<64x128xf32>
    %cst_83 = arith.constant 1.000000e+00 : f32
    %474 = vector.broadcast %cst_83 : f32 to vector<64x128xf32>
    %475 = arith.addf %474, %473 : vector<64x128xf32>
    %476 = arith.divf %474, %475 : vector<64x128xf32>
    %c0_84 = arith.constant 0 : index
    %c0_85 = arith.constant 0 : index
    %477 = vector.load %arg7[%c0_84, %c0_85] : memref<128x512xf32, #tpu.memory_space<vmem>>, vector<128x512xf32>
    %c0_86 = arith.constant 0 : index
    %c0_87 = arith.constant 0 : index
    %478 = vector.load %arg8[%c0_86, %c0_87] : memref<128x512xf32, #tpu.memory_space<vmem>>, vector<128x512xf32>
    %c0_88 = arith.constant 0 : index
    %c0_89 = arith.constant 0 : index
    %479 = vector.load %arg9[%c0_88, %c0_89] : memref<1x512xf32, #tpu.memory_space<vmem>>, vector<1x512xf32>
    %cst_90 = arith.constant dense<0.000000e+00> : vector<64x512xf32>
    %480 = tpu.matmul %476, %477, %cst_90 {dimension_numbers = #tpu.dot_dimension_numbers<[1], [0], [0], [1], [0, 0, 1, 1], [], []>} : vector<64x128xf32>, vector<128x512xf32>, vector<64x512xf32> -> vector<64x512xf32>
    %481 = vector.broadcast %479 : vector<1x512xf32> to vector<64x512xf32>
    %482 = arith.addf %480, %481 : vector<64x512xf32>
    %cst_91 = arith.constant 0.000000e+00 : f32
    %483 = vector.broadcast %cst_91 : f32 to vector<8x128xf32>
    %cst_92 = arith.constant 0.000000e+00 : f32
    %484 = vector.broadcast %cst_92 : f32 to vector<8x128xf32>
    %485 = vector.extract_strided_slice %482 {offsets = [0, 0], sizes = [8, 512], strides = [1, 1]} : vector<64x512xf32> to vector<8x512xf32>
    %cst_93 = arith.constant dense<0.000000e+00> : vector<8x512xf32>
    %486 = tpu.matmul %483, %478, %cst_93 {dimension_numbers = #tpu.dot_dimension_numbers<[1], [0], [0], [1], [0, 0, 1, 1], [], []>} : vector<8x128xf32>, vector<128x512xf32>, vector<8x512xf32> -> vector<8x512xf32>
    %487 = arith.addf %485, %486 : vector<8x512xf32>
    %488 = vector.extract_strided_slice %487 {offsets = [0, 0], sizes = [8, 128], strides = [1, 1]} : vector<8x512xf32> to vector<8x128xf32>
    %489 = arith.negf %488 : vector<8x128xf32>
    %490 = math.exp %489 : vector<8x128xf32>
    %cst_94 = arith.constant 1.000000e+00 : f32
    %491 = vector.broadcast %cst_94 : f32 to vector<8x128xf32>
    %492 = arith.addf %491, %490 : vector<8x128xf32>
    %493 = arith.divf %491, %492 : vector<8x128xf32>
    %494 = vector.extract_strided_slice %487 {offsets = [0, 128], sizes = [8, 128], strides = [1, 1]} : vector<8x512xf32> to vector<8x128xf32>
    %495 = arith.negf %494 : vector<8x128xf32>
    %496 = math.exp %495 : vector<8x128xf32>
    %cst_95 = arith.constant 1.000000e+00 : f32
    %497 = vector.broadcast %cst_95 : f32 to vector<8x128xf32>
    %498 = arith.addf %497, %496 : vector<8x128xf32>
    %499 = arith.divf %497, %498 : vector<8x128xf32>
    %500 = vector.extract_strided_slice %487 {offsets = [0, 256], sizes = [8, 128], strides = [1, 1]} : vector<8x512xf32> to vector<8x128xf32>
    %501 = math.tanh %500 : vector<8x128xf32>
    %502 = vector.extract_strided_slice %487 {offsets = [0, 384], sizes = [8, 128], strides = [1, 1]} : vector<8x512xf32> to vector<8x128xf32>
    %503 = arith.negf %502 : vector<8x128xf32>
    %504 = math.exp %503 : vector<8x128xf32>
    %cst_96 = arith.constant 1.000000e+00 : f32
    %505 = vector.broadcast %cst_96 : f32 to vector<8x128xf32>
    %506 = arith.addf %505, %504 : vector<8x128xf32>
    %507 = arith.divf %505, %506 : vector<8x128xf32>
    %508 = arith.mulf %499, %484 : vector<8x128xf32>
    %509 = arith.mulf %493, %501 : vector<8x128xf32>
    %510 = arith.addf %508, %509 : vector<8x128xf32>
    %511 = math.tanh %510 : vector<8x128xf32>
    %512 = arith.mulf %507, %511 : vector<8x128xf32>
    %513 = vector.extract_strided_slice %482 {offsets = [8, 0], sizes = [8, 512], strides = [1, 1]} : vector<64x512xf32> to vector<8x512xf32>
    %cst_97 = arith.constant dense<0.000000e+00> : vector<8x512xf32>
    %514 = tpu.matmul %512, %478, %cst_97 {dimension_numbers = #tpu.dot_dimension_numbers<[1], [0], [0], [1], [0, 0, 1, 1], [], []>} : vector<8x128xf32>, vector<128x512xf32>, vector<8x512xf32> -> vector<8x512xf32>
    %515 = arith.addf %513, %514 : vector<8x512xf32>
    %516 = vector.extract_strided_slice %515 {offsets = [0, 0], sizes = [8, 128], strides = [1, 1]} : vector<8x512xf32> to vector<8x128xf32>
    %517 = arith.negf %516 : vector<8x128xf32>
    %518 = math.exp %517 : vector<8x128xf32>
    %cst_98 = arith.constant 1.000000e+00 : f32
    %519 = vector.broadcast %cst_98 : f32 to vector<8x128xf32>
    %520 = arith.addf %519, %518 : vector<8x128xf32>
    %521 = arith.divf %519, %520 : vector<8x128xf32>
    %522 = vector.extract_strided_slice %515 {offsets = [0, 128], sizes = [8, 128], strides = [1, 1]} : vector<8x512xf32> to vector<8x128xf32>
    %523 = arith.negf %522 : vector<8x128xf32>
    %524 = math.exp %523 : vector<8x128xf32>
    %cst_99 = arith.constant 1.000000e+00 : f32
    %525 = vector.broadcast %cst_99 : f32 to vector<8x128xf32>
    %526 = arith.addf %525, %524 : vector<8x128xf32>
    %527 = arith.divf %525, %526 : vector<8x128xf32>
    %528 = vector.extract_strided_slice %515 {offsets = [0, 256], sizes = [8, 128], strides = [1, 1]} : vector<8x512xf32> to vector<8x128xf32>
    %529 = math.tanh %528 : vector<8x128xf32>
    %530 = vector.extract_strided_slice %515 {offsets = [0, 384], sizes = [8, 128], strides = [1, 1]} : vector<8x512xf32> to vector<8x128xf32>
    %531 = arith.negf %530 : vector<8x128xf32>
    %532 = math.exp %531 : vector<8x128xf32>
    %cst_100 = arith.constant 1.000000e+00 : f32
    %533 = vector.broadcast %cst_100 : f32 to vector<8x128xf32>
    %534 = arith.addf %533, %532 : vector<8x128xf32>
    %535 = arith.divf %533, %534 : vector<8x128xf32>
    %536 = arith.mulf %527, %510 : vector<8x128xf32>
    %537 = arith.mulf %521, %529 : vector<8x128xf32>
    %538 = arith.addf %536, %537 : vector<8x128xf32>
    %539 = math.tanh %538 : vector<8x128xf32>
    %540 = arith.mulf %535, %539 : vector<8x128xf32>
    %541 = vector.extract_strided_slice %482 {offsets = [16, 0], sizes = [8, 512], strides = [1, 1]} : vector<64x512xf32> to vector<8x512xf32>
    %cst_101 = arith.constant dense<0.000000e+00> : vector<8x512xf32>
    %542 = tpu.matmul %540, %478, %cst_101 {dimension_numbers = #tpu.dot_dimension_numbers<[1], [0], [0], [1], [0, 0, 1, 1], [], []>} : vector<8x128xf32>, vector<128x512xf32>, vector<8x512xf32> -> vector<8x512xf32>
    %543 = arith.addf %541, %542 : vector<8x512xf32>
    %544 = vector.extract_strided_slice %543 {offsets = [0, 0], sizes = [8, 128], strides = [1, 1]} : vector<8x512xf32> to vector<8x128xf32>
    %545 = arith.negf %544 : vector<8x128xf32>
    %546 = math.exp %545 : vector<8x128xf32>
    %cst_102 = arith.constant 1.000000e+00 : f32
    %547 = vector.broadcast %cst_102 : f32 to vector<8x128xf32>
    %548 = arith.addf %547, %546 : vector<8x128xf32>
    %549 = arith.divf %547, %548 : vector<8x128xf32>
    %550 = vector.extract_strided_slice %543 {offsets = [0, 128], sizes = [8, 128], strides = [1, 1]} : vector<8x512xf32> to vector<8x128xf32>
    %551 = arith.negf %550 : vector<8x128xf32>
    %552 = math.exp %551 : vector<8x128xf32>
    %cst_103 = arith.constant 1.000000e+00 : f32
    %553 = vector.broadcast %cst_103 : f32 to vector<8x128xf32>
    %554 = arith.addf %553, %552 : vector<8x128xf32>
    %555 = arith.divf %553, %554 : vector<8x128xf32>
    %556 = vector.extract_strided_slice %543 {offsets = [0, 256], sizes = [8, 128], strides = [1, 1]} : vector<8x512xf32> to vector<8x128xf32>
    %557 = math.tanh %556 : vector<8x128xf32>
    %558 = vector.extract_strided_slice %543 {offsets = [0, 384], sizes = [8, 128], strides = [1, 1]} : vector<8x512xf32> to vector<8x128xf32>
    %559 = arith.negf %558 : vector<8x128xf32>
    %560 = math.exp %559 : vector<8x128xf32>
    %cst_104 = arith.constant 1.000000e+00 : f32
    %561 = vector.broadcast %cst_104 : f32 to vector<8x128xf32>
    %562 = arith.addf %561, %560 : vector<8x128xf32>
    %563 = arith.divf %561, %562 : vector<8x128xf32>
    %564 = arith.mulf %555, %538 : vector<8x128xf32>
    %565 = arith.mulf %549, %557 : vector<8x128xf32>
    %566 = arith.addf %564, %565 : vector<8x128xf32>
    %567 = math.tanh %566 : vector<8x128xf32>
    %568 = arith.mulf %563, %567 : vector<8x128xf32>
    %569 = vector.extract_strided_slice %482 {offsets = [24, 0], sizes = [8, 512], strides = [1, 1]} : vector<64x512xf32> to vector<8x512xf32>
    %cst_105 = arith.constant dense<0.000000e+00> : vector<8x512xf32>
    %570 = tpu.matmul %568, %478, %cst_105 {dimension_numbers = #tpu.dot_dimension_numbers<[1], [0], [0], [1], [0, 0, 1, 1], [], []>} : vector<8x128xf32>, vector<128x512xf32>, vector<8x512xf32> -> vector<8x512xf32>
    %571 = arith.addf %569, %570 : vector<8x512xf32>
    %572 = vector.extract_strided_slice %571 {offsets = [0, 0], sizes = [8, 128], strides = [1, 1]} : vector<8x512xf32> to vector<8x128xf32>
    %573 = arith.negf %572 : vector<8x128xf32>
    %574 = math.exp %573 : vector<8x128xf32>
    %cst_106 = arith.constant 1.000000e+00 : f32
    %575 = vector.broadcast %cst_106 : f32 to vector<8x128xf32>
    %576 = arith.addf %575, %574 : vector<8x128xf32>
    %577 = arith.divf %575, %576 : vector<8x128xf32>
    %578 = vector.extract_strided_slice %571 {offsets = [0, 128], sizes = [8, 128], strides = [1, 1]} : vector<8x512xf32> to vector<8x128xf32>
    %579 = arith.negf %578 : vector<8x128xf32>
    %580 = math.exp %579 : vector<8x128xf32>
    %cst_107 = arith.constant 1.000000e+00 : f32
    %581 = vector.broadcast %cst_107 : f32 to vector<8x128xf32>
    %582 = arith.addf %581, %580 : vector<8x128xf32>
    %583 = arith.divf %581, %582 : vector<8x128xf32>
    %584 = vector.extract_strided_slice %571 {offsets = [0, 256], sizes = [8, 128], strides = [1, 1]} : vector<8x512xf32> to vector<8x128xf32>
    %585 = math.tanh %584 : vector<8x128xf32>
    %586 = vector.extract_strided_slice %571 {offsets = [0, 384], sizes = [8, 128], strides = [1, 1]} : vector<8x512xf32> to vector<8x128xf32>
    %587 = arith.negf %586 : vector<8x128xf32>
    %588 = math.exp %587 : vector<8x128xf32>
    %cst_108 = arith.constant 1.000000e+00 : f32
    %589 = vector.broadcast %cst_108 : f32 to vector<8x128xf32>
    %590 = arith.addf %589, %588 : vector<8x128xf32>
    %591 = arith.divf %589, %590 : vector<8x128xf32>
    %592 = arith.mulf %583, %566 : vector<8x128xf32>
    %593 = arith.mulf %577, %585 : vector<8x128xf32>
    %594 = arith.addf %592, %593 : vector<8x128xf32>
    %595 = math.tanh %594 : vector<8x128xf32>
    %596 = arith.mulf %591, %595 : vector<8x128xf32>
    %597 = vector.extract_strided_slice %482 {offsets = [32, 0], sizes = [8, 512], strides = [1, 1]} : vector<64x512xf32> to vector<8x512xf32>
    %cst_109 = arith.constant dense<0.000000e+00> : vector<8x512xf32>
    %598 = tpu.matmul %596, %478, %cst_109 {dimension_numbers = #tpu.dot_dimension_numbers<[1], [0], [0], [1], [0, 0, 1, 1], [], []>} : vector<8x128xf32>, vector<128x512xf32>, vector<8x512xf32> -> vector<8x512xf32>
    %599 = arith.addf %597, %598 : vector<8x512xf32>
    %600 = vector.extract_strided_slice %599 {offsets = [0, 0], sizes = [8, 128], strides = [1, 1]} : vector<8x512xf32> to vector<8x128xf32>
    %601 = arith.negf %600 : vector<8x128xf32>
    %602 = math.exp %601 : vector<8x128xf32>
    %cst_110 = arith.constant 1.000000e+00 : f32
    %603 = vector.broadcast %cst_110 : f32 to vector<8x128xf32>
    %604 = arith.addf %603, %602 : vector<8x128xf32>
    %605 = arith.divf %603, %604 : vector<8x128xf32>
    %606 = vector.extract_strided_slice %599 {offsets = [0, 128], sizes = [8, 128], strides = [1, 1]} : vector<8x512xf32> to vector<8x128xf32>
    %607 = arith.negf %606 : vector<8x128xf32>
    %608 = math.exp %607 : vector<8x128xf32>
    %cst_111 = arith.constant 1.000000e+00 : f32
    %609 = vector.broadcast %cst_111 : f32 to vector<8x128xf32>
    %610 = arith.addf %609, %608 : vector<8x128xf32>
    %611 = arith.divf %609, %610 : vector<8x128xf32>
    %612 = vector.extract_strided_slice %599 {offsets = [0, 256], sizes = [8, 128], strides = [1, 1]} : vector<8x512xf32> to vector<8x128xf32>
    %613 = math.tanh %612 : vector<8x128xf32>
    %614 = vector.extract_strided_slice %599 {offsets = [0, 384], sizes = [8, 128], strides = [1, 1]} : vector<8x512xf32> to vector<8x128xf32>
    %615 = arith.negf %614 : vector<8x128xf32>
    %616 = math.exp %615 : vector<8x128xf32>
    %cst_112 = arith.constant 1.000000e+00 : f32
    %617 = vector.broadcast %cst_112 : f32 to vector<8x128xf32>
    %618 = arith.addf %617, %616 : vector<8x128xf32>
    %619 = arith.divf %617, %618 : vector<8x128xf32>
    %620 = arith.mulf %611, %594 : vector<8x128xf32>
    %621 = arith.mulf %605, %613 : vector<8x128xf32>
    %622 = arith.addf %620, %621 : vector<8x128xf32>
    %623 = math.tanh %622 : vector<8x128xf32>
    %624 = arith.mulf %619, %623 : vector<8x128xf32>
    %625 = vector.extract_strided_slice %482 {offsets = [40, 0], sizes = [8, 512], strides = [1, 1]} : vector<64x512xf32> to vector<8x512xf32>
    %cst_113 = arith.constant dense<0.000000e+00> : vector<8x512xf32>
    %626 = tpu.matmul %624, %478, %cst_113 {dimension_numbers = #tpu.dot_dimension_numbers<[1], [0], [0], [1], [0, 0, 1, 1], [], []>} : vector<8x128xf32>, vector<128x512xf32>, vector<8x512xf32> -> vector<8x512xf32>
    %627 = arith.addf %625, %626 : vector<8x512xf32>
    %628 = vector.extract_strided_slice %627 {offsets = [0, 0], sizes = [8, 128], strides = [1, 1]} : vector<8x512xf32> to vector<8x128xf32>
    %629 = arith.negf %628 : vector<8x128xf32>
    %630 = math.exp %629 : vector<8x128xf32>
    %cst_114 = arith.constant 1.000000e+00 : f32
    %631 = vector.broadcast %cst_114 : f32 to vector<8x128xf32>
    %632 = arith.addf %631, %630 : vector<8x128xf32>
    %633 = arith.divf %631, %632 : vector<8x128xf32>
    %634 = vector.extract_strided_slice %627 {offsets = [0, 128], sizes = [8, 128], strides = [1, 1]} : vector<8x512xf32> to vector<8x128xf32>
    %635 = arith.negf %634 : vector<8x128xf32>
    %636 = math.exp %635 : vector<8x128xf32>
    %cst_115 = arith.constant 1.000000e+00 : f32
    %637 = vector.broadcast %cst_115 : f32 to vector<8x128xf32>
    %638 = arith.addf %637, %636 : vector<8x128xf32>
    %639 = arith.divf %637, %638 : vector<8x128xf32>
    %640 = vector.extract_strided_slice %627 {offsets = [0, 256], sizes = [8, 128], strides = [1, 1]} : vector<8x512xf32> to vector<8x128xf32>
    %641 = math.tanh %640 : vector<8x128xf32>
    %642 = vector.extract_strided_slice %627 {offsets = [0, 384], sizes = [8, 128], strides = [1, 1]} : vector<8x512xf32> to vector<8x128xf32>
    %643 = arith.negf %642 : vector<8x128xf32>
    %644 = math.exp %643 : vector<8x128xf32>
    %cst_116 = arith.constant 1.000000e+00 : f32
    %645 = vector.broadcast %cst_116 : f32 to vector<8x128xf32>
    %646 = arith.addf %645, %644 : vector<8x128xf32>
    %647 = arith.divf %645, %646 : vector<8x128xf32>
    %648 = arith.mulf %639, %622 : vector<8x128xf32>
    %649 = arith.mulf %633, %641 : vector<8x128xf32>
    %650 = arith.addf %648, %649 : vector<8x128xf32>
    %651 = math.tanh %650 : vector<8x128xf32>
    %652 = arith.mulf %647, %651 : vector<8x128xf32>
    %653 = vector.extract_strided_slice %482 {offsets = [48, 0], sizes = [8, 512], strides = [1, 1]} : vector<64x512xf32> to vector<8x512xf32>
    %cst_117 = arith.constant dense<0.000000e+00> : vector<8x512xf32>
    %654 = tpu.matmul %652, %478, %cst_117 {dimension_numbers = #tpu.dot_dimension_numbers<[1], [0], [0], [1], [0, 0, 1, 1], [], []>} : vector<8x128xf32>, vector<128x512xf32>, vector<8x512xf32> -> vector<8x512xf32>
    %655 = arith.addf %653, %654 : vector<8x512xf32>
    %656 = vector.extract_strided_slice %655 {offsets = [0, 0], sizes = [8, 128], strides = [1, 1]} : vector<8x512xf32> to vector<8x128xf32>
    %657 = arith.negf %656 : vector<8x128xf32>
    %658 = math.exp %657 : vector<8x128xf32>
    %cst_118 = arith.constant 1.000000e+00 : f32
    %659 = vector.broadcast %cst_118 : f32 to vector<8x128xf32>
    %660 = arith.addf %659, %658 : vector<8x128xf32>
    %661 = arith.divf %659, %660 : vector<8x128xf32>
    %662 = vector.extract_strided_slice %655 {offsets = [0, 128], sizes = [8, 128], strides = [1, 1]} : vector<8x512xf32> to vector<8x128xf32>
    %663 = arith.negf %662 : vector<8x128xf32>
    %664 = math.exp %663 : vector<8x128xf32>
    %cst_119 = arith.constant 1.000000e+00 : f32
    %665 = vector.broadcast %cst_119 : f32 to vector<8x128xf32>
    %666 = arith.addf %665, %664 : vector<8x128xf32>
    %667 = arith.divf %665, %666 : vector<8x128xf32>
    %668 = vector.extract_strided_slice %655 {offsets = [0, 256], sizes = [8, 128], strides = [1, 1]} : vector<8x512xf32> to vector<8x128xf32>
    %669 = math.tanh %668 : vector<8x128xf32>
    %670 = vector.extract_strided_slice %655 {offsets = [0, 384], sizes = [8, 128], strides = [1, 1]} : vector<8x512xf32> to vector<8x128xf32>
    %671 = arith.negf %670 : vector<8x128xf32>
    %672 = math.exp %671 : vector<8x128xf32>
    %cst_120 = arith.constant 1.000000e+00 : f32
    %673 = vector.broadcast %cst_120 : f32 to vector<8x128xf32>
    %674 = arith.addf %673, %672 : vector<8x128xf32>
    %675 = arith.divf %673, %674 : vector<8x128xf32>
    %676 = arith.mulf %667, %650 : vector<8x128xf32>
    %677 = arith.mulf %661, %669 : vector<8x128xf32>
    %678 = arith.addf %676, %677 : vector<8x128xf32>
    %679 = math.tanh %678 : vector<8x128xf32>
    %680 = arith.mulf %675, %679 : vector<8x128xf32>
    %681 = vector.extract_strided_slice %482 {offsets = [56, 0], sizes = [8, 512], strides = [1, 1]} : vector<64x512xf32> to vector<8x512xf32>
    %cst_121 = arith.constant dense<0.000000e+00> : vector<8x512xf32>
    %682 = tpu.matmul %680, %478, %cst_121 {dimension_numbers = #tpu.dot_dimension_numbers<[1], [0], [0], [1], [0, 0, 1, 1], [], []>} : vector<8x128xf32>, vector<128x512xf32>, vector<8x512xf32> -> vector<8x512xf32>
    %683 = arith.addf %681, %682 : vector<8x512xf32>
    %684 = vector.extract_strided_slice %683 {offsets = [0, 0], sizes = [8, 128], strides = [1, 1]} : vector<8x512xf32> to vector<8x128xf32>
    %685 = arith.negf %684 : vector<8x128xf32>
    %686 = math.exp %685 : vector<8x128xf32>
    %cst_122 = arith.constant 1.000000e+00 : f32
    %687 = vector.broadcast %cst_122 : f32 to vector<8x128xf32>
    %688 = arith.addf %687, %686 : vector<8x128xf32>
    %689 = arith.divf %687, %688 : vector<8x128xf32>
    %690 = vector.extract_strided_slice %683 {offsets = [0, 128], sizes = [8, 128], strides = [1, 1]} : vector<8x512xf32> to vector<8x128xf32>
    %691 = arith.negf %690 : vector<8x128xf32>
    %692 = math.exp %691 : vector<8x128xf32>
    %cst_123 = arith.constant 1.000000e+00 : f32
    %693 = vector.broadcast %cst_123 : f32 to vector<8x128xf32>
    %694 = arith.addf %693, %692 : vector<8x128xf32>
    %695 = arith.divf %693, %694 : vector<8x128xf32>
    %696 = vector.extract_strided_slice %683 {offsets = [0, 256], sizes = [8, 128], strides = [1, 1]} : vector<8x512xf32> to vector<8x128xf32>
    %697 = math.tanh %696 : vector<8x128xf32>
    %698 = vector.extract_strided_slice %683 {offsets = [0, 384], sizes = [8, 128], strides = [1, 1]} : vector<8x512xf32> to vector<8x128xf32>
    %699 = arith.negf %698 : vector<8x128xf32>
    %700 = math.exp %699 : vector<8x128xf32>
    %cst_124 = arith.constant 1.000000e+00 : f32
    %701 = vector.broadcast %cst_124 : f32 to vector<8x128xf32>
    %702 = arith.addf %701, %700 : vector<8x128xf32>
    %703 = arith.divf %701, %702 : vector<8x128xf32>
    %704 = arith.mulf %695, %678 : vector<8x128xf32>
    %705 = arith.mulf %689, %697 : vector<8x128xf32>
    %706 = arith.addf %704, %705 : vector<8x128xf32>
    %707 = math.tanh %706 : vector<8x128xf32>
    %708 = arith.mulf %703, %707 : vector<8x128xf32>
    %709 = tpu.concatenate %512, %540, %568, %596, %624, %652, %680, %708 in 0 : vector<8x128xf32>, vector<8x128xf32>, vector<8x128xf32>, vector<8x128xf32>, vector<8x128xf32>, vector<8x128xf32>, vector<8x128xf32>, vector<8x128xf32> -> vector<64x128xf32>
    %c0_125 = arith.constant 0 : index
    %c0_126 = arith.constant 0 : index
    %710 = vector.load %arg10[%c0_125, %c0_126] : memref<64x128xf32, #tpu.memory_space<vmem>>, vector<64x128xf32>
    tpu.vector_store %arg10[%c0_125, %c0_126], %709 {strides = array<i32>} : memref<64x128xf32, #tpu.memory_space<vmem>>, vector<64x128xf32>,
    return
  }
}

</mosaic_0001>

<bundles_post_ra>
// kernel: decoder_forward.1
= control target key start
LH: loop header
LB: loop body
LE: loop exit
PB: predicated region body
PF: predicated region fallthrough
CT: control target
= control target key end

     0   :  { %15 = vsyncpa [#allocation3], 0  ;;  %s9595_s0 = inlined_call_operand.vmem [shape: f32[64,32], index: 0, kind: input, shape index: {}]   ;;  %s9596_s1 = inlined_call_operand.hbm [shape: f32[32,512], index: 1, kind: input, shape index: {}]   ;;  %s9597_s2 = inlined_call_operand.hbm [shape: f32[128,512], index: 2, kind: input, shape index: {}]   ;;  %s9598_s3 = inlined_call_operand.vmem [shape: f32[1,512], index: 3, kind: input, shape index: {}]   ;;  %s9599_s4 = inlined_call_operand.hbm [shape: f32[128,512], index: 4, kind: input, shape index: {}]   ;;  %s9600_s5 = inlined_call_operand.hbm [shape: f32[128,512], index: 5, kind: input, shape index: {}]   ;;  %s9601_s6 = inlined_call_operand.vmem [shape: f32[1,512], index: 6, kind: input, shape index: {}]   ;;  %s9602_s7 = inlined_call_operand.hbm [shape: f32[128,512], index: 7, kind: input, shape index: {}]   ;;  %s9603_s8 = inlined_call_operand.hbm [shape: f32[128,512], index: 8, kind: input, shape index: {}]   ;;  %s9604_s9 = inlined_call_operand.vmem [shape: f32[1,512], index: 9, kind: input, shape index: {}]   ;;  %s9605_s10 = inlined_call_operand.vmem [shape: f32[64,128], index: 10, kind: output, shape index: {}]  }
   0x1   :  { %16 = vsyncpa [#allocation5], 0 }
   0x2   :  { %17 = vsyncpa [#allocation8], 0 }
   0x3   :  { %18 = vsyncpa [#allocation11], 0  ;;  %s7995_s13 = smov [#allocation4]   ;;  %s7996_s15 = smov [#allocation7]  }
   0x4   :  { %s38_s14 = sshll.u32 %s7995_s13, 4  ;;  %s64_s16 = sshll.u32 %s7996_s15, 4  ;;  %s39_s14 = int_to_ptr.vmem [resolvable:$true] %s38_s14  ;;  %s8059_s16 = int_to_ptr.vmem [resolvable:$true] %s64_s16 }
   0x5   :  { %s7855_s19 = scalar_lea.hbm %s9597_s2, 8192 }
   0x6   :  { %p7856_p0 = scmp.ne.s32.totalorder %s9597_s2, %s7855_s19  ;;  %p7859_p1 = scmp.lt.u32.totalorder %s7855_s19, %s9597_s2 }
   0x8   :  { %p7861_p2 = pnand %p7859_p1, %p7856_p0 }
   0xa   :  { %7864 = shalt.err (!%p7861_p2)
}
   0xb   :  { %s7865_s24 = scalar_lea.vmem %s39_s14, 8192  ;;  %p7870_p4 = scmp.lt.s32.totalorder %s39_s14, %s39_s14 }
   0xc   :  { %p7866_p3 = scmp.ne.s32.totalorder %s39_s14, %s7865_s24  ;;  %p7871_p5 = scmp.lt.s32.totalorder %s7865_s24, %s7865_s24 }
   0xe   :  { %p7872_p6 = por %p7871_p5, %p7870_p4 }
  0x10   :  { %p7873_p7 = pnand %p7872_p6, %p7866_p3 }
  0x12   :  { %7876 = shalt.err (!%p7873_p7)
}
  0x13   :  { %s7997_s25 = smov 512   ;;  %s7998_s26 = smov 32  }
  0x14   :  { %44 = dma.hbm_to_vmem [thread:$0]  %s9597_s2, 8192, %s39_s14, [#allocation5], %s7997_s25, %s7997_s25, %s7998_s26  }
  0x15   :  { %s7877_s11 = scalar_lea.hbm %s9600_s5, 8192 }
  0x16   :  { %p7878_p8 = scmp.ne.s32.totalorder %s9600_s5, %s7877_s11  ;;  %p7881_p9 = scmp.lt.u32.totalorder %s7877_s11, %s9600_s5 }
  0x18   :  { %p7883_p10 = pnand %p7881_p9, %p7878_p8 }
  0x1a   :  { %7886 = shalt.err (!%p7883_p10)
}
  0x1b   :  { %s7887_s18 = scalar_lea.vmem %s8059_s16, 8192  ;;  %p7892_p12 = scmp.lt.s32.totalorder %s8059_s16, %s8059_s16 }
  0x1c   :  { %p7888_p11 = scmp.ne.s32.totalorder %s8059_s16, %s7887_s18  ;;  %p7893_p13 = scmp.lt.s32.totalorder %s7887_s18, %s7887_s18 }
  0x1e   :  { %p7894_p0 = por %p7893_p13, %p7892_p12 }
  0x20   :  { %p7895_p1 = pnand %p7894_p0, %p7888_p11 }
  0x22   :  { %7898 = shalt.err (!%p7895_p1)
}
  0x23   :  { %70 = dma.hbm_to_vmem [thread:$0]  %s9600_s5, 8192, %s8059_s16, [#allocation8], %s7997_s25, %s7997_s25, %s7998_s26  }
  0x24   :  { %s7999_s19 = smov [#allocation2]   ;;  %s8000_s21 = smov [#allocation6]  }
  0x25   :  { %s26_s20 = sshll.u32 %s7999_s19, 4  ;;  %s52_s22 = sshll.u32 %s8000_s21, 4  ;;  %s27_s20 = int_to_ptr.vmem [resolvable:$true] %s26_s20  ;;  %s8096_s22 = int_to_ptr.vmem [resolvable:$true] %s52_s22 }
  0x26   :  { %s7899_s27 = scalar_lea.hbm %s9596_s1, 2048 }
  0x27   :  { %p7900_p2 = scmp.ne.s32.totalorder %s9596_s1, %s7899_s27  ;;  %p7903_p3 = scmp.lt.u32.totalorder %s7899_s27, %s9596_s1 }
  0x29   :  { %p7905_p4 = pnand %p7903_p3, %p7900_p2 }
  0x2b   :  { %7908 = shalt.err (!%p7905_p4)
}
  0x2c   :  { %s7909_s5 = scalar_lea.vmem %s27_s20, 2048  ;;  %p7914_p6 = scmp.lt.s32.totalorder %s27_s20, %s27_s20 }
  0x2d   :  { %p7910_p5 = scmp.ne.s32.totalorder %s27_s20, %s7909_s5  ;;  %p7915_p7 = scmp.lt.s32.totalorder %s7909_s5, %s7909_s5 }
  0x2f   :  { %p7916_p8 = por %p7915_p7, %p7914_p6 }
  0x31   :  { %p7917_p9 = pnand %p7916_p8, %p7910_p5 }
  0x33   :  { %7920 = shalt.err (!%p7917_p9)
}
  0x34   :  { %32 = dma.hbm_to_vmem [thread:$0]  %s9596_s1, 2048, %s27_s20, [#allocation3], %s7997_s25, %s7997_s25, %s7998_s26  }
  0x35   :  { %s7921_s17 = scalar_lea.hbm %s9599_s4, 8192 }
  0x36   :  { %p7922_p10 = scmp.ne.s32.totalorder %s9599_s4, %s7921_s17  ;;  %p7925_p11 = scmp.lt.u32.totalorder %s7921_s17, %s9599_s4 }
  0x38   :  { %p7927_p12 = pnand %p7925_p11, %p7922_p10 }
  0x3a   :  { %7930 = shalt.err (!%p7927_p12)
}
  0x3b   :  { %s7931_s21 = scalar_lea.vmem %s8096_s22, 8192  ;;  %p7936_p0 = scmp.lt.s32.totalorder %s8096_s22, %s8096_s22 }
  0x3c   :  { %p7932_p13 = scmp.ne.s32.totalorder %s8096_s22, %s7931_s21  ;;  %p7937_p1 = scmp.lt.s32.totalorder %s7931_s21, %s7931_s21 }
  0x3e   :  { %p7938_p2 = por %p7937_p1, %p7936_p0 }
  0x40   :  { %p7939_p3 = pnand %p7938_p2, %p7932_p13 }
  0x42   :  { %7942 = shalt.err (!%p7939_p3)
}
  0x43   :  { %58 = dma.hbm_to_vmem [thread:$0]  %s9599_s4, 8192, %s8096_s22, [#allocation5], %s7997_s25, %s7997_s25, %s7998_s26  }
  0x44   :  { %s8001_s23 = smov [#allocation9]   ;;  %s8002_s27 = smov [#allocation10]  }
  0x45   :  { %s78_s24 = sshll.u32 %s8001_s23, 4  ;;  %s90_s28 = sshll.u32 %s8002_s27, 4  ;;  %s79_s24 = int_to_ptr.vmem [resolvable:$true] %s78_s24  ;;  %s8133_s28 = int_to_ptr.vmem [resolvable:$true] %s90_s28 }
  0x46   :  { %s7943_s11 = scalar_lea.hbm %s9602_s7, 8192 }
  0x47   :  { %p7944_p4 = scmp.ne.s32.totalorder %s9602_s7, %s7943_s11  ;;  %p7947_p5 = scmp.lt.u32.totalorder %s7943_s11, %s9602_s7 }
  0x49   :  { %p7949_p6 = pnand %p7947_p5, %p7944_p4 }
  0x4b   :  { %7952 = shalt.err (!%p7949_p6)
}
  0x4c   :  { %s7953_s4 = scalar_lea.vmem %s79_s24, 8192  ;;  %p7958_p8 = scmp.lt.s32.totalorder %s79_s24, %s79_s24 }
  0x4d   :  { %p7954_p7 = scmp.ne.s32.totalorder %s79_s24, %s7953_s4  ;;  %p7959_p9 = scmp.lt.s32.totalorder %s7953_s4, %s7953_s4 }
  0x4f   :  { %p7960_p10 = por %p7959_p9, %p7958_p8 }
  0x51   :  { %p7961_p11 = pnand %p7960_p10, %p7954_p7 }
  0x53   :  { %7964 = shalt.err (!%p7961_p11)
}
  0x54   :  { %84 = dma.hbm_to_vmem [thread:$0]  %s9602_s7, 8192, %s79_s24, [#allocation8], %s7997_s25, %s7997_s25, %s7998_s26  }
  0x55   :  { %s7965_s2 = scalar_lea.hbm %s9603_s8, 8192 }
  0x56   :  { %p7966_p12 = scmp.ne.s32.totalorder %s9603_s8, %s7965_s2  ;;  %p7969_p13 = scmp.lt.u32.totalorder %s7965_s2, %s9603_s8 }
  0x58   :  { %p7971_p0 = pnand %p7969_p13, %p7966_p12 }
  0x5a   :  { %7974 = shalt.err (!%p7971_p0)
}
  0x5b   :  { %s7975_s20 = scalar_lea.vmem %s8133_s28, 8192  ;;  %p7980_p2 = scmp.lt.s32.totalorder %s8133_s28, %s8133_s28 }
  0x5c   :  { %p7976_p1 = scmp.ne.s32.totalorder %s8133_s28, %s7975_s20  ;;  %p7981_p3 = scmp.lt.s32.totalorder %s7975_s20, %s7975_s20 }
  0x5e   :  { %p7982_p4 = por %p7981_p3, %p7980_p2 }
  0x60   :  { %p7983_p5 = pnand %p7982_p4, %p7976_p1 }
  0x62   :  { %7986 = shalt.err (!%p7983_p5)
}
  0x63   :  { %96 = dma.hbm_to_vmem [thread:$0]  %s9603_s8, 8192, %s8133_s28, [#allocation11], %s7997_s25, %s7997_s25, %s7998_s26  }
  0x64   :  { %7987 = dma.done.wait [#allocation3], 2048  }
  0x65   :  { %7988 = vsyncadd [#allocation3], 4294965248 }
  0x66   :  { %7989 = dma.done.wait [#allocation5], 16384  }
  0x67   :  { %7990 = vsyncadd [#allocation5], 4294950912 }
  0x68   :  { %7991 = dma.done.wait [#allocation8], 16384  }
  0x69   :  { %7992 = vsyncadd [#allocation8], 4294950912 }
  0x6a   :  { %7993 = dma.done.wait [#allocation11], 8192  }
  0x6b   :  { %7994 = vsyncadd [#allocation11], 4294959104  ;;  %v8003_v0 = vmov 0.0   ;;  %v126_v1 = vld [vmem:[#allocation2 + $0x8] sm:$0xff]  ;;  %v128_v3 = vld [vmem:[#allocation2 + $0x18] sm:$0xff]  ;;  %vm227_vm0 = vcmask 261120  }
  0x6c   :  { %316 = vmatprep.mubr.f32.mxu0 %v8003_v0  ;;  %429 = vmatprep.mubr.f32.mxu1 %v8003_v0  ;;  %v130_v2 = vld [vmem:[#allocation2 + $0x28] sm:$0xff]  ;;  %v132_v5 = vld [vmem:[#allocation2 + $0x38] sm:$0xff]  ;;  %v125_v6 = vld [vmem:[#allocation2] sm:$0xff] }
  0x6d   :  { %v5526_v4 = vpack.c.bf16 %v130_v2, %v126_v1  ;;  %v129_v7 = vld [vmem:[#allocation2 + $0x20] sm:$0xff]  ;;  %v5534_v8 = vpack.c.bf16 %v132_v5, %v128_v3  ;;  %v127_v10 = vld [vmem:[#allocation2 + $0x10] sm:$0xff]  ;;  %v134_v12 = vld [vmem:[#allocation2 + $0x48] sm:$0xff] }
  0x6e   :  { %v5528_v9 = vpack.c.bf16 %v129_v7, %v125_v6  ;;  %v131_v11 = vld [vmem:[#allocation2 + $0x30] sm:$0xff]  ;;  %v138_v14 = vld [vmem:[#allocation2 + $0x68] sm:$0xff]  ;;  %v136_v15 = vld [vmem:[#allocation2 + $0x58] sm:$0xff] }
  0x6f   :  { %5527 = vmatprep.subr.bf16.mxu0 %v5526_v4  ;;  %v5536_v13 = vpack.c.bf16 %v131_v11, %v127_v10  ;;  %v140_v16 = vld [vmem:[#allocation2 + $0x78] sm:$0xff]  ;;  %5535 = vmatprep.subr.bf16.mxu1 %v5534_v8  ;;  %v5530_v17 = vpack.c.bf16 %v138_v14, %v134_v12  ;;  %v133_v19 = vld [vmem:[#allocation2 + $0x40] sm:$0xff]  ;;  %v135_v21 = vld [vmem:[#allocation2 + $0x50] sm:$0xff] }
  0x70   :  { %5529 = vmatpush1.bf16.msra.mxu0 %v5528_v9  ;;  %v5538_v18 = vpack.c.bf16 %v140_v16, %v136_v15  ;;  %v137_v20 = vld [vmem:[#allocation2 + $0x60] sm:$0xff]  ;;  %v139_v23 = vld [vmem:[#allocation2 + $0x70] sm:$0xff]  ;;  %v142_v24 = vld [vmem:[#allocation4 + $0x8] sm:$0xff] }
  0x71   :  { %5537 = vmatpush1.bf16.msra.mxu1 %v5536_v13  ;;  %v5532_v22 = vpack.c.bf16 %v137_v20, %v133_v19  ;;  %5531 = vmatprep.subr.bf16.mxu0 %v5530_v17  ;;  %v5540_v25 = vpack.c.bf16 %v139_v23, %v135_v21  ;;  %v146_v26 = vld [vmem:[#allocation4 + $0x28] sm:$0xff]  ;;  %v144_v27 = vld [vmem:[#allocation4 + $0x18] sm:$0xff]  ;;  %v141_v31 = vld [vmem:[#allocation4] sm:$0xff] }
  0x72   :  { %5539 = vmatprep.subr.bf16.mxu1 %v5538_v18  ;;  %v148_v28 = vld [vmem:[#allocation4 + $0x38] sm:$0xff]  ;;  %v8172_v29 = vpack.c.bf16 %v146_v26, %v142_v24  ;;  %v145_v32 = vld [vmem:[#allocation4 + $0x20] sm:$0xff]  ;;  %v143_v33 = vld [vmem:[#allocation4 + $0x10] sm:$0xff] }
  0x73   :  { %v8174_v30 = vpack.c.bf16 %v148_v28, %v144_v27  ;;  %v117_v34 = vld [vmem:[%s9595_s0] sm:$0xff]  ;;  %v8179_v35 = vpack.c.bf16 %v145_v32, %v141_v31  ;;  %v147_v36 = vld [vmem:[#allocation4 + $0x30] sm:$0xff]  ;;  %v150_v37 = vld [vmem:[#allocation4 + $0x48] sm:$0xff] }
  0x74   :  { %5533 = vmatpush1.bf16.msra.mxu0 %v5532_v22  ;;  %v8182_v38 = vpack.c.bf16 %v147_v36, %v143_v33  ;;  %v154_v39 = vld [vmem:[#allocation4 + $0x68] sm:$0xff]  ;;  %v152_v40 = vld [vmem:[#allocation4 + $0x58] sm:$0xff]  ;;  %v149_v43 = vld [vmem:[#allocation4 + $0x40] sm:$0xff] }
  0x75   :  { %5541 = vmatpush1.bf16.msra.mxu1 %v5540_v25  ;;  %5543 = vmatprep.subr.bf16.mxu0 %v8172_v29  ;;  %v156_v41 = vld [vmem:[#allocation4 + $0x78] sm:$0xff]  ;;  %v8185_v42 = vpack.c.bf16 %v154_v39, %v150_v37  ;;  %v153_v44 = vld [vmem:[#allocation4 + $0x60] sm:$0xff]  ;;  %v151_v45 = vld [vmem:[#allocation4 + $0x50] sm:$0xff] }
  0x76   :  { %5575 = vmatprep.subr.bf16.mxu1 %v8174_v30  ;;  %v118_v46 = vld [vmem:[%s9595_s0 + $0x8] sm:$0xff]  ;;  %v8191_v47 = vpack.c.bf16 %v156_v41, %v152_v40  ;;  %v155_v48 = vld [vmem:[#allocation4 + $0x70] sm:$0xff]  ;;  %v8195_v50 = vpack.c.bf16 %v153_v44, %v149_v43  ;;  %v160_v52 = vld [vmem:[#allocation4 + $0x98] sm:$0xff] }
  0x77   :  { %5422 = vmatmul.mubr.msk.f32.vlgmr.msra.gmra.mrb[0].mxu0 %vm227_vm0, %v117_v34  ;;  %v158_v49 = vld [vmem:[#allocation4 + $0x88] sm:$0xff]  ;;  %v164_v53 = vld [vmem:[#allocation4 + $0xb8] sm:$0xff]  ;;  %v8199_v54 = vpack.c.bf16 %v155_v48, %v151_v45  ;;  %v157_v55 = vld [vmem:[#allocation4 + $0x80] sm:$0xff] }
  0x78   :  { %5430 = vmatmul.mubr.msk.f32.vlgmr.msra.gmra.mrb[0].mxu1 %vm227_vm0, %v117_v34  ;;  %5545 = vmatpush1.bf16.msra.mxu0 %v8179_v35  ;;  %v162_v51 = vld [vmem:[#allocation4 + $0xa8] sm:$0xff]  ;;  %v161_v56 = vld [vmem:[#allocation4 + $0xa0] sm:$0xff]  ;;  %v159_v58 = vld [vmem:[#allocation4 + $0x90] sm:$0xff]  ;;  %v8207_v60 = vpack.c.bf16 %v164_v53, %v160_v52 }
  0x79   :  { %5577 = vmatpush1.bf16.msra.mxu1 %v8182_v38  ;;  %322 = vmatprep.mubr.f32.mxu0 %v8003_v0  ;;  %v8203_v57 = vpack.c.bf16 %v162_v51, %v158_v49  ;;  %v163_v59 = vld [vmem:[#allocation4 + $0xb0] sm:$0xff]  ;;  %v166_v61 = vld [vmem:[#allocation4 + $0xc8] sm:$0xff]  ;;  %v8214_v1 = vpack.c.bf16 %v161_v56, %v157_v55  ;;  %v168_v2 = vld [vmem:[#allocation4 + $0xd8] sm:$0xff] }
  0x7a   :  { %435 = vmatprep.mubr.f32.mxu1 %v8003_v0  ;;  %5547 = vmatprep.subr.bf16.mxu0 %v8185_v42  ;;  %v170_v62 = vld [vmem:[#allocation4 + $0xe8] sm:$0xff]  ;;  %v119_v63 = vld [vmem:[%s9595_s0 + $0x10] sm:$0xff]  ;;  %v172_v3 = vld [vmem:[#allocation4 + $0xf8] sm:$0xff]  ;;  %v8218_v4 = vpack.c.bf16 %v163_v59, %v159_v58 }
  0x7b   :  { %5423 = vmatmul.mubr.msk.f32.gmra.mrb[2].mxu0 %vm227_vm0, %v118_v46  ;;  %5579 = vmatprep.subr.bf16.mxu1 %v8191_v47  ;;  %v165_v5 = vld [vmem:[#allocation4 + $0xc0] sm:$0xff]  ;;  %v8222_v7 = vpack.c.bf16 %v170_v62, %v166_v61  ;;  %v167_v8 = vld [vmem:[#allocation4 + $0xd0] sm:$0xff]  ;;  %v8226_v10 = vpack.c.bf16 %v172_v3, %v168_v2  ;;  %v174_v11 = vld [vmem:[#allocation4 + $0x108] sm:$0xff] }
  0x7c   :  { %5431 = vmatmul.mubr.msk.f32.gmra.mrb[2].mxu1 %vm227_vm0, %v118_v46  ;;  %5549 = vmatpush1.bf16.msra.mxu0 %v8195_v50  ;;  %v169_v6 = vld [vmem:[#allocation4 + $0xe0] sm:$0xff]  ;;  %v171_v9 = vld [vmem:[#allocation4 + $0xf0] sm:$0xff]  ;;  %v178_v12 = vld [vmem:[#allocation4 + $0x128] sm:$0xff] }
  0x7d   :  { %5581 = vmatpush1.bf16.msra.mxu1 %v8199_v54  ;;  %328 = vmatprep.mubr.f32.mxu0 %v8003_v0  ;;  %v120_v13 = vld [vmem:[%s9595_s0 + $0x18] sm:$0xff]  ;;  %v8233_v14 = vpack.c.bf16 %v169_v6, %v165_v5  ;;  %v8237_v17 = vpack.c.bf16 %v171_v9, %v167_v8  ;;  %v173_v18 = vld [vmem:[#allocation4 + $0x100] sm:$0xff]  ;;  %v8241_v20 = vpack.c.bf16 %v178_v12, %v174_v11  ;;  %v175_v21 = vld [vmem:[#allocation4 + $0x110] sm:$0xff] }
  0x7e   :  { %441 = vmatprep.mubr.f32.mxu1 %v8003_v0  ;;  %5551 = vmatprep.subr.bf16.mxu0 %v8203_v57  ;;  %v176_v15 = vld [vmem:[#allocation4 + $0x118] sm:$0xff]  ;;  %v177_v19 = vld [vmem:[#allocation4 + $0x120] sm:$0xff]  ;;  %v179_v22 = vld [vmem:[#allocation4 + $0x130] sm:$0xff] }
  0x7f   :  { %5424 = vmatmul.mubr.msk.f32.gmra.mrb[4].mxu0 %vm227_vm0, %v119_v63  ;;  %5583 = vmatprep.subr.bf16.mxu1 %v8207_v60  ;;  %v180_v16 = vld [vmem:[#allocation4 + $0x138] sm:$0xff]  ;;  %v182_v24 = vld [vmem:[#allocation4 + $0x148] sm:$0xff]  ;;  %v121_v26 = vld [vmem:[%s9595_s0 + $0x20] sm:$0xff]  ;;  %v8252_v27 = vpack.c.bf16 %v177_v19, %v173_v18  ;;  %v8256_v32 = vpack.c.bf16 %v179_v22, %v175_v21  ;;  %v207_v19 = vlaneseq }
  0x80   :  { %5432 = vmatmul.mubr.msk.f32.gmra.mrb[4].mxu1 %vm227_vm0, %v119_v63  ;;  %5553 = vmatpush1.bf16.msra.mxu0 %v8214_v1  ;;  %v8245_v23 = vpack.c.bf16 %v180_v16, %v176_v15  ;;  %v186_v25 = vld [vmem:[#allocation4 + $0x168] sm:$0xff]  ;;  %v184_v28 = vld [vmem:[#allocation4 + $0x158] sm:$0xff]  ;;  %v181_v33 = vld [vmem:[#allocation4 + $0x140] sm:$0xff] }
  0x81   :  { %5585 = vmatpush1.bf16.msra.mxu1 %v8218_v4  ;;  %334 = vmatprep.mubr.f32.mxu0 %v8003_v0  ;;  %v188_v31 = vld [vmem:[#allocation4 + $0x178] sm:$0xff]  ;;  %v185_v34 = vld [vmem:[#allocation4 + $0x160] sm:$0xff]  ;;  %v8260_v36 = vpack.c.bf16 %v186_v25, %v182_v24  ;;  %v183_v37 = vld [vmem:[#allocation4 + $0x150] sm:$0xff]  ;;  %v208_v21 = vshrl.u32 %v207_v19, 7 }
  0x82   :  { %447 = vmatprep.mubr.f32.mxu1 %v8003_v0  ;;  %5555 = vmatprep.subr.bf16.mxu0 %v8222_v7  ;;  %v187_v39 = vld [vmem:[#allocation4 + $0x170] sm:$0xff]  ;;  %v8264_v40 = vpack.c.bf16 %v188_v31, %v184_v28  ;;  %v190_v41 = vld [vmem:[#allocation4 + $0x188] sm:$0xff]  ;;  %v8271_v45 = vpack.c.bf16 %v185_v34, %v181_v33  ;;  %v192_v46 = vld [vmem:[#allocation4 + $0x198] sm:$0xff] }
  0x83   :  { %5425 = vmatmul.mubr.msk.f32.gmra.mrb[6].mxu0 %vm227_vm0, %v120_v13  ;;  %5587 = vmatprep.subr.bf16.mxu1 %v8226_v10  ;;  %v194_v43 = vld [vmem:[#allocation4 + $0x1a8] sm:$0xff]  ;;  %v196_v48 = vld [vmem:[#allocation4 + $0x1b8] sm:$0xff]  ;;  %v8275_v49 = vpack.c.bf16 %v187_v39, %v183_v37  ;;  %v189_v51 = vld [vmem:[#allocation4 + $0x180] sm:$0xff]  ;;  %v8362_v22 = vsub.s32 0, %v208_v21  ;;  %v8367_v25 = vsub.s32 1, %v208_v21  ;;  %v8375_v33 = vsub.s32 3, %v208_v21 }
  0x84   :  { %5433 = vmatmul.mubr.msk.f32.gmra.mrb[6].mxu1 %vm227_vm0, %v120_v13  ;;  %5557 = vmatpush1.bf16.msra.mxu0 %v8233_v14  ;;  %v122_v44 = vld [vmem:[%s9595_s0 + $0x28] sm:$0xff]  ;;  %v193_v52 = vld [vmem:[#allocation4 + $0x1a0] sm:$0xff]  ;;  %v8279_v53 = vpack.c.bf16 %v194_v43, %v190_v41  ;;  %v191_v55 = vld [vmem:[#allocation4 + $0x190] sm:$0xff]  ;;  %v8283_v58 = vpack.c.bf16 %v196_v48, %v192_v46 }
  0x85   :  { %5589 = vmatpush1.bf16.msra.mxu1 %v8237_v17  ;;  %340 = vmatprep.mubr.f32.mxu0 %v8003_v0  ;;  %v195_v56 = vld [vmem:[#allocation4 + $0x1b0] sm:$0xff]  ;;  %v198_v59 = vld [vmem:[#allocation4 + $0x1c8] sm:$0xff]  ;;  %v8290_v63 = vpack.c.bf16 %v193_v52, %v189_v51  ;;  %v200_v2 = vld [vmem:[#allocation4 + $0x1d8] sm:$0xff]  ;;  %v8382_v51 = vsub.s32 2, %v208_v21 }
  0x86   :  { %453 = vmatprep.mubr.f32.mxu1 %v8003_v0  ;;  %5559 = vmatprep.subr.bf16.mxu0 %v8241_v20  ;;  %v202_v61 = vld [vmem:[#allocation4 + $0x1e8] sm:$0xff]  ;;  %v123_v62 = vld [vmem:[%s9595_s0 + $0x30] sm:$0xff]  ;;  %v204_v3 = vld [vmem:[#allocation4 + $0x1f8] sm:$0xff]  ;;  %v8294_v5 = vpack.c.bf16 %v195_v56, %v191_v55 }
  0x87   :  { %5426 = vmatmul.mubr.msk.f32.gmra.mrb[8].mxu0 %vm227_vm0, %v121_v26  ;;  %5591 = vmatprep.subr.bf16.mxu1 %v8245_v23  ;;  %v197_v6 = vld [vmem:[#allocation4 + $0x1c0] sm:$0xff]  ;;  %v8298_v9 = vpack.c.bf16 %v202_v61, %v198_v59  ;;  %v199_v11 = vld [vmem:[#allocation4 + $0x1d0] sm:$0xff]  ;;  %v8302_v13 = vpack.c.bf16 %v204_v3, %v200_v2  ;;  %v124_v15 = vld [vmem:[%s9595_s0 + $0x38] sm:$0xff] }
  0x88   :  { %5434 = vmatmul.mubr.msk.f32.gmra.mrb[8].mxu1 %vm227_vm0, %v121_v26  ;;  %5561 = vmatpush1.bf16.msra.mxu0 %v8252_v27  ;;  %v201_v8 = vld [vmem:[#allocation4 + $0x1e0] sm:$0xff]  ;;  %v203_v12 = vld [vmem:[#allocation4 + $0x1f0] sm:$0xff] }
  0x89   :  { %5593 = vmatpush1.bf16.msra.mxu1 %v8256_v32  ;;  %346 = vmatprep.mubr.f32.mxu0 %v8003_v0  ;;  %v8309_v16 = vpack.c.bf16 %v201_v8, %v197_v6  ;;  %v8313_v18 = vpack.c.bf16 %v203_v12, %v199_v11  ;;  %v205_v24 = vld [vmem:[%s9598_s3] sm:$0xf] }
  0x8a   :  { %459 = vmatprep.mubr.f32.mxu1 %v8003_v0  ;;  %5563 = vmatprep.subr.bf16.mxu0 %v8260_v36  ;;  %v8370_v26 = vrot.slane %v205_v24, %v8362_v22  ;;  %v8373_v28 = vrot.slane %v205_v24, %v8367_v25  ;;  %v8380_v48 = vrot.slane %v205_v24, %v8375_v33 }
  0x8b   :  { %5427 = vmatmul.mubr.msk.f32.gmra.mrb[10].mxu0 %vm227_vm0, %v122_v44  ;;  %5595 = vmatprep.subr.bf16.mxu1 %v8264_v40  ;;  %v8386_v55 = vrot.slane %v205_v24, %v8382_v51 }
  0x8c   :  { %5435 = vmatmul.mubr.msk.f32.gmra.mrb[10].mxu1 %vm227_vm0, %v122_v44  ;;  %5565 = vmatpush1.bf16.msra.mxu0 %v8271_v45 }
  0x8d   :  { %5597 = vmatpush1.bf16.msra.mxu1 %v8275_v49  ;;  %352 = vmatprep.mubr.f32.mxu0 %v8003_v0 }
  0x8e   :  { %465 = vmatprep.mubr.f32.mxu1 %v8003_v0  ;;  %5567 = vmatprep.subr.bf16.mxu0 %v8279_v53 }
  0x8f   :  { %5428 = vmatmul.mubr.msk.f32.gmra.mrb[12].mxu0 %vm227_vm0, %v123_v62  ;;  %5599 = vmatprep.subr.bf16.mxu1 %v8283_v58 }
  0x90   :  { %5436 = vmatmul.mubr.msk.f32.gmra.mrb[12].mxu1 %vm227_vm0, %v123_v62  ;;  %5569 = vmatpush1.bf16.msra.mxu0 %v8290_v63 }
  0x91   :  { %5601 = vmatpush1.bf16.msra.mxu1 %v8294_v5  ;;  %358 = vmatprep.mubr.f32.mxu0 %v8003_v0 }
  0x92   :  { %471 = vmatprep.mubr.f32.mxu1 %v8003_v0  ;;  %5571 = vmatprep.subr.bf16.mxu0 %v8298_v9 }
  0x93   :  { %5429 = vmatmul.mubr.msk.f32.gmra.mrb[14].mxu0 %vm227_vm0, %v124_v15  ;;  %5603 = vmatprep.subr.bf16.mxu1 %v8302_v13 }
  0x94   :  { %5437 = vmatmul.mubr.msk.f32.gmra.mrb[14].mxu1 %vm227_vm0, %v124_v15  ;;  %5573 = vmatpush1.bf16.msra.mxu0 %v8309_v16 }
  0x95   :  { %5605 = vmatpush1.bf16.msra.mxu1 %v8313_v18  ;;  %542 = vmatprep.mubr.f32.mxu0 %v8003_v0 }
  0x96   :  { %613 = vmatprep.mubr.f32.mxu1 %v8003_v0  ;;  %5607 = vmatprep.subr.bf16.mxu0 %v8172_v29 }
  0x97   :  { %543 = vmatmul.mubr.f32.vlgmr.msra.gmra.mrb[0].mxu0 %v8003_v0  ;;  %5639 = vmatprep.subr.bf16.mxu1 %v8174_v30 }
  0x98   :  { %614 = vmatmul.mubr.f32.vlgmr.msra.gmra.mrb[0].mxu1 %v8003_v0  ;;  %5609 = vmatpush1.bf16.msra.mxu0 %v8179_v35 }
  0x99   :  { %5641 = vmatpush1.bf16.msra.mxu1 %v8182_v38  ;;  %5611 = vmatprep.subr.bf16.mxu0 %v8185_v42 }
  0x9a   :  { %5643 = vmatprep.subr.bf16.mxu1 %v8191_v47  ;;  %712 = vmatprep.mubr.f32.mxu0 %v8003_v0 }
  0x9b   :  { %783 = vmatprep.mubr.f32.mxu1 %v8003_v0 }
  0x9c   :  { %5613 = vmatpush1.bf16.msra.mxu0 %v8195_v50 }
  0x9d   :  { %5645 = vmatpush1.bf16.msra.mxu1 %v8199_v54  ;;  %5615 = vmatprep.subr.bf16.mxu0 %v8203_v57 }
  0x9e   :  { %5647 = vmatprep.subr.bf16.mxu1 %v8207_v60 }
  0xa0   :  { %5617 = vmatpush1.bf16.msra.mxu0 %v8214_v1 }
  0xa1   :  { %5649 = vmatpush1.bf16.msra.mxu1 %v8218_v4  ;;  %5619 = vmatprep.subr.bf16.mxu0 %v8222_v7 }
  0xa2   :  { %5651 = vmatprep.subr.bf16.mxu1 %v8226_v10 }
  0xa4   :  { %5621 = vmatpush1.bf16.msra.mxu0 %v8233_v14 }
  0xa5   :  { %5653 = vmatpush1.bf16.msra.mxu1 %v8237_v17  ;;  %5623 = vmatprep.subr.bf16.mxu0 %v8241_v20 }
  0xa6   :  { %5655 = vmatprep.subr.bf16.mxu1 %v8245_v23 }
  0xa8   :  { %5625 = vmatpush1.bf16.msra.mxu0 %v8252_v27 }
  0xa9   :  { %5657 = vmatpush1.bf16.msra.mxu1 %v8256_v32  ;;  %5627 = vmatprep.subr.bf16.mxu0 %v8260_v36 }
  0xaa   :  { %5659 = vmatprep.subr.bf16.mxu1 %v8264_v40 }
  0xac   :  { %5629 = vmatpush1.bf16.msra.mxu0 %v8271_v45 }
  0xad   :  { %5661 = vmatpush1.bf16.msra.mxu1 %v8275_v49  ;;  %5631 = vmatprep.subr.bf16.mxu0 %v8279_v53 }
  0xae   :  { %5663 = vmatprep.subr.bf16.mxu1 %v8283_v58 }
  0xb0   :  { %5633 = vmatpush1.bf16.msra.mxu0 %v8290_v63 }
  0xb1   :  { %5665 = vmatpush1.bf16.msra.mxu1 %v8294_v5  ;;  %5635 = vmatprep.subr.bf16.mxu0 %v8298_v9 }
  0xb2   :  { %5667 = vmatprep.subr.bf16.mxu1 %v8302_v13 }
  0xb4   :  { %5637 = vmatpush1.bf16.msra.mxu0 %v8309_v16 }
  0xb5   :  { %5669 = vmatpush1.bf16.msra.mxu1 %v8313_v18  ;;  %5671 = vmatprep.subr.bf16.mxu0 %v8172_v29 }
  0xb6   :  { %5703 = vmatprep.subr.bf16.mxu1 %v8174_v30 }
 0x16a   :  { %v544_v31 = vpop.f32.mrb[0].mxu0 }
 0x16b   :  { %v7206_v34 = vadd.f32 %v544_v31, %v8370_v26  ;;  %v615_v37 = vpop.f32.mrb[0].mxu1  ;;  %v546_v39 = vpop.f32.mrb[1].mxu0 }
 0x16c   :  { %v7207_v41 = vadd.f32 %v546_v39, %v8373_v28  ;;  %v617_v43 = vpop.f32.mrb[1].mxu1  ;;  %v7222_v59 = vadd.f32 %v615_v37, %v8386_v55 }
 0x16d   :  { %v5438_v44 = vmul.f32 -1.442695, %v7206_v34  ;;  %v7223_v52 = vadd.f32 %v617_v43, %v8380_v48 }
 0x16e   :  { %v5439_v46 = vmul.f32 -1.442695, %v7207_v41 }
 0x16f   :  { %7407 = vpow2.f32 %v5438_v44  ;;  %v5440_v56 = vmul.f32 -1.442695, %v7223_v52 }
 0x170   :  { %7409 = vpow2.f32 %v5439_v46 }
 0x171   :  { %7411 = vpow2.f32 %v5440_v56 }
 0x172   :  { %7413 = vtanh.f32 %v7222_v59 }
 0x179   :  { %v7408_v61 = vpop.eup %7407 }
 0x17a   :  { %v7410_v62 = vpop.eup %7409  ;;  %v627_v2 = vadd.f32 1.0, %v7408_v61 }
 0x17b   :  { %v633_v3 = vadd.f32 1.0, %v7410_v62  ;;  %v7412_v6 = vpop.eup %7411 }
 0x17c   :  { %7415 = vrcp.f32 %v627_v2  ;;  %v7414_v8 = vpop.eup %7413  ;;  %v640_v19 = vadd.f32 1.0, %v7412_v6 }
 0x17d   :  { %7417 = vrcp.f32 %v633_v3 }
 0x17e   :  { %7419 = vrcp.f32 %v640_v19 }
 0x186   :  { %v7416_v11 = vpop.eup %7415 }
 0x187   :  { %v7418_v12 = vpop.eup %7417  ;;  %v644_v15 = vmul.f32 %v7416_v11, %v7414_v8 }
 0x188   :  { %v643_v21 = vmul.f32 0.0, %v7418_v12  ;;  %v7420_v31 = vpop.eup %7419 }
 0x18a   :  { %v8389_v24 = vadd.f32 %v644_v15, %v643_v21 }
 0x18c   :  { %7421 = vtanh.f32 %v8389_v24 }
 0x196   :  { %v7422_v34 = vpop.eup %7421 }
 0x197   :  { %v8392_v37 = vmul.f32 %v7422_v34, %v7420_v31 }
 0x199   :  { %713 = vmatmul.mubr.f32.vlgmr.msra.gmra.mrb[2].mxu0 %v8392_v37  ;;  %784 = vmatmul.mubr.f32.vlgmr.msra.gmra.mrb[2].mxu1 %v8392_v37 }
 0x19a   :  { %5673 = vmatpush1.bf16.msra.mxu0 %v8179_v35  ;;  %5705 = vmatpush1.bf16.msra.mxu1 %v8182_v38 }
 0x19b   :  { %5675 = vmatprep.subr.bf16.mxu0 %v8185_v42  ;;  %5707 = vmatprep.subr.bf16.mxu1 %v8191_v47 }
 0x19c   :  { %882 = vmatprep.mubr.f32.mxu0 %v8003_v0  ;;  %953 = vmatprep.mubr.f32.mxu1 %v8003_v0 }
 0x19e   :  { %5677 = vmatpush1.bf16.msra.mxu0 %v8195_v50  ;;  %5709 = vmatpush1.bf16.msra.mxu1 %v8199_v54 }
 0x19f   :  { %5679 = vmatprep.subr.bf16.mxu0 %v8203_v57  ;;  %5711 = vmatprep.subr.bf16.mxu1 %v8207_v60 }
 0x1a2   :  { %5681 = vmatpush1.bf16.msra.mxu0 %v8214_v1  ;;  %5713 = vmatpush1.bf16.msra.mxu1 %v8218_v4 }
 0x1a3   :  { %5683 = vmatprep.subr.bf16.mxu0 %v8222_v7  ;;  %5715 = vmatprep.subr.bf16.mxu1 %v8226_v10 }
 0x1a6   :  { %5685 = vmatpush1.bf16.msra.mxu0 %v8233_v14  ;;  %5717 = vmatpush1.bf16.msra.mxu1 %v8237_v17 }
 0x1a7   :  { %5687 = vmatprep.subr.bf16.mxu0 %v8241_v20  ;;  %5719 = vmatprep.subr.bf16.mxu1 %v8245_v23 }
 0x1aa   :  { %5689 = vmatpush1.bf16.msra.mxu0 %v8252_v27  ;;  %5721 = vmatpush1.bf16.msra.mxu1 %v8256_v32 }
 0x1ab   :  { %5691 = vmatprep.subr.bf16.mxu0 %v8260_v36  ;;  %5723 = vmatprep.subr.bf16.mxu1 %v8264_v40 }
 0x1ae   :  { %5693 = vmatpush1.bf16.msra.mxu0 %v8271_v45  ;;  %5725 = vmatpush1.bf16.msra.mxu1 %v8275_v49 }
 0x1af   :  { %5695 = vmatprep.subr.bf16.mxu0 %v8279_v53  ;;  %5727 = vmatprep.subr.bf16.mxu1 %v8283_v58 }
 0x1b2   :  { %5697 = vmatpush1.bf16.msra.mxu0 %v8290_v63  ;;  %5729 = vmatpush1.bf16.msra.mxu1 %v8294_v5 }
 0x1b3   :  { %5699 = vmatprep.subr.bf16.mxu0 %v8298_v9  ;;  %5731 = vmatprep.subr.bf16.mxu1 %v8302_v13 }
 0x1b6   :  { %5701 = vmatpush1.bf16.msra.mxu0 %v8309_v16  ;;  %5733 = vmatpush1.bf16.msra.mxu1 %v8313_v18 }
 0x1b7   :  { %5735 = vmatprep.subr.bf16.mxu0 %v8172_v29  ;;  %5767 = vmatprep.subr.bf16.mxu1 %v8174_v30 }
 0x26c   :  { %v714_v39 = vpop.f32.mrb[2].mxu0  ;;  %v785_v41 = vpop.f32.mrb[2].mxu1 }
 0x26d   :  { %v7208_v43 = vadd.f32 %v714_v39, %v8370_v26  ;;  %v716_v44 = vpop.f32.mrb[3].mxu0  ;;  %v787_v46 = vpop.f32.mrb[3].mxu1  ;;  %v7224_v2 = vadd.f32 %v785_v41, %v8386_v55 }
 0x26e   :  { %v7209_v52 = vadd.f32 %v716_v44, %v8373_v28  ;;  %v7225_v61 = vadd.f32 %v787_v46, %v8380_v48 }
 0x26f   :  { %v5441_v56 = vmul.f32 -1.442695, %v7208_v43 }
 0x270   :  { %v5442_v59 = vmul.f32 -1.442695, %v7209_v52  ;;  %v5443_v62 = vmul.f32 -1.442695, %v7225_v61 }
 0x271   :  { %7423 = vpow2.f32 %v5441_v56 }
 0x272   :  { %7425 = vpow2.f32 %v5442_v59 }
 0x273   :  { %7427 = vpow2.f32 %v5443_v62 }
 0x274   :  { %7429 = vtanh.f32 %v7224_v2 }
 0x27b   :  { %v7424_v3 = vpop.eup %7423 }
 0x27c   :  { %v7426_v6 = vpop.eup %7425  ;;  %v797_v8 = vadd.f32 1.0, %v7424_v3 }
 0x27d   :  { %v803_v11 = vadd.f32 1.0, %v7426_v6  ;;  %v7428_v12 = vpop.eup %7427 }
 0x27e   :  { %7431 = vrcp.f32 %v797_v8  ;;  %v7430_v15 = vpop.eup %7429  ;;  %v810_v34 = vadd.f32 1.0, %v7428_v12 }
 0x27f   :  { %7433 = vrcp.f32 %v803_v11 }
 0x280   :  { %7435 = vrcp.f32 %v810_v34 }
 0x288   :  { %v7432_v19 = vpop.eup %7431 }
 0x289   :  { %v7434_v21 = vpop.eup %7433  ;;  %v814_v31 = vmul.f32 %v7432_v19, %v7430_v15 }
 0x28a   :  { %v813_v39 = vmul.f32 %v7434_v21, %v8389_v24  ;;  %v7436_v41 = vpop.eup %7435 }
 0x28c   :  { %v8435_v43 = vadd.f32 %v814_v31, %v813_v39 }
 0x28e   :  { %7437 = vtanh.f32 %v8435_v43 }
 0x298   :  { %v7438_v44 = vpop.eup %7437 }
 0x299   :  { %v8438_v46 = vmul.f32 %v7438_v44, %v7436_v41 }
 0x29b   :  { %883 = vmatmul.mubr.f32.vlgmr.msra.gmra.mrb[4].mxu0 %v8438_v46  ;;  %954 = vmatmul.mubr.f32.vlgmr.msra.gmra.mrb[4].mxu1 %v8438_v46 }
 0x29c   :  { %5737 = vmatpush1.bf16.msra.mxu0 %v8179_v35  ;;  %5769 = vmatpush1.bf16.msra.mxu1 %v8182_v38 }
 0x29d   :  { %5739 = vmatprep.subr.bf16.mxu0 %v8185_v42  ;;  %5771 = vmatprep.subr.bf16.mxu1 %v8191_v47 }
 0x29e   :  { %1052 = vmatprep.mubr.f32.mxu0 %v8003_v0  ;;  %1123 = vmatprep.mubr.f32.mxu1 %v8003_v0 }
 0x2a0   :  { %5741 = vmatpush1.bf16.msra.mxu0 %v8195_v50  ;;  %5773 = vmatpush1.bf16.msra.mxu1 %v8199_v54 }
 0x2a1   :  { %5743 = vmatprep.subr.bf16.mxu0 %v8203_v57  ;;  %5775 = vmatprep.subr.bf16.mxu1 %v8207_v60 }
 0x2a4   :  { %5745 = vmatpush1.bf16.msra.mxu0 %v8214_v1  ;;  %5777 = vmatpush1.bf16.msra.mxu1 %v8218_v4 }
 0x2a5   :  { %5747 = vmatprep.subr.bf16.mxu0 %v8222_v7  ;;  %5779 = vmatprep.subr.bf16.mxu1 %v8226_v10 }
 0x2a8   :  { %5749 = vmatpush1.bf16.msra.mxu0 %v8233_v14  ;;  %5781 = vmatpush1.bf16.msra.mxu1 %v8237_v17 }
 0x2a9   :  { %5751 = vmatprep.subr.bf16.mxu0 %v8241_v20  ;;  %5783 = vmatprep.subr.bf16.mxu1 %v8245_v23 }
 0x2ac   :  { %5753 = vmatpush1.bf16.msra.mxu0 %v8252_v27  ;;  %5785 = vmatpush1.bf16.msra.mxu1 %v8256_v32 }
 0x2ad   :  { %5755 = vmatprep.subr.bf16.mxu0 %v8260_v36  ;;  %5787 = vmatprep.subr.bf16.mxu1 %v8264_v40 }
 0x2b0   :  { %5757 = vmatpush1.bf16.msra.mxu0 %v8271_v45  ;;  %5789 = vmatpush1.bf16.msra.mxu1 %v8275_v49 }
 0x2b1   :  { %5759 = vmatprep.subr.bf16.mxu0 %v8279_v53  ;;  %5791 = vmatprep.subr.bf16.mxu1 %v8283_v58 }
 0x2b4   :  { %5761 = vmatpush1.bf16.msra.mxu0 %v8290_v63  ;;  %5793 = vmatpush1.bf16.msra.mxu1 %v8294_v5 }
 0x2b5   :  { %5763 = vmatprep.subr.bf16.mxu0 %v8298_v9  ;;  %5795 = vmatprep.subr.bf16.mxu1 %v8302_v13 }
 0x2b8   :  { %5765 = vmatpush1.bf16.msra.mxu0 %v8309_v16  ;;  %5797 = vmatpush1.bf16.msra.mxu1 %v8313_v18 }
 0x2b9   :  { %5799 = vmatprep.subr.bf16.mxu0 %v8172_v29  ;;  %5831 = vmatprep.subr.bf16.mxu1 %v8174_v30 }
 0x36e   :  { %v884_v24 = vpop.f32.mrb[4].mxu0  ;;  %v955_v52 = vpop.f32.mrb[4].mxu1 }
 0x36f   :  { %v7210_v56 = vadd.f32 %v884_v24, %v8370_v26  ;;  %v886_v59 = vpop.f32.mrb[5].mxu0  ;;  %v957_v61 = vpop.f32.mrb[5].mxu1  ;;  %v7226_v11 = vadd.f32 %v955_v52, %v8386_v55 }
 0x370   :  { %v7211_v62 = vadd.f32 %v886_v59, %v8373_v28  ;;  %v7227_v6 = vadd.f32 %v957_v61, %v8380_v48 }
 0x371   :  { %v5444_v2 = vmul.f32 -1.442695, %v7210_v56 }
 0x372   :  { %v5445_v3 = vmul.f32 -1.442695, %v7211_v62  ;;  %v5446_v8 = vmul.f32 -1.442695, %v7227_v6 }
 0x373   :  { %7439 = vpow2.f32 %v5444_v2 }
 0x374   :  { %7441 = vpow2.f32 %v5445_v3 }
 0x375   :  { %7443 = vpow2.f32 %v5446_v8 }
 0x376   :  { %7445 = vtanh.f32 %v7226_v11 }
 0x37d   :  { %v7440_v12 = vpop.eup %7439 }
 0x37e   :  { %v7442_v15 = vpop.eup %7441  ;;  %v967_v19 = vadd.f32 1.0, %v7440_v12 }
 0x37f   :  { %v973_v21 = vadd.f32 1.0, %v7442_v15  ;;  %v7444_v31 = vpop.eup %7443 }
 0x380   :  { %7447 = vrcp.f32 %v967_v19  ;;  %v7446_v34 = vpop.eup %7445  ;;  %v980_v24 = vadd.f32 1.0, %v7444_v31 }
 0x381   :  { %7449 = vrcp.f32 %v973_v21 }
 0x382   :  { %7451 = vrcp.f32 %v980_v24 }
 0x38a   :  { %v7448_v39 = vpop.eup %7447 }
 0x38b   :  { %v7450_v41 = vpop.eup %7449  ;;  %v984_v44 = vmul.f32 %v7448_v39, %v7446_v34 }
 0x38c   :  { %v983_v56 = vmul.f32 %v7450_v41, %v8435_v43  ;;  %v7452_v52 = vpop.eup %7451 }
 0x38e   :  { %v8481_v59 = vadd.f32 %v984_v44, %v983_v56 }
 0x390   :  { %7453 = vtanh.f32 %v8481_v59 }
 0x39a   :  { %v7454_v61 = vpop.eup %7453 }
 0x39b   :  { %v8484_v62 = vmul.f32 %v7454_v61, %v7452_v52 }
 0x39d   :  { %1053 = vmatmul.mubr.f32.vlgmr.msra.gmra.mrb[6].mxu0 %v8484_v62  ;;  %1124 = vmatmul.mubr.f32.vlgmr.msra.gmra.mrb[6].mxu1 %v8484_v62 }
 0x39e   :  { %5801 = vmatpush1.bf16.msra.mxu0 %v8179_v35  ;;  %5833 = vmatpush1.bf16.msra.mxu1 %v8182_v38 }
 0x39f   :  { %5803 = vmatprep.subr.bf16.mxu0 %v8185_v42  ;;  %5835 = vmatprep.subr.bf16.mxu1 %v8191_v47 }
 0x3a0   :  { %1222 = vmatprep.mubr.f32.mxu0 %v8003_v0  ;;  %1293 = vmatprep.mubr.f32.mxu1 %v8003_v0 }
 0x3a2   :  { %5805 = vmatpush1.bf16.msra.mxu0 %v8195_v50  ;;  %5837 = vmatpush1.bf16.msra.mxu1 %v8199_v54 }
 0x3a3   :  { %5807 = vmatprep.subr.bf16.mxu0 %v8203_v57  ;;  %5839 = vmatprep.subr.bf16.mxu1 %v8207_v60 }
 0x3a6   :  { %5809 = vmatpush1.bf16.msra.mxu0 %v8214_v1  ;;  %5841 = vmatpush1.bf16.msra.mxu1 %v8218_v4 }
 0x3a7   :  { %5811 = vmatprep.subr.bf16.mxu0 %v8222_v7  ;;  %5843 = vmatprep.subr.bf16.mxu1 %v8226_v10 }
 0x3aa   :  { %5813 = vmatpush1.bf16.msra.mxu0 %v8233_v14  ;;  %5845 = vmatpush1.bf16.msra.mxu1 %v8237_v17 }
 0x3ab   :  { %5815 = vmatprep.subr.bf16.mxu0 %v8241_v20  ;;  %5847 = vmatprep.subr.bf16.mxu1 %v8245_v23 }
 0x3ae   :  { %5817 = vmatpush1.bf16.msra.mxu0 %v8252_v27  ;;  %5849 = vmatpush1.bf16.msra.mxu1 %v8256_v32 }
 0x3af   :  { %5819 = vmatprep.subr.bf16.mxu0 %v8260_v36  ;;  %5851 = vmatprep.subr.bf16.mxu1 %v8264_v40 }
 0x3b2   :  { %5821 = vmatpush1.bf16.msra.mxu0 %v8271_v45  ;;  %5853 = vmatpush1.bf16.msra.mxu1 %v8275_v49 }
 0x3b3   :  { %5823 = vmatprep.subr.bf16.mxu0 %v8279_v53  ;;  %5855 = vmatprep.subr.bf16.mxu1 %v8283_v58 }
 0x3b6   :  { %5825 = vmatpush1.bf16.msra.mxu0 %v8290_v63  ;;  %5857 = vmatpush1.bf16.msra.mxu1 %v8294_v5 }
 0x3b7   :  { %5827 = vmatprep.subr.bf16.mxu0 %v8298_v9  ;;  %5859 = vmatprep.subr.bf16.mxu1 %v8302_v13 }
 0x3ba   :  { %5829 = vmatpush1.bf16.msra.mxu0 %v8309_v16  ;;  %5861 = vmatpush1.bf16.msra.mxu1 %v8313_v18 }
 0x3bb   :  { %5863 = vmatprep.subr.bf16.mxu0 %v8172_v29  ;;  %5895 = vmatprep.subr.bf16.mxu1 %v8174_v30 }
 0x470   :  { %v1054_v43 = vpop.f32.mrb[6].mxu0  ;;  %v1125_v2 = vpop.f32.mrb[6].mxu1 }
 0x471   :  { %v7212_v3 = vadd.f32 %v1054_v43, %v8370_v26  ;;  %v1056_v6 = vpop.f32.mrb[7].mxu0  ;;  %v1127_v8 = vpop.f32.mrb[7].mxu1  ;;  %v7228_v31 = vadd.f32 %v1125_v2, %v8386_v55 }
 0x472   :  { %v7213_v11 = vadd.f32 %v1056_v6, %v8373_v28  ;;  %v7229_v19 = vadd.f32 %v1127_v8, %v8380_v48 }
 0x473   :  { %v5447_v12 = vmul.f32 -1.442695, %v7212_v3 }
 0x474   :  { %v5448_v15 = vmul.f32 -1.442695, %v7213_v11  ;;  %v5449_v21 = vmul.f32 -1.442695, %v7229_v19 }
 0x475   :  { %7455 = vpow2.f32 %v5447_v12 }
 0x476   :  { %7457 = vpow2.f32 %v5448_v15 }
 0x477   :  { %7459 = vpow2.f32 %v5449_v21 }
 0x478   :  { %7461 = vtanh.f32 %v7228_v31 }
 0x47f   :  { %v7456_v34 = vpop.eup %7455 }
 0x480   :  { %v7458_v39 = vpop.eup %7457  ;;  %v1137_v41 = vadd.f32 1.0, %v7456_v34 }
 0x481   :  { %v1143_v44 = vadd.f32 1.0, %v7458_v39  ;;  %v7460_v24 = vpop.eup %7459 }
 0x482   :  { %7463 = vrcp.f32 %v1137_v41  ;;  %v7462_v56 = vpop.eup %7461  ;;  %v1150_v3 = vadd.f32 1.0, %v7460_v24 }
 0x483   :  { %7465 = vrcp.f32 %v1143_v44 }
 0x484   :  { %7467 = vrcp.f32 %v1150_v3 }
 0x48c   :  { %v7464_v52 = vpop.eup %7463 }
 0x48d   :  { %v7466_v61 = vpop.eup %7465  ;;  %v1154_v43 = vmul.f32 %v7464_v52, %v7462_v56 }
 0x48e   :  { %v1153_v6 = vmul.f32 %v7466_v61, %v8481_v59  ;;  %v7468_v2 = vpop.eup %7467 }
 0x490   :  { %v8527_v8 = vadd.f32 %v1154_v43, %v1153_v6 }
 0x492   :  { %7469 = vtanh.f32 %v8527_v8 }
 0x49c   :  { %v7470_v11 = vpop.eup %7469 }
 0x49d   :  { %v8530_v12 = vmul.f32 %v7470_v11, %v7468_v2 }
 0x49f   :  { %1223 = vmatmul.mubr.f32.vlgmr.msra.gmra.mrb[8].mxu0 %v8530_v12  ;;  %1294 = vmatmul.mubr.f32.vlgmr.msra.gmra.mrb[8].mxu1 %v8530_v12 }
 0x4a0   :  { %5865 = vmatpush1.bf16.msra.mxu0 %v8179_v35  ;;  %5897 = vmatpush1.bf16.msra.mxu1 %v8182_v38 }
 0x4a1   :  { %5867 = vmatprep.subr.bf16.mxu0 %v8185_v42  ;;  %5899 = vmatprep.subr.bf16.mxu1 %v8191_v47 }
 0x4a2   :  { %1392 = vmatprep.mubr.f32.mxu0 %v8003_v0  ;;  %1463 = vmatprep.mubr.f32.mxu1 %v8003_v0 }
 0x4a4   :  { %5869 = vmatpush1.bf16.msra.mxu0 %v8195_v50  ;;  %5901 = vmatpush1.bf16.msra.mxu1 %v8199_v54 }
 0x4a5   :  { %5871 = vmatprep.subr.bf16.mxu0 %v8203_v57  ;;  %5903 = vmatprep.subr.bf16.mxu1 %v8207_v60 }
 0x4a8   :  { %5873 = vmatpush1.bf16.msra.mxu0 %v8214_v1  ;;  %5905 = vmatpush1.bf16.msra.mxu1 %v8218_v4 }
 0x4a9   :  { %5875 = vmatprep.subr.bf16.mxu0 %v8222_v7  ;;  %5907 = vmatprep.subr.bf16.mxu1 %v8226_v10 }
 0x4ac   :  { %5877 = vmatpush1.bf16.msra.mxu0 %v8233_v14  ;;  %5909 = vmatpush1.bf16.msra.mxu1 %v8237_v17 }
 0x4ad   :  { %5879 = vmatprep.subr.bf16.mxu0 %v8241_v20  ;;  %5911 = vmatprep.subr.bf16.mxu1 %v8245_v23 }
 0x4b0   :  { %5881 = vmatpush1.bf16.msra.mxu0 %v8252_v27  ;;  %5913 = vmatpush1.bf16.msra.mxu1 %v8256_v32 }
 0x4b1   :  { %5883 = vmatprep.subr.bf16.mxu0 %v8260_v36  ;;  %5915 = vmatprep.subr.bf16.mxu1 %v8264_v40 }
 0x4b4   :  { %5885 = vmatpush1.bf16.msra.mxu0 %v8271_v45  ;;  %5917 = vmatpush1.bf16.msra.mxu1 %v8275_v49 }
 0x4b5   :  { %5887 = vmatprep.subr.bf16.mxu0 %v8279_v53  ;;  %5919 = vmatprep.subr.bf16.mxu1 %v8283_v58 }
 0x4b8   :  { %5889 = vmatpush1.bf16.msra.mxu0 %v8290_v63  ;;  %5921 = vmatpush1.bf16.msra.mxu1 %v8294_v5 }
 0x4b9   :  { %5891 = vmatprep.subr.bf16.mxu0 %v8298_v9  ;;  %5923 = vmatprep.subr.bf16.mxu1 %v8302_v13 }
 0x4bc   :  { %5893 = vmatpush1.bf16.msra.mxu0 %v8309_v16  ;;  %5925 = vmatpush1.bf16.msra.mxu1 %v8313_v18 }
 0x4bd   :  { %5927 = vmatprep.subr.bf16.mxu0 %v8172_v29  ;;  %5959 = vmatprep.subr.bf16.mxu1 %v8174_v30 }
 0x572   :  { %v1224_v59 = vpop.f32.mrb[8].mxu0  ;;  %v1295_v15 = vpop.f32.mrb[8].mxu1 }
 0x573   :  { %v7214_v19 = vadd.f32 %v1224_v59, %v8370_v26  ;;  %v1226_v21 = vpop.f32.mrb[9].mxu0  ;;  %v1297_v31 = vpop.f32.mrb[9].mxu1  ;;  %v7230_v56 = vadd.f32 %v1295_v15, %v8386_v55 }
 0x574   :  { %v7215_v34 = vadd.f32 %v1226_v21, %v8373_v28  ;;  %v7231_v44 = vadd.f32 %v1297_v31, %v8380_v48 }
 0x575   :  { %v5450_v39 = vmul.f32 -1.442695, %v7214_v19 }
 0x576   :  { %v5451_v41 = vmul.f32 -1.442695, %v7215_v34  ;;  %v5452_v24 = vmul.f32 -1.442695, %v7231_v44 }
 0x577   :  { %7471 = vpow2.f32 %v5450_v39 }
 0x578   :  { %7473 = vpow2.f32 %v5451_v41 }
 0x579   :  { %7475 = vpow2.f32 %v5452_v24 }
 0x57a   :  { %7477 = vtanh.f32 %v7230_v56 }
 0x581   :  { %v7472_v52 = vpop.eup %7471 }
 0x582   :  { %v7474_v61 = vpop.eup %7473  ;;  %v1307_v43 = vadd.f32 1.0, %v7472_v52 }
 0x583   :  { %v1313_v3 = vadd.f32 1.0, %v7474_v61  ;;  %v7476_v6 = vpop.eup %7475 }
 0x584   :  { %7479 = vrcp.f32 %v1307_v43  ;;  %v7478_v2 = vpop.eup %7477  ;;  %v1320_v21 = vadd.f32 1.0, %v7476_v6 }
 0x585   :  { %7481 = vrcp.f32 %v1313_v3 }
 0x586   :  { %7483 = vrcp.f32 %v1320_v21 }
 0x58e   :  { %v7480_v11 = vpop.eup %7479 }
 0x58f   :  { %v7482_v59 = vpop.eup %7481  ;;  %v1324_v19 = vmul.f32 %v7480_v11, %v7478_v2 }
 0x590   :  { %v1323_v34 = vmul.f32 %v7482_v59, %v8527_v8  ;;  %v7484_v15 = vpop.eup %7483 }
 0x592   :  { %v8573_v31 = vadd.f32 %v1324_v19, %v1323_v34 }
 0x594   :  { %7485 = vtanh.f32 %v8573_v31 }
 0x59e   :  { %v7486_v39 = vpop.eup %7485 }
 0x59f   :  { %v8576_v41 = vmul.f32 %v7486_v39, %v7484_v15 }
 0x5a1   :  { %1393 = vmatmul.mubr.f32.vlgmr.msra.gmra.mrb[10].mxu0 %v8576_v41  ;;  %1464 = vmatmul.mubr.f32.vlgmr.msra.gmra.mrb[10].mxu1 %v8576_v41 }
 0x5a2   :  { %5929 = vmatpush1.bf16.msra.mxu0 %v8179_v35  ;;  %5961 = vmatpush1.bf16.msra.mxu1 %v8182_v38 }
 0x5a3   :  { %5931 = vmatprep.subr.bf16.mxu0 %v8185_v42  ;;  %5963 = vmatprep.subr.bf16.mxu1 %v8191_v47 }
 0x5a4   :  { %1562 = vmatprep.mubr.f32.mxu0 %v8003_v0  ;;  %1633 = vmatprep.mubr.f32.mxu1 %v8003_v0 }
 0x5a6   :  { %5933 = vmatpush1.bf16.msra.mxu0 %v8195_v50  ;;  %5965 = vmatpush1.bf16.msra.mxu1 %v8199_v54 }
 0x5a7   :  { %5935 = vmatprep.subr.bf16.mxu0 %v8203_v57  ;;  %5967 = vmatprep.subr.bf16.mxu1 %v8207_v60 }
 0x5aa   :  { %5937 = vmatpush1.bf16.msra.mxu0 %v8214_v1  ;;  %5969 = vmatpush1.bf16.msra.mxu1 %v8218_v4 }
 0x5ab   :  { %5939 = vmatprep.subr.bf16.mxu0 %v8222_v7  ;;  %5971 = vmatprep.subr.bf16.mxu1 %v8226_v10 }
 0x5ae   :  { %5941 = vmatpush1.bf16.msra.mxu0 %v8233_v14  ;;  %5973 = vmatpush1.bf16.msra.mxu1 %v8237_v17 }
 0x5af   :  { %5943 = vmatprep.subr.bf16.mxu0 %v8241_v20  ;;  %5975 = vmatprep.subr.bf16.mxu1 %v8245_v23 }
 0x5b2   :  { %5945 = vmatpush1.bf16.msra.mxu0 %v8252_v27  ;;  %5977 = vmatpush1.bf16.msra.mxu1 %v8256_v32 }
 0x5b3   :  { %5947 = vmatprep.subr.bf16.mxu0 %v8260_v36  ;;  %5979 = vmatprep.subr.bf16.mxu1 %v8264_v40 }
 0x5b6   :  { %5949 = vmatpush1.bf16.msra.mxu0 %v8271_v45  ;;  %5981 = vmatpush1.bf16.msra.mxu1 %v8275_v49 }
 0x5b7   :  { %5951 = vmatprep.subr.bf16.mxu0 %v8279_v53  ;;  %5983 = vmatprep.subr.bf16.mxu1 %v8283_v58 }
 0x5ba   :  { %5953 = vmatpush1.bf16.msra.mxu0 %v8290_v63  ;;  %5985 = vmatpush1.bf16.msra.mxu1 %v8294_v5 }
 0x5bb   :  { %5955 = vmatprep.subr.bf16.mxu0 %v8298_v9  ;;  %5987 = vmatprep.subr.bf16.mxu1 %v8302_v13 }
 0x5be   :  { %5957 = vmatpush1.bf16.msra.mxu0 %v8309_v16  ;;  %5989 = vmatpush1.bf16.msra.mxu1 %v8313_v18 }
 0x5bf   :  { %5991 = vmatprep.subr.bf16.mxu0 %v8172_v29  ;;  %6023 = vmatprep.subr.bf16.mxu1 %v8174_v30 }
 0x674   :  { %v1394_v8 = vpop.f32.mrb[10].mxu0  ;;  %v1465_v44 = vpop.f32.mrb[10].mxu1 }
 0x675   :  { %v7216_v24 = vadd.f32 %v1394_v8, %v8370_v26  ;;  %v1396_v56 = vpop.f32.mrb[11].mxu0  ;;  %v1467_v52 = vpop.f32.mrb[11].mxu1  ;;  %v7232_v11 = vadd.f32 %v1465_v44, %v8386_v55 }
 0x676   :  { %v7217_v61 = vadd.f32 %v1396_v56, %v8373_v28  ;;  %v7233_v6 = vadd.f32 %v1467_v52, %v8380_v48 }
 0x677   :  { %v5453_v43 = vmul.f32 -1.442695, %v7216_v24 }
 0x678   :  { %v5454_v3 = vmul.f32 -1.442695, %v7217_v61  ;;  %v5455_v2 = vmul.f32 -1.442695, %v7233_v6  ;;  %v1892_v6 = vld [vmem:[#allocation6 + $0x30] sm:$0xff] }
 0x679   :  { %7487 = vpow2.f32 %v5453_v43 }
 0x67a   :  { %7489 = vpow2.f32 %v5454_v3  ;;  %v1888_v3 = vld [vmem:[#allocation6 + $0x10] sm:$0xff] }
 0x67b   :  { %7491 = vpow2.f32 %v5455_v2  ;;  %v1895_v2 = vld [vmem:[#allocation6 + $0x48] sm:$0xff] }
 0x67c   :  { %7493 = vtanh.f32 %v7232_v11  ;;  %v1899_v11 = vld [vmem:[#allocation6 + $0x68] sm:$0xff] }
 0x683   :  { %v7488_v29 = vpop.eup %7487 }
 0x684   :  { %v7490_v59 = vpop.eup %7489  ;;  %v1477_v30 = vadd.f32 1.0, %v7488_v29  ;;  %v1897_v29 = vld [vmem:[#allocation6 + $0x58] sm:$0xff] }
 0x685   :  { %v1483_v19 = vadd.f32 1.0, %v7490_v59  ;;  %v7492_v21 = vpop.eup %7491  ;;  %v1901_v59 = vld [vmem:[#allocation6 + $0x78] sm:$0xff] }
 0x686   :  { %7495 = vrcp.f32 %v1477_v30  ;;  %v7494_v34 = vpop.eup %7493  ;;  %v1490_v24 = vadd.f32 1.0, %v7492_v21 }
 0x687   :  { %7497 = vrcp.f32 %v1483_v19 }
 0x688   :  { %7499 = vrcp.f32 %v1490_v24  ;;  %v6058_v24 = vpack.c.bf16 %v1899_v11, %v1895_v2 }
 0x690   :  { %v7496_v15 = vpop.eup %7495 }
 0x691   :  { %v7498_v39 = vpop.eup %7497  ;;  %v1494_v8 = vmul.f32 %v7496_v15, %v7494_v34  ;;  %v6088_v34 = vpack.c.bf16 %v1892_v6, %v1888_v3  ;;  %v1894_v15 = vld [vmem:[#allocation6 + $0x40] sm:$0xff] }
 0x692   :  { %v1493_v56 = vmul.f32 %v7498_v39, %v8573_v31  ;;  %v7500_v44 = vpop.eup %7499  ;;  %v1890_v31 = vld [vmem:[#allocation6 + $0x20] sm:$0xff] }
 0x693   :  { %v1898_v39 = vld [vmem:[#allocation6 + $0x60] sm:$0xff] }
 0x694   :  { %v8619_v52 = vadd.f32 %v1494_v8, %v1493_v56  ;;  %v6090_v56 = vpack.c.bf16 %v1901_v59, %v1897_v29  ;;  %v1918_v3 = vld [vmem:[#allocation6 + $0x100] sm:$0xff]  ;;  %v1920_v29 = vld [vmem:[#allocation6 + $0x110] sm:$0xff] }
 0x695   :  { %v1922_v6 = vld [vmem:[#allocation6 + $0x120] sm:$0xff]  ;;  %v1924_v59 = vld [vmem:[#allocation6 + $0x130] sm:$0xff] }
 0x696   :  { %7501 = vtanh.f32 %v8619_v52 }
 0x6a0   :  { %v7502_v61 = vpop.eup %7501 }
 0x6a1   :  { %v8622_v43 = vmul.f32 %v7502_v61, %v7500_v44  ;;  %v1900_v44 = vld [vmem:[#allocation6 + $0x70] sm:$0xff]  ;;  %v1903_v61 = vld [vmem:[#allocation6 + $0x88] sm:$0xff] }
 0x6a3   :  { %1563 = vmatmul.mubr.f32.vlgmr.msra.gmra.mrb[12].mxu0 %v8622_v43  ;;  %1634 = vmatmul.mubr.f32.vlgmr.msra.gmra.mrb[12].mxu1 %v8622_v43 }
 0x6a4   :  { %5993 = vmatpush1.bf16.msra.mxu0 %v8179_v35  ;;  %6025 = vmatpush1.bf16.msra.mxu1 %v8182_v38  ;;  %v1887_v35 = vld [vmem:[#allocation6 + $0x8] sm:$0xff] }
 0x6a5   :  { %5995 = vmatprep.subr.bf16.mxu0 %v8185_v42  ;;  %6027 = vmatprep.subr.bf16.mxu1 %v8191_v47  ;;  %v1891_v38 = vld [vmem:[#allocation6 + $0x28] sm:$0xff]  ;;  %v1889_v42 = vld [vmem:[#allocation6 + $0x18] sm:$0xff] }
 0x6a6   :  { %1732 = vmatprep.mubr.f32.mxu0 %v8003_v0  ;;  %1803 = vmatprep.mubr.f32.mxu1 %v8003_v0  ;;  %v6054_v47 = vpack.c.bf16 %v1891_v38, %v1887_v35  ;;  %v1907_v35 = vld [vmem:[#allocation6 + $0xa8] sm:$0xff]  ;;  %v1905_v38 = vld [vmem:[#allocation6 + $0x98] sm:$0xff] }
 0x6a8   :  { %5997 = vmatpush1.bf16.msra.mxu0 %v8195_v50  ;;  %6029 = vmatpush1.bf16.msra.mxu1 %v8199_v54  ;;  %v1893_v50 = vld [vmem:[#allocation6 + $0x38] sm:$0xff] }
 0x6a9   :  { %5999 = vmatprep.subr.bf16.mxu0 %v8203_v57  ;;  %6031 = vmatprep.subr.bf16.mxu1 %v8207_v60  ;;  %v6086_v54 = vpack.c.bf16 %v1893_v50, %v1889_v42  ;;  %v1909_v42 = vld [vmem:[#allocation6 + $0xb8] sm:$0xff]  ;;  %v6060_v50 = vpack.c.bf16 %v1898_v39, %v1894_v15  ;;  %v5465_v15 = vmul.f32 -1.442695, %v8530_v12  ;;  %v6104_v39 = vpack.c.bf16 %v1924_v59, %v1920_v29 }
 0x6aa   :  { %v5466_v12 = vmul.f32 -1.442695, %v8576_v41  ;;  %v5467_v41 = vmul.f32 -1.442695, %v8622_v43 }
 0x6ac   :  { %6001 = vmatpush1.bf16.msra.mxu0 %v8214_v1  ;;  %6033 = vmatpush1.bf16.msra.mxu1 %v8218_v4 }
 0x6ad   :  { %6003 = vmatprep.subr.bf16.mxu0 %v8222_v7  ;;  %6035 = vmatprep.subr.bf16.mxu1 %v8226_v10 }
 0x6b0   :  { %6005 = vmatpush1.bf16.msra.mxu0 %v8233_v14  ;;  %6037 = vmatpush1.bf16.msra.mxu1 %v8237_v17 }
 0x6b1   :  { %6007 = vmatprep.subr.bf16.mxu0 %v8241_v20  ;;  %6039 = vmatprep.subr.bf16.mxu1 %v8245_v23 }
 0x6b4   :  { %6009 = vmatpush1.bf16.msra.mxu0 %v8252_v27  ;;  %6041 = vmatpush1.bf16.msra.mxu1 %v8256_v32 }
 0x6b5   :  { %6011 = vmatprep.subr.bf16.mxu0 %v8260_v36  ;;  %6043 = vmatprep.subr.bf16.mxu1 %v8264_v40 }
 0x6b8   :  { %6013 = vmatpush1.bf16.msra.mxu0 %v8271_v45  ;;  %6045 = vmatpush1.bf16.msra.mxu1 %v8275_v49 }
 0x6b9   :  { %6015 = vmatprep.subr.bf16.mxu0 %v8279_v53  ;;  %6047 = vmatprep.subr.bf16.mxu1 %v8283_v58 }
 0x6bc   :  { %6017 = vmatpush1.bf16.msra.mxu0 %v8290_v63  ;;  %6049 = vmatpush1.bf16.msra.mxu1 %v8294_v5 }
 0x6bd   :  { %6019 = vmatprep.subr.bf16.mxu0 %v8298_v9  ;;  %6051 = vmatprep.subr.bf16.mxu1 %v8302_v13 }
 0x6c0   :  { %6021 = vmatpush1.bf16.msra.mxu0 %v8309_v16  ;;  %6053 = vmatpush1.bf16.msra.mxu1 %v8313_v18  ;;  %v1886_v18 = vld [vmem:[#allocation6] sm:$0xff] }
 0x6c1   :  { %6055 = vmatprep.subr.bf16.mxu0 %v6054_v47  ;;  %6087 = vmatprep.subr.bf16.mxu1 %v6086_v54  ;;  %v6056_v21 = vpack.c.bf16 %v1890_v31, %v1886_v18  ;;  %v5462_v47 = vmul.f32 -1.442695, %v8392_v37  ;;  %v1917_v37 = vld [vmem:[#allocation6 + $0xf8] sm:$0xff]  ;;  %v5464_v18 = vmul.f32 -1.442695, %v8484_v62  ;;  %v6072_v62 = vpack.c.bf16 %v1922_v6, %v1918_v3 }
 0x776   :  { %v1564_v57 = vpop.f32.mrb[12].mxu0  ;;  %v1635_v60 = vpop.f32.mrb[12].mxu1 }
 0x777   :  { %v7218_v1 = vadd.f32 %v1564_v57, %v8370_v26  ;;  %v1566_v4 = vpop.f32.mrb[13].mxu0  ;;  %v1637_v7 = vpop.f32.mrb[13].mxu1  ;;  %v7234_v27 = vadd.f32 %v1635_v60, %v8386_v55  ;;  %v1902_v57 = vld [vmem:[#allocation6 + $0x80] sm:$0xff] }
 0x778   :  { %v7219_v10 = vadd.f32 %v1566_v4, %v8373_v28  ;;  %v7235_v20 = vadd.f32 %v1637_v7, %v8380_v48  ;;  %v1906_v60 = vld [vmem:[#allocation6 + $0xa0] sm:$0xff]  ;;  %v6094_v4 = vpack.c.bf16 %v1909_v42, %v1905_v38  ;;  %v1904_v7 = vld [vmem:[#allocation6 + $0x90] sm:$0xff]  ;;  %v1935_v42 = vld [vmem:[#allocation6 + $0x188] sm:$0xff] }
 0x779   :  { %v5456_v14 = vmul.f32 -1.442695, %v7218_v1  ;;  %v6062_v1 = vpack.c.bf16 %v1907_v35, %v1903_v61  ;;  %v1928_v35 = vld [vmem:[#allocation6 + $0x150] sm:$0xff] }
 0x77a   :  { %v5457_v17 = vmul.f32 -1.442695, %v7219_v10  ;;  %v5458_v23 = vmul.f32 -1.442695, %v7235_v20  ;;  %v1908_v10 = vld [vmem:[#allocation6 + $0xb0] sm:$0xff]  ;;  %v1913_v20 = vld [vmem:[#allocation6 + $0xd8] sm:$0xff] }
 0x77b   :  { %7503 = vpow2.f32 %v5456_v14  ;;  %v1911_v14 = vld [vmem:[#allocation6 + $0xc8] sm:$0xff]  ;;  %v1932_v38 = vld [vmem:[#allocation6 + $0x170] sm:$0xff] }
 0x77c   :  { %7505 = vpow2.f32 %v5457_v17  ;;  %v1915_v17 = vld [vmem:[#allocation6 + $0xe8] sm:$0xff] }
 0x77d   :  { %7507 = vpow2.f32 %v5458_v23  ;;  %v5463_v23 = vmul.f32 -1.442695, %v8438_v46 }
 0x77e   :  { %7509 = vtanh.f32 %v7234_v27  ;;  %v6064_v27 = vpack.c.bf16 %v1906_v60, %v1902_v57 }
 0x785   :  { %v7504_v32 = vpop.eup %7503 }
 0x786   :  { %v7506_v36 = vpop.eup %7505  ;;  %v1647_v40 = vadd.f32 1.0, %v7504_v32  ;;  %v6096_v32 = vpack.c.bf16 %v1908_v10, %v1904_v7  ;;  %v1938_v7 = vld [vmem:[#allocation6 + $0x1a0] sm:$0xff] }
 0x787   :  { %v1653_v45 = vadd.f32 1.0, %v7506_v36  ;;  %v7508_v49 = vpop.eup %7507  ;;  %v1910_v36 = vld [vmem:[#allocation6 + $0xc0] sm:$0xff] }
 0x788   :  { %7511 = vrcp.f32 %v1647_v40  ;;  %v7510_v53 = vpop.eup %7509  ;;  %v1660_v9 = vadd.f32 1.0, %v7508_v49  ;;  %v1914_v40 = vld [vmem:[#allocation6 + $0xe0] sm:$0xff]  ;;  %v6098_v49 = vpack.c.bf16 %v1917_v37, %v1913_v20  ;;  %v1936_v20 = vld [vmem:[#allocation6 + $0x190] sm:$0xff] }
 0x789   :  { %7513 = vrcp.f32 %v1653_v45  ;;  %v6066_v45 = vpack.c.bf16 %v1915_v17, %v1911_v14  ;;  %v6068_v46 = vpack.c.bf16 %v1914_v40, %v1910_v36  ;;  %v1940_v37 = vld [vmem:[#allocation6 + $0x1b0] sm:$0xff]  ;;  %v1949_v36 = vld [vmem:[#allocation6 + $0x1f8] sm:$0xff] }
 0x78a   :  { %7515 = vrcp.f32 %v1660_v9  ;;  %v1921_v9 = vld [vmem:[#allocation6 + $0x118] sm:$0xff] }
 0x792   :  { %v7512_v58 = vpop.eup %7511 }
 0x793   :  { %v7514_v63 = vpop.eup %7513  ;;  %v1664_v5 = vmul.f32 %v7512_v58, %v7510_v53  ;;  %v1912_v53 = vld [vmem:[#allocation6 + $0xd0] sm:$0xff] }
 0x794   :  { %v1663_v13 = vmul.f32 %v7514_v63, %v8619_v52  ;;  %v7516_v30 = vpop.eup %7515  ;;  %v1896_v52 = vld [vmem:[#allocation6 + $0x50] sm:$0xff]  ;;  %v1919_v63 = vld [vmem:[#allocation6 + $0x108] sm:$0xff] }
 0x795   :  { %v6092_v54 = vpack.c.bf16 %v1900_v44, %v1896_v52  ;;  %v1916_v58 = vld [vmem:[#allocation6 + $0xf0] sm:$0xff] }
 0x796   :  { %v8663_v16 = vadd.f32 %v1664_v5, %v1663_v13  ;;  %v1923_v5 = vld [vmem:[#allocation6 + $0x128] sm:$0xff]  ;;  %v1925_v13 = vld [vmem:[#allocation6 + $0x138] sm:$0xff]  ;;  %v6100_v31 = vpack.c.bf16 %v1916_v58, %v1912_v53  ;;  %v1942_v53 = vld [vmem:[#allocation6 + $0x1c0] sm:$0xff] }
 0x797   :  { %v6070_v2 = vpack.c.bf16 %v1923_v5, %v1919_v63  ;;  %v6102_v11 = vpack.c.bf16 %v1925_v13, %v1921_v9  ;;  %v1946_v9 = vld [vmem:[#allocation6 + $0x1e0] sm:$0xff]  ;;  %v1944_v13 = vld [vmem:[#allocation6 + $0x1d0] sm:$0xff] }
 0x798   :  { %7517 = vtanh.f32 %v8663_v16 }
 0x799   :  { %7519 = vpow2.f32 %v5462_v47  ;;  %v1939_v47 = vld [vmem:[#allocation6 + $0x1a8] sm:$0xff] }
 0x79a   :  { %7521 = vpow2.f32 %v5463_v23  ;;  %v6078_v14 = vpack.c.bf16 %v1939_v47, %v1935_v42  ;;  %v1943_v23 = vld [vmem:[#allocation6 + $0x1c8] sm:$0xff]  ;;  %v1950_v42 = vld [vmem:[#allocation7] sm:$0xff] }
 0x79b   :  { %7523 = vpow2.f32 %v5464_v18  ;;  %v1948_v18 = vld [vmem:[#allocation6 + $0x1f0] sm:$0xff]  ;;  %v1954_v47 = vld [vmem:[#allocation7 + $0x20] sm:$0xff] }
 0x79c   :  { %7525 = vpow2.f32 %v5465_v15  ;;  %v6116_v3 = vpack.c.bf16 %v1948_v18, %v1944_v13  ;;  %v1968_v13 = vld [vmem:[#allocation7 + $0x90] sm:$0xff] }
 0x79d   :  { %7527 = vpow2.f32 %v5466_v12  ;;  %v1952_v12 = vld [vmem:[#allocation7 + $0x10] sm:$0xff] }
 0x79e   :  { %v1972_v18 = vld [vmem:[#allocation7 + $0xb0] sm:$0xff] }
 0x7a2   :  { %v7518_v19 = vpop.eup %7517 }
 0x7a3   :  { %v8666_v8 = vmul.f32 %v7518_v19, %v7516_v30  ;;  %v1927_v30 = vld [vmem:[#allocation6 + $0x148] sm:$0xff]  ;;  %v7520_v52 = vpop.eup %7519 }
 0x7a4   :  { %v1931_v19 = vld [vmem:[#allocation6 + $0x168] sm:$0xff]  ;;  %v1862_v57 = vadd.f32 1.0, %v7520_v52  ;;  %v7522_v10 = vpop.eup %7521 }
 0x7a5   :  { %1733 = vmatmul.mubr.f32.vlgmr.msra.gmra.mrb[14].mxu0 %v8666_v8  ;;  %1804 = vmatmul.mubr.f32.vlgmr.msra.gmra.mrb[14].mxu1 %v8666_v8  ;;  %v6074_v44 = vpack.c.bf16 %v1931_v19, %v1927_v30  ;;  %v1863_v40 = vadd.f32 1.0, %v7522_v10  ;;  %v7524_v58 = vpop.eup %7523  ;;  %v1951_v52 = vld [vmem:[#allocation7 + $0x8] sm:$0xff] }
 0x7a6   :  { %6057 = vmatpush1.bf16.msra.mxu0 %v6056_v21  ;;  %6089 = vmatpush1.bf16.msra.mxu1 %v6088_v34  ;;  %v1929_v21 = vld [vmem:[#allocation6 + $0x158] sm:$0xff]  ;;  %7529 = vrcp.f32 %v1862_v57  ;;  %v1864_v43 = vadd.f32 1.0, %v7524_v58  ;;  %v7526_v6 = vpop.eup %7525  ;;  %v1956_v57 = vld [vmem:[#allocation7 + $0x30] sm:$0xff]  ;;  %v1966_v58 = vld [vmem:[#allocation7 + $0x80] sm:$0xff] }
 0x7a7   :  { %6059 = vmatprep.subr.bf16.mxu0 %v6058_v24  ;;  %6091 = vmatprep.subr.bf16.mxu1 %v6090_v56  ;;  %v1933_v34 = vld [vmem:[#allocation6 + $0x178] sm:$0xff]  ;;  %v1926_v24 = vld [vmem:[#allocation6 + $0x140] sm:$0xff]  ;;  %7531 = vpow2.f32 %v5467_v41  ;;  %v1967_v41 = vld [vmem:[#allocation7 + $0x88] sm:$0xff] }
 0x7a8   :  { %2100 = vmatprep.mubr.f32.mxu0 %v8003_v0  ;;  %2213 = vmatprep.mubr.f32.mxu1 %v8003_v0  ;;  %v1930_v56 = vld [vmem:[#allocation6 + $0x160] sm:$0xff]  ;;  %v6106_v61 = vpack.c.bf16 %v1933_v34, %v1929_v21  ;;  %7533 = vrcp.f32 %v1863_v40  ;;  %v1971_v40 = vld [vmem:[#allocation7 + $0xa8] sm:$0xff] }
 0x7a9   :  { %v6076_v60 = vpack.c.bf16 %v1930_v56, %v1926_v24 }
 0x7aa   :  { %6061 = vmatpush1.bf16.msra.mxu0 %v6060_v50  ;;  %6093 = vmatpush1.bf16.msra.mxu1 %v6092_v54  ;;  %v1937_v50 = vld [vmem:[#allocation6 + $0x198] sm:$0xff] }
 0x7ab   :  { %6063 = vmatprep.subr.bf16.mxu0 %v6062_v1  ;;  %6095 = vmatprep.subr.bf16.mxu1 %v6094_v4  ;;  %v1941_v54 = vld [vmem:[#allocation6 + $0x1b8] sm:$0xff]  ;;  %v6108_v1 = vpack.c.bf16 %v1932_v38, %v1928_v35  ;;  %v1934_v4 = vld [vmem:[#allocation6 + $0x180] sm:$0xff] }
 0x7ac   :  { %v6110_v17 = vpack.c.bf16 %v1941_v54, %v1937_v50  ;;  %v1957_v38 = vld [vmem:[#allocation7 + $0x38] sm:$0xff]  ;;  %v8697_v54 = vpack.c.bf16 %v1954_v47, %v1950_v42  ;;  %v1988_v42 = vld [vmem:[#allocation7 + $0x130] sm:$0xff] }
 0x7ae   :  { %6065 = vmatpush1.bf16.msra.mxu0 %v6064_v27  ;;  %6097 = vmatpush1.bf16.msra.mxu1 %v6096_v32  ;;  %v1947_v27 = vld [vmem:[#allocation6 + $0x1e8] sm:$0xff]  ;;  %v1945_v32 = vld [vmem:[#allocation6 + $0x1d8] sm:$0xff] }
 0x7af   :  { %6067 = vmatprep.subr.bf16.mxu0 %v6066_v45  ;;  %6099 = vmatprep.subr.bf16.mxu1 %v6098_v49  ;;  %v6080_v45 = vpack.c.bf16 %v1938_v7, %v1934_v4  ;;  %v6112_v49 = vpack.c.bf16 %v1940_v37, %v1936_v20  ;;  %v6082_v63 = vpack.c.bf16 %v1947_v27, %v1943_v23  ;;  %v1963_v4 = vld [vmem:[#allocation7 + $0x68] sm:$0xff]  ;;  %v1961_v7 = vld [vmem:[#allocation7 + $0x58] sm:$0xff]  ;;  %v1962_v20 = vld [vmem:[#allocation7 + $0x60] sm:$0xff] }
 0x7b0   :  { %v6114_v5 = vpack.c.bf16 %v1949_v36, %v1945_v32  ;;  %v1960_v27 = vld [vmem:[#allocation7 + $0x50] sm:$0xff] }
 0x7b1   :  { %v1964_v32 = vld [vmem:[#allocation7 + $0x70] sm:$0xff] }
 0x7b2   :  { %6069 = vmatpush1.bf16.msra.mxu0 %v6068_v46  ;;  %6101 = vmatpush1.bf16.msra.mxu1 %v6100_v31  ;;  %v5468_v46 = vmul.f32 -1.442695, %v8666_v8  ;;  %v6084_v31 = vpack.c.bf16 %v1946_v9, %v1942_v53  ;;  %v8712_v36 = vpack.c.bf16 %v1964_v32, %v1960_v27  ;;  %v1973_v53 = vld [vmem:[#allocation7 + $0xb8] sm:$0xff]  ;;  %v1992_v32 = vld [vmem:[#allocation7 + $0x150] sm:$0xff] }
 0x7b3   :  { %6071 = vmatprep.subr.bf16.mxu0 %v6070_v2  ;;  %6103 = vmatprep.subr.bf16.mxu1 %v6102_v11  ;;  %v1865_v2 = vadd.f32 1.0, %v7526_v6  ;;  %v7528_v11 = vpop.eup %7527 }
 0x7b4   :  { %7535 = vpow2.f32 %v5468_v46  ;;  %v7530_v29 = vpop.eup %7529  ;;  %v1866_v8 = vadd.f32 1.0, %v7528_v11  ;;  %v8724_v46 = vpack.c.bf16 %v1972_v18, %v1968_v13  ;;  %v1974_v11 = vld [vmem:[#allocation7 + $0xc0] sm:$0xff] }
 0x7b5   :  { %7537 = vrcp.f32 %v1864_v43  ;;  %v7532_v59 = vpop.eup %7531  ;;  %v1975_v43 = vld [vmem:[#allocation7 + $0xc8] sm:$0xff] }
 0x7b6   :  { %6073 = vmatpush1.bf16.msra.mxu0 %v6072_v62  ;;  %6105 = vmatpush1.bf16.msra.mxu1 %v6104_v39  ;;  %7539 = vrcp.f32 %v1865_v2  ;;  %v7534_v30 = vpop.eup %7533  ;;  %v1867_v19 = vadd.f32 1.0, %v7532_v59  ;;  %v1981_v2 = vld [vmem:[#allocation7 + $0xf8] sm:$0xff] }
 0x7b7   :  { %6075 = vmatprep.subr.bf16.mxu0 %v6074_v44  ;;  %6107 = vmatprep.subr.bf16.mxu1 %v6106_v61  ;;  %7541 = vrcp.f32 %v1866_v8  ;;  %v1955_v44 = vld [vmem:[#allocation7 + $0x28] sm:$0xff]  ;;  %v1953_v61 = vld [vmem:[#allocation7 + $0x18] sm:$0xff] }
 0x7b8   :  { %7543 = vrcp.f32 %v1867_v19  ;;  %v8693_v35 = vpack.c.bf16 %v1955_v44, %v1951_v52  ;;  %v8695_v50 = vpack.c.bf16 %v1957_v38, %v1953_v61  ;;  %v1980_v19 = vld [vmem:[#allocation7 + $0xf0] sm:$0xff]  ;;  %v1986_v52 = vld [vmem:[#allocation7 + $0x120] sm:$0xff] }
 0x7b9   :  { %v1984_v38 = vld [vmem:[#allocation7 + $0x110] sm:$0xff] }
 0x7ba   :  { %6077 = vmatpush1.bf16.msra.mxu0 %v6076_v60  ;;  %6109 = vmatpush1.bf16.msra.mxu1 %v6108_v1  ;;  %v8700_v60 = vpack.c.bf16 %v1956_v57, %v1952_v12  ;;  %v1959_v1 = vld [vmem:[#allocation7 + $0x48] sm:$0xff]  ;;  %v8748_v47 = vpack.c.bf16 %v1988_v42, %v1984_v38  ;;  %v2008_v42 = vld [vmem:[#allocation7 + $0x1d0] sm:$0xff] }
 0x7bb   :  { %6079 = vmatprep.subr.bf16.mxu0 %v6078_v14  ;;  %6111 = vmatprep.subr.bf16.mxu1 %v6110_v17  ;;  %v8705_v10 = vpack.c.bf16 %v1963_v4, %v1959_v1  ;;  %v1965_v14 = vld [vmem:[#allocation7 + $0x78] sm:$0xff]  ;;  %v1958_v17 = vld [vmem:[#allocation7 + $0x40] sm:$0xff]  ;;  %v1991_v12 = vld [vmem:[#allocation7 + $0x148] sm:$0xff] }
 0x7bc   :  { %v8707_v37 = vpack.c.bf16 %v1965_v14, %v1961_v7  ;;  %v8709_v23 = vpack.c.bf16 %v1962_v20, %v1958_v17  ;;  %v1995_v57 = vld [vmem:[#allocation7 + $0x168] sm:$0xff]  ;;  %v1993_v1 = vld [vmem:[#allocation7 + $0x158] sm:$0xff]  ;;  %v1990_v14 = vld [vmem:[#allocation7 + $0x140] sm:$0xff] }
 0x7bd   :  { %v8752_v4 = vpack.c.bf16 %v1995_v57, %v1991_v12  ;;  %v1997_v7 = vld [vmem:[#allocation7 + $0x178] sm:$0xff]  ;;  %v1994_v17 = vld [vmem:[#allocation7 + $0x160] sm:$0xff]  ;;  %v2012_v12 = vld [vmem:[#allocation7 + $0x1f0] sm:$0xff] }
 0x7be   :  { %6081 = vmatpush1.bf16.msra.mxu0 %v6080_v45  ;;  %6113 = vmatpush1.bf16.msra.mxu1 %v6112_v49  ;;  %v7536_v21 = vpop.eup %7535  ;;  %v1969_v45 = vld [vmem:[#allocation7 + $0x98] sm:$0xff]  ;;  %v8717_v49 = vpack.c.bf16 %v1971_v40, %v1967_v41  ;;  %v8755_v20 = vpack.c.bf16 %v1997_v7, %v1993_v1  ;;  %v8757_v27 = vpack.c.bf16 %v1994_v17, %v1990_v14  ;;  %v1996_v41 = vld [vmem:[#allocation7 + $0x170] sm:$0xff]  ;;  %v1999_v40 = vld [vmem:[#allocation7 + $0x188] sm:$0xff] }
 0x7bf   :  { %6083 = vmatprep.subr.bf16.mxu0 %v6082_v63  ;;  %6115 = vmatprep.subr.bf16.mxu1 %v6114_v5  ;;  %v7538_v34 = vpop.eup %7537  ;;  %v1868_v15 = vadd.f32 1.0, %v7536_v21  ;;  %v1970_v63 = vld [vmem:[#allocation7 + $0xa0] sm:$0xff]  ;;  %v8719_v5 = vpack.c.bf16 %v1973_v53, %v1969_v45  ;;  %v8760_v45 = vpack.c.bf16 %v1996_v41, %v1992_v32  ;;  %v2003_v53 = vld [vmem:[#allocation7 + $0x1a8] sm:$0xff]  ;;  %v8784_v57 = vpack.c.bf16 %v2012_v12, %v2008_v42 }
 0x7c0   :  { %v7540_v62 = vpop.eup %7539  ;;  %v8721_v9 = vpack.c.bf16 %v1970_v63, %v1966_v58  ;;  %v2001_v58 = vld [vmem:[#allocation7 + $0x198] sm:$0xff]  ;;  %v8763_v13 = vpack.c.bf16 %v2003_v53, %v1999_v40 }
 0x7c1   :  { %7545 = vrcp.f32 %v1868_v15  ;;  %v7542_v39 = vpop.eup %7541  ;;  %v1987_v15 = vld [vmem:[#allocation7 + $0x128] sm:$0xff]  ;;  %v2005_v63 = vld [vmem:[#allocation7 + $0x1b8] sm:$0xff] }
 0x7c2   :  { %6085 = vmatpush1.bf16.msra.mxu0 %v6084_v31  ;;  %6117 = vmatpush1.bf16.msra.mxu1 %v6116_v3  ;;  %v7544_v24 = vpop.eup %7543  ;;  %v1979_v31 = vld [vmem:[#allocation7 + $0xe8] sm:$0xff]  ;;  %v1977_v3 = vld [vmem:[#allocation7 + $0xd8] sm:$0xff]  ;;  %v8765_v18 = vpack.c.bf16 %v2005_v63, %v2001_v58 }
 0x7c3   :  { %6119 = vmatprep.subr.bf16.mxu0 %v8693_v35  ;;  %6151 = vmatprep.subr.bf16.mxu1 %v8695_v50  ;;  %v8729_v6 = vpack.c.bf16 %v1979_v31, %v1975_v43  ;;  %v8731_v8 = vpack.c.bf16 %v1981_v2, %v1977_v3  ;;  %v1998_v43 = vld [vmem:[#allocation7 + $0x180] sm:$0xff]  ;;  %v2000_v3 = vld [vmem:[#allocation7 + $0x190] sm:$0xff] }
 0x7c4   :  { %v2002_v31 = vld [vmem:[#allocation7 + $0x1a0] sm:$0xff] }
 0x7c5   :  { %2101 = vmatmul.mubr.f32.vlgmr.msra.gmra.mrb[16].mxu0 %v7530_v29  ;;  %2214 = vmatmul.mubr.f32.vlgmr.msra.gmra.mrb[16].mxu1 %v7530_v29  ;;  %v1978_v29 = vld [vmem:[#allocation7 + $0xe0] sm:$0xff]  ;;  %v8768_v2 = vpack.c.bf16 %v2002_v31, %v1998_v43 }
 0x7c6   :  { %2106 = vmatprep.mubr.f32.mxu0 %v8003_v0  ;;  %2219 = vmatprep.mubr.f32.mxu1 %v8003_v0  ;;  %v8733_v59 = vpack.c.bf16 %v1978_v29, %v1974_v11  ;;  %v2004_v11 = vld [vmem:[#allocation7 + $0x1b0] sm:$0xff] }
 0x7c7   :  { %6121 = vmatpush1.bf16.msra.mxu0 %v8697_v54  ;;  %6153 = vmatpush1.bf16.msra.mxu1 %v8700_v60  ;;  %v8772_v29 = vpack.c.bf16 %v2004_v11, %v2000_v3 }
 0x7c8   :  { %6123 = vmatprep.subr.bf16.mxu0 %v8705_v10  ;;  %6155 = vmatprep.subr.bf16.mxu1 %v8707_v37 }
 0x7c9   :  { %2107 = vmatmul.mubr.f32.gmra.mrb[18].mxu0 %v7534_v30  ;;  %2220 = vmatmul.mubr.f32.gmra.mrb[18].mxu1 %v7534_v30  ;;  %v1976_v30 = vld [vmem:[#allocation7 + $0xd0] sm:$0xff] }
 0x7ca   :  { %2112 = vmatprep.mubr.f32.mxu0 %v8003_v0  ;;  %2225 = vmatprep.mubr.f32.mxu1 %v8003_v0  ;;  %v8736_v21 = vpack.c.bf16 %v1980_v19, %v1976_v30  ;;  %v2007_v30 = vld [vmem:[#allocation7 + $0x1c8] sm:$0xff] }
 0x7cb   :  { %v7546_v56 = vpop.eup %7545  ;;  %6125 = vmatpush1.bf16.msra.mxu0 %v8709_v23  ;;  %6157 = vmatpush1.bf16.msra.mxu1 %v8712_v36  ;;  %v2011_v19 = vld [vmem:[#allocation7 + $0x1e8] sm:$0xff] }
 0x7cc   :  { %6127 = vmatprep.subr.bf16.mxu0 %v8717_v49  ;;  %6159 = vmatprep.subr.bf16.mxu1 %v8719_v5 }
 0x7cd   :  { %2113 = vmatmul.mubr.f32.gmra.mrb[20].mxu0 %v7538_v34  ;;  %2226 = vmatmul.mubr.f32.gmra.mrb[20].mxu1 %v7538_v34  ;;  %v1983_v34 = vld [vmem:[#allocation7 + $0x108] sm:$0xff] }
 0x7ce   :  { %2118 = vmatprep.mubr.f32.mxu0 %v8003_v0  ;;  %2231 = vmatprep.mubr.f32.mxu1 %v8003_v0 }
 0x7cf   :  { %6129 = vmatpush1.bf16.msra.mxu0 %v8721_v9  ;;  %6161 = vmatpush1.bf16.msra.mxu1 %v8724_v46 }
 0x7d0   :  { %6131 = vmatprep.subr.bf16.mxu0 %v8729_v6  ;;  %6163 = vmatprep.subr.bf16.mxu1 %v8731_v8 }
 0x7d1   :  { %2119 = vmatmul.mubr.f32.gmra.mrb[22].mxu0 %v7540_v62  ;;  %2232 = vmatmul.mubr.f32.gmra.mrb[22].mxu1 %v7540_v62  ;;  %v1985_v62 = vld [vmem:[#allocation7 + $0x118] sm:$0xff] }
 0x7d2   :  { %2124 = vmatprep.mubr.f32.mxu0 %v8003_v0  ;;  %2237 = vmatprep.mubr.f32.mxu1 %v8003_v0 }
 0x7d3   :  { %6133 = vmatpush1.bf16.msra.mxu0 %v8733_v59  ;;  %6165 = vmatpush1.bf16.msra.mxu1 %v8736_v21 }
 0x7d5   :  { %2125 = vmatmul.mubr.f32.gmra.mrb[24].mxu0 %v7542_v39  ;;  %2238 = vmatmul.mubr.f32.gmra.mrb[24].mxu1 %v7542_v39  ;;  %v8741_v39 = vpack.c.bf16 %v1987_v15, %v1983_v34  ;;  %v2009_v34 = vld [vmem:[#allocation7 + $0x1d8] sm:$0xff]  ;;  %v8777_v15 = vpack.c.bf16 %v2011_v19, %v2007_v30 }
 0x7d6   :  { %2130 = vmatprep.mubr.f32.mxu0 %v8003_v0  ;;  %2243 = vmatprep.mubr.f32.mxu1 %v8003_v0 }
 0x7d7   :  { %6135 = vmatprep.subr.bf16.mxu0 %v8741_v39 }
 0x7d9   :  { %2131 = vmatmul.mubr.f32.gmra.mrb[26].mxu0 %v7544_v24  ;;  %2244 = vmatmul.mubr.f32.gmra.mrb[26].mxu1 %v7544_v24  ;;  %v1989_v24 = vld [vmem:[#allocation7 + $0x138] sm:$0xff] }
 0x7da   :  { %2136 = vmatprep.mubr.f32.mxu0 %v8003_v0  ;;  %2249 = vmatprep.mubr.f32.mxu1 %v8003_v0  ;;  %v8743_v44 = vpack.c.bf16 %v1989_v24, %v1985_v62  ;;  %v2013_v62 = vld [vmem:[#allocation7 + $0x1f8] sm:$0xff]  ;;  %v2006_v24 = vld [vmem:[#allocation7 + $0x1c0] sm:$0xff] }
 0x7dc   :  { %6167 = vmatprep.subr.bf16.mxu1 %v8743_v44 }
 0x7dd   :  { %2137 = vmatmul.mubr.f32.gmra.mrb[28].mxu0 %v7546_v56  ;;  %2250 = vmatmul.mubr.f32.gmra.mrb[28].mxu1 %v7546_v56  ;;  %v1982_v56 = vld [vmem:[#allocation7 + $0x100] sm:$0xff] }
 0x7de   :  { %2142 = vmatprep.mubr.f32.mxu0 %v8003_v0  ;;  %2255 = vmatprep.mubr.f32.mxu1 %v8003_v0  ;;  %v8745_v61 = vpack.c.bf16 %v1986_v52, %v1982_v56  ;;  %v2010_v56 = vld [vmem:[#allocation7 + $0x1e0] sm:$0xff]  ;;  %v8779_v52 = vpack.c.bf16 %v2013_v62, %v2009_v34 }
 0x7df   :  { %6169 = vmatpush1.bf16.msra.mxu1 %v8748_v47  ;;  %v8781_v38 = vpack.c.bf16 %v2010_v56, %v2006_v24 }
 0x7e0   :  { %6137 = vmatpush1.bf16.msra.mxu0 %v8745_v61  ;;  %6171 = vmatprep.subr.bf16.mxu1 %v8755_v20 }
 0x7e1   :  { %6139 = vmatprep.subr.bf16.mxu0 %v8752_v4 }
 0x7e3   :  { %6173 = vmatpush1.bf16.msra.mxu1 %v8760_v45 }
 0x7e4   :  { %6141 = vmatpush1.bf16.msra.mxu0 %v8757_v27  ;;  %6175 = vmatprep.subr.bf16.mxu1 %v8765_v18 }
 0x7e5   :  { %6143 = vmatprep.subr.bf16.mxu0 %v8763_v13 }
 0x7e7   :  { %6177 = vmatpush1.bf16.msra.mxu1 %v8772_v29 }
 0x7e8   :  { %6145 = vmatpush1.bf16.msra.mxu0 %v8768_v2  ;;  %6179 = vmatprep.subr.bf16.mxu1 %v8779_v52 }
 0x7e9   :  { %6147 = vmatprep.subr.bf16.mxu0 %v8777_v15 }
 0x7eb   :  { %6181 = vmatpush1.bf16.msra.mxu1 %v8784_v57 }
 0x7ec   :  { %6149 = vmatpush1.bf16.msra.mxu0 %v8781_v38  ;;  %6215 = vmatprep.subr.bf16.mxu1 %v8695_v50 }
 0x7ed   :  { %6183 = vmatprep.subr.bf16.mxu0 %v8693_v35 }
 0x878   :  { %v1734_v1 = vpop.f32.mrb[14].mxu0  ;;  %v1805_v7 = vpop.f32.mrb[14].mxu1 }
 0x879   :  { %v7220_v14 = vadd.f32 %v1734_v1, %v8370_v26  ;;  %v1736_v17 = vpop.f32.mrb[15].mxu0  ;;  %v1807_v32 = vpop.f32.mrb[15].mxu1  ;;  %v7236_v43 = vadd.f32 %v1805_v7, %v8386_v55 }
 0x87a   :  { %v7221_v41 = vadd.f32 %v1736_v17, %v8373_v28  ;;  %v7237_v58 = vadd.f32 %v1807_v32, %v8380_v48 }
 0x87b   :  { %v5459_v40 = vmul.f32 -1.442695, %v7220_v14 }
 0x87c   :  { %v5460_v53 = vmul.f32 -1.442695, %v7221_v41  ;;  %v5461_v63 = vmul.f32 -1.442695, %v7237_v58 }
 0x87d   :  { %7547 = vpow2.f32 %v5459_v40 }
 0x87e   :  { %7549 = vpow2.f32 %v5460_v53 }
 0x87f   :  { %7551 = vpow2.f32 %v5461_v63 }
 0x880   :  { %7553 = vtanh.f32 %v7236_v43 }
 0x887   :  { %v7548_v31 = vpop.eup %7547 }
 0x888   :  { %v7550_v3 = vpop.eup %7549  ;;  %v1817_v11 = vadd.f32 1.0, %v7548_v31 }
 0x889   :  { %v1823_v30 = vadd.f32 1.0, %v7550_v3  ;;  %v7552_v26 = vpop.eup %7551 }
 0x88a   :  { %7555 = vrcp.f32 %v1817_v11  ;;  %v7554_v19 = vpop.eup %7553  ;;  %v1830_v24 = vadd.f32 1.0, %v7552_v26 }
 0x88b   :  { %7557 = vrcp.f32 %v1823_v30 }
 0x88c   :  { %7559 = vrcp.f32 %v1830_v24 }
 0x894   :  { %v7556_v28 = vpop.eup %7555 }
 0x895   :  { %v7558_v34 = vpop.eup %7557  ;;  %v1834_v62 = vmul.f32 %v7556_v28, %v7554_v19 }
 0x896   :  { %v1833_v56 = vmul.f32 %v7558_v34, %v8663_v16  ;;  %v7560_v55 = vpop.eup %7559  ;;  %v2014_v16 = vld [vmem:[%s9601_s6] sm:$0xf] }
 0x897   :  { %v8838_v32 = vrot.slane %v2014_v16, %v8362_v22  ;;  %v8841_v41 = vrot.slane %v2014_v16, %v8367_v25  ;;  %v8846_v30 = vrot.slane %v2014_v16, %v8375_v33  ;;  %v8850_v19 = vrot.slane %v2014_v16, %v8382_v51 }
 0x898   :  { %v1835_v48 = vadd.f32 %v1834_v62, %v1833_v56 }
 0x89a   :  { %7561 = vtanh.f32 %v1835_v48 }
 0x8a4   :  { %v7562_v42 = vpop.eup %7561 }
 0x8a5   :  { %v1837_v12 = vmul.f32 %v7562_v42, %v7560_v55 }
 0x8a7   :  { %v5469_v1 = vmul.f32 -1.442695, %v1837_v12 }
 0x8a9   :  { %7563 = vpow2.f32 %v5469_v1 }
 0x8b3   :  { %v7564_v7 = vpop.eup %7563 }
 0x8b4   :  { %v1869_v14 = vadd.f32 1.0, %v7564_v7 }
 0x8b6   :  { %7565 = vrcp.f32 %v1869_v14 }
 0x8c0   :  { %v7566_v17 = vpop.eup %7565 }
 0x8c1   :  { %2143 = vmatmul.mubr.f32.gmra.mrb[30].mxu0 %v7566_v17  ;;  %2256 = vmatmul.mubr.f32.gmra.mrb[30].mxu1 %v7566_v17 }
 0x8c2   :  { %2326 = vmatprep.mubr.f32.mxu0 %v8003_v0  ;;  %2397 = vmatprep.mubr.f32.mxu1 %v8003_v0 }
 0x8c5   :  { %2327 = vmatmul.mubr.f32.vlgmr.msra.gmra.mrb[16].mxu0 %v8003_v0  ;;  %2398 = vmatmul.mubr.f32.vlgmr.msra.gmra.mrb[16].mxu1 %v8003_v0 }
 0x8c6   :  { %6185 = vmatpush1.bf16.msra.mxu0 %v8697_v54  ;;  %6217 = vmatpush1.bf16.msra.mxu1 %v8700_v60 }
 0x8c7   :  { %6187 = vmatprep.subr.bf16.mxu0 %v8705_v10  ;;  %6219 = vmatprep.subr.bf16.mxu1 %v8707_v37 }
 0x8c8   :  { %2496 = vmatprep.mubr.f32.mxu0 %v8003_v0  ;;  %2567 = vmatprep.mubr.f32.mxu1 %v8003_v0 }
 0x8ca   :  { %6189 = vmatpush1.bf16.msra.mxu0 %v8709_v23  ;;  %6221 = vmatpush1.bf16.msra.mxu1 %v8712_v36 }
 0x8cb   :  { %6191 = vmatprep.subr.bf16.mxu0 %v8717_v49  ;;  %6223 = vmatprep.subr.bf16.mxu1 %v8719_v5 }
 0x8ce   :  { %6193 = vmatpush1.bf16.msra.mxu0 %v8721_v9  ;;  %6225 = vmatpush1.bf16.msra.mxu1 %v8724_v46 }
 0x8cf   :  { %6195 = vmatprep.subr.bf16.mxu0 %v8729_v6  ;;  %6227 = vmatprep.subr.bf16.mxu1 %v8731_v8 }
 0x8d2   :  { %6197 = vmatpush1.bf16.msra.mxu0 %v8733_v59  ;;  %6229 = vmatpush1.bf16.msra.mxu1 %v8736_v21 }
 0x8d3   :  { %6199 = vmatprep.subr.bf16.mxu0 %v8741_v39  ;;  %6231 = vmatprep.subr.bf16.mxu1 %v8743_v44 }
 0x8d6   :  { %6201 = vmatpush1.bf16.msra.mxu0 %v8745_v61  ;;  %6233 = vmatpush1.bf16.msra.mxu1 %v8748_v47 }
 0x8d7   :  { %6203 = vmatprep.subr.bf16.mxu0 %v8752_v4  ;;  %6235 = vmatprep.subr.bf16.mxu1 %v8755_v20 }
 0x8da   :  { %6205 = vmatpush1.bf16.msra.mxu0 %v8757_v27  ;;  %6237 = vmatpush1.bf16.msra.mxu1 %v8760_v45 }
 0x8db   :  { %6207 = vmatprep.subr.bf16.mxu0 %v8763_v13  ;;  %6239 = vmatprep.subr.bf16.mxu1 %v8765_v18 }
 0x8de   :  { %6209 = vmatpush1.bf16.msra.mxu0 %v8768_v2  ;;  %6241 = vmatpush1.bf16.msra.mxu1 %v8772_v29 }
 0x8df   :  { %6211 = vmatprep.subr.bf16.mxu0 %v8777_v15  ;;  %6243 = vmatprep.subr.bf16.mxu1 %v8779_v52 }
 0x8e2   :  { %6213 = vmatpush1.bf16.msra.mxu0 %v8781_v38  ;;  %6245 = vmatpush1.bf16.msra.mxu1 %v8784_v57 }
 0x8e3   :  { %6247 = vmatprep.subr.bf16.mxu0 %v8693_v35  ;;  %6279 = vmatprep.subr.bf16.mxu1 %v8695_v50 }
 0x998   :  { %v2328_v40 = vpop.f32.mrb[16].mxu0  ;;  %v2399_v53 = vpop.f32.mrb[16].mxu1 }
 0x999   :  { %v7238_v58 = vadd.f32 %v2328_v40, %v8838_v32  ;;  %v2330_v63 = vpop.f32.mrb[17].mxu0  ;;  %v2401_v43 = vpop.f32.mrb[17].mxu1  ;;  %v7254_v34 = vadd.f32 %v2399_v53, %v8850_v19 }
 0x99a   :  { %v7239_v31 = vadd.f32 %v2330_v63, %v8841_v41  ;;  %v7255_v26 = vadd.f32 %v2401_v43, %v8846_v30 }
 0x99b   :  { %v5470_v3 = vmul.f32 -1.442695, %v7238_v58 }
 0x99c   :  { %v5471_v11 = vmul.f32 -1.442695, %v7239_v31  ;;  %v5472_v28 = vmul.f32 -1.442695, %v7255_v26 }
 0x99d   :  { %7567 = vpow2.f32 %v5470_v3 }
 0x99e   :  { %7569 = vpow2.f32 %v5471_v11 }
 0x99f   :  { %7571 = vpow2.f32 %v5472_v28 }
 0x9a0   :  { %7573 = vtanh.f32 %v7254_v34 }
 0x9a7   :  { %v7568_v62 = vpop.eup %7567 }
 0x9a8   :  { %v7570_v24 = vpop.eup %7569  ;;  %v2411_v56 = vadd.f32 1.0, %v7568_v62 }
 0x9a9   :  { %v2417_v48 = vadd.f32 1.0, %v7570_v24  ;;  %v7572_v55 = vpop.eup %7571 }
 0x9aa   :  { %7575 = vrcp.f32 %v2411_v56  ;;  %v7574_v42 = vpop.eup %7573  ;;  %v2424_v14 = vadd.f32 1.0, %v7572_v55 }
 0x9ab   :  { %7577 = vrcp.f32 %v2417_v48 }
 0x9ac   :  { %7579 = vrcp.f32 %v2424_v14 }
 0x9b4   :  { %v7576_v12 = vpop.eup %7575 }
 0x9b5   :  { %v7578_v1 = vpop.eup %7577  ;;  %v2428_v7 = vmul.f32 %v7576_v12, %v7574_v42 }
 0x9b6   :  { %v2427_v17 = vmul.f32 0.0, %v7578_v1  ;;  %v7580_v40 = vpop.eup %7579 }
 0x9b8   :  { %v8853_v16 = vadd.f32 %v2428_v7, %v2427_v17 }
 0x9ba   :  { %7581 = vtanh.f32 %v8853_v16 }
 0x9c4   :  { %v7582_v53 = vpop.eup %7581 }
 0x9c5   :  { %v8856_v58 = vmul.f32 %v7582_v53, %v7580_v40 }
 0x9c7   :  { %2497 = vmatmul.mubr.f32.vlgmr.msra.gmra.mrb[18].mxu0 %v8856_v58  ;;  %2568 = vmatmul.mubr.f32.vlgmr.msra.gmra.mrb[18].mxu1 %v8856_v58 }
 0x9c8   :  { %6249 = vmatpush1.bf16.msra.mxu0 %v8697_v54  ;;  %6281 = vmatpush1.bf16.msra.mxu1 %v8700_v60 }
 0x9c9   :  { %6251 = vmatprep.subr.bf16.mxu0 %v8705_v10  ;;  %6283 = vmatprep.subr.bf16.mxu1 %v8707_v37 }
 0x9ca   :  { %2666 = vmatprep.mubr.f32.mxu0 %v8003_v0  ;;  %2737 = vmatprep.mubr.f32.mxu1 %v8003_v0 }
 0x9cc   :  { %6253 = vmatpush1.bf16.msra.mxu0 %v8709_v23  ;;  %6285 = vmatpush1.bf16.msra.mxu1 %v8712_v36 }
 0x9cd   :  { %6255 = vmatprep.subr.bf16.mxu0 %v8717_v49  ;;  %6287 = vmatprep.subr.bf16.mxu1 %v8719_v5 }
 0x9d0   :  { %6257 = vmatpush1.bf16.msra.mxu0 %v8721_v9  ;;  %6289 = vmatpush1.bf16.msra.mxu1 %v8724_v46 }
 0x9d1   :  { %6259 = vmatprep.subr.bf16.mxu0 %v8729_v6  ;;  %6291 = vmatprep.subr.bf16.mxu1 %v8731_v8 }
 0x9d4   :  { %6261 = vmatpush1.bf16.msra.mxu0 %v8733_v59  ;;  %6293 = vmatpush1.bf16.msra.mxu1 %v8736_v21 }
 0x9d5   :  { %6263 = vmatprep.subr.bf16.mxu0 %v8741_v39  ;;  %6295 = vmatprep.subr.bf16.mxu1 %v8743_v44 }
 0x9d8   :  { %6265 = vmatpush1.bf16.msra.mxu0 %v8745_v61  ;;  %6297 = vmatpush1.bf16.msra.mxu1 %v8748_v47 }
 0x9d9   :  { %6267 = vmatprep.subr.bf16.mxu0 %v8752_v4  ;;  %6299 = vmatprep.subr.bf16.mxu1 %v8755_v20 }
 0x9dc   :  { %6269 = vmatpush1.bf16.msra.mxu0 %v8757_v27  ;;  %6301 = vmatpush1.bf16.msra.mxu1 %v8760_v45 }
 0x9dd   :  { %6271 = vmatprep.subr.bf16.mxu0 %v8763_v13  ;;  %6303 = vmatprep.subr.bf16.mxu1 %v8765_v18 }
 0x9e0   :  { %6273 = vmatpush1.bf16.msra.mxu0 %v8768_v2  ;;  %6305 = vmatpush1.bf16.msra.mxu1 %v8772_v29 }
 0x9e1   :  { %6275 = vmatprep.subr.bf16.mxu0 %v8777_v15  ;;  %6307 = vmatprep.subr.bf16.mxu1 %v8779_v52 }
 0x9e4   :  { %6277 = vmatpush1.bf16.msra.mxu0 %v8781_v38  ;;  %6309 = vmatpush1.bf16.msra.mxu1 %v8784_v57 }
 0x9e5   :  { %6311 = vmatprep.subr.bf16.mxu0 %v8693_v35  ;;  %6343 = vmatprep.subr.bf16.mxu1 %v8695_v50 }
 0xa9a   :  { %v2498_v63 = vpop.f32.mrb[18].mxu0  ;;  %v2569_v43 = vpop.f32.mrb[18].mxu1 }
 0xa9b   :  { %v7240_v31 = vadd.f32 %v2498_v63, %v8838_v32  ;;  %v2500_v3 = vpop.f32.mrb[19].mxu0  ;;  %v2571_v11 = vpop.f32.mrb[19].mxu1  ;;  %v7256_v56 = vadd.f32 %v2569_v43, %v8850_v19 }
 0xa9c   :  { %v7241_v26 = vadd.f32 %v2500_v3, %v8841_v41  ;;  %v7257_v62 = vadd.f32 %v2571_v11, %v8846_v30 }
 0xa9d   :  { %v5473_v28 = vmul.f32 -1.442695, %v7240_v31 }
 0xa9e   :  { %v5474_v34 = vmul.f32 -1.442695, %v7241_v26  ;;  %v5475_v24 = vmul.f32 -1.442695, %v7257_v62 }
 0xa9f   :  { %7583 = vpow2.f32 %v5473_v28 }
 0xaa0   :  { %7585 = vpow2.f32 %v5474_v34 }
 0xaa1   :  { %7587 = vpow2.f32 %v5475_v24 }
 0xaa2   :  { %7589 = vtanh.f32 %v7256_v56 }
 0xaa9   :  { %v7584_v48 = vpop.eup %7583 }
 0xaaa   :  { %v7586_v55 = vpop.eup %7585  ;;  %v2581_v42 = vadd.f32 1.0, %v7584_v48 }
 0xaab   :  { %v2587_v12 = vadd.f32 1.0, %v7586_v55  ;;  %v7588_v1 = vpop.eup %7587 }
 0xaac   :  { %7591 = vrcp.f32 %v2581_v42  ;;  %v7590_v7 = vpop.eup %7589  ;;  %v2594_v53 = vadd.f32 1.0, %v7588_v1 }
 0xaad   :  { %7593 = vrcp.f32 %v2587_v12 }
 0xaae   :  { %7595 = vrcp.f32 %v2594_v53 }
 0xab6   :  { %v7592_v14 = vpop.eup %7591 }
 0xab7   :  { %v7594_v17 = vpop.eup %7593  ;;  %v2598_v40 = vmul.f32 %v7592_v14, %v7590_v7 }
 0xab8   :  { %v2597_v63 = vmul.f32 %v7594_v17, %v8853_v16  ;;  %v7596_v43 = vpop.eup %7595 }
 0xaba   :  { %v8899_v31 = vadd.f32 %v2598_v40, %v2597_v63 }
 0xabc   :  { %7597 = vtanh.f32 %v8899_v31 }
 0xac6   :  { %v7598_v3 = vpop.eup %7597 }
 0xac7   :  { %v8902_v11 = vmul.f32 %v7598_v3, %v7596_v43 }
 0xac9   :  { %2667 = vmatmul.mubr.f32.vlgmr.msra.gmra.mrb[20].mxu0 %v8902_v11  ;;  %2738 = vmatmul.mubr.f32.vlgmr.msra.gmra.mrb[20].mxu1 %v8902_v11 }
 0xaca   :  { %6313 = vmatpush1.bf16.msra.mxu0 %v8697_v54  ;;  %6345 = vmatpush1.bf16.msra.mxu1 %v8700_v60 }
 0xacb   :  { %6315 = vmatprep.subr.bf16.mxu0 %v8705_v10  ;;  %6347 = vmatprep.subr.bf16.mxu1 %v8707_v37 }
 0xacc   :  { %2836 = vmatprep.mubr.f32.mxu0 %v8003_v0  ;;  %2907 = vmatprep.mubr.f32.mxu1 %v8003_v0 }
 0xace   :  { %6317 = vmatpush1.bf16.msra.mxu0 %v8709_v23  ;;  %6349 = vmatpush1.bf16.msra.mxu1 %v8712_v36 }
 0xacf   :  { %6319 = vmatprep.subr.bf16.mxu0 %v8717_v49  ;;  %6351 = vmatprep.subr.bf16.mxu1 %v8719_v5 }
 0xad2   :  { %6321 = vmatpush1.bf16.msra.mxu0 %v8721_v9  ;;  %6353 = vmatpush1.bf16.msra.mxu1 %v8724_v46 }
 0xad3   :  { %6323 = vmatprep.subr.bf16.mxu0 %v8729_v6  ;;  %6355 = vmatprep.subr.bf16.mxu1 %v8731_v8 }
 0xad6   :  { %6325 = vmatpush1.bf16.msra.mxu0 %v8733_v59  ;;  %6357 = vmatpush1.bf16.msra.mxu1 %v8736_v21 }
 0xad7   :  { %6327 = vmatprep.subr.bf16.mxu0 %v8741_v39  ;;  %6359 = vmatprep.subr.bf16.mxu1 %v8743_v44 }
 0xada   :  { %6329 = vmatpush1.bf16.msra.mxu0 %v8745_v61  ;;  %6361 = vmatpush1.bf16.msra.mxu1 %v8748_v47 }
 0xadb   :  { %6331 = vmatprep.subr.bf16.mxu0 %v8752_v4  ;;  %6363 = vmatprep.subr.bf16.mxu1 %v8755_v20 }
 0xade   :  { %6333 = vmatpush1.bf16.msra.mxu0 %v8757_v27  ;;  %6365 = vmatpush1.bf16.msra.mxu1 %v8760_v45 }
 0xadf   :  { %6335 = vmatprep.subr.bf16.mxu0 %v8763_v13  ;;  %6367 = vmatprep.subr.bf16.mxu1 %v8765_v18 }
 0xae2   :  { %6337 = vmatpush1.bf16.msra.mxu0 %v8768_v2  ;;  %6369 = vmatpush1.bf16.msra.mxu1 %v8772_v29 }
 0xae3   :  { %6339 = vmatprep.subr.bf16.mxu0 %v8777_v15  ;;  %6371 = vmatprep.subr.bf16.mxu1 %v8779_v52 }
 0xae6   :  { %6341 = vmatpush1.bf16.msra.mxu0 %v8781_v38  ;;  %6373 = vmatpush1.bf16.msra.mxu1 %v8784_v57 }
 0xae7   :  { %6375 = vmatprep.subr.bf16.mxu0 %v8693_v35  ;;  %6407 = vmatprep.subr.bf16.mxu1 %v8695_v50 }
 0xb9c   :  { %v2668_v16 = vpop.f32.mrb[20].mxu0  ;;  %v2739_v26 = vpop.f32.mrb[20].mxu1 }
 0xb9d   :  { %v7242_v28 = vadd.f32 %v2668_v16, %v8838_v32  ;;  %v2670_v34 = vpop.f32.mrb[21].mxu0  ;;  %v2741_v62 = vpop.f32.mrb[21].mxu1  ;;  %v7258_v12 = vadd.f32 %v2739_v26, %v8850_v19 }
 0xb9e   :  { %v7243_v24 = vadd.f32 %v2670_v34, %v8841_v41  ;;  %v7259_v55 = vadd.f32 %v2741_v62, %v8846_v30 }
 0xb9f   :  { %v5476_v56 = vmul.f32 -1.442695, %v7242_v28 }
 0xba0   :  { %v5477_v48 = vmul.f32 -1.442695, %v7243_v24  ;;  %v5478_v42 = vmul.f32 -1.442695, %v7259_v55 }
 0xba1   :  { %7599 = vpow2.f32 %v5476_v56 }
 0xba2   :  { %7601 = vpow2.f32 %v5477_v48 }
 0xba3   :  { %7603 = vpow2.f32 %v5478_v42 }
 0xba4   :  { %7605 = vtanh.f32 %v7258_v12 }
 0xbab   :  { %v7600_v1 = vpop.eup %7599 }
 0xbac   :  { %v7602_v7 = vpop.eup %7601  ;;  %v2751_v14 = vadd.f32 1.0, %v7600_v1 }
 0xbad   :  { %v2757_v17 = vadd.f32 1.0, %v7602_v7  ;;  %v7604_v40 = vpop.eup %7603 }
 0xbae   :  { %7607 = vrcp.f32 %v2751_v14  ;;  %v7606_v53 = vpop.eup %7605  ;;  %v2764_v16 = vadd.f32 1.0, %v7604_v40 }
 0xbaf   :  { %7609 = vrcp.f32 %v2757_v17 }
 0xbb0   :  { %7611 = vrcp.f32 %v2764_v16 }
 0xbb8   :  { %v7608_v63 = vpop.eup %7607 }
 0xbb9   :  { %v7610_v43 = vpop.eup %7609  ;;  %v2768_v3 = vmul.f32 %v7608_v63, %v7606_v53 }
 0xbba   :  { %v2767_v28 = vmul.f32 %v7610_v43, %v8899_v31  ;;  %v7612_v26 = vpop.eup %7611 }
 0xbbc   :  { %v8945_v34 = vadd.f32 %v2768_v3, %v2767_v28 }
 0xbbe   :  { %7613 = vtanh.f32 %v8945_v34 }
 0xbc8   :  { %v7614_v62 = vpop.eup %7613 }
 0xbc9   :  { %v8948_v24 = vmul.f32 %v7614_v62, %v7612_v26 }
 0xbcb   :  { %2837 = vmatmul.mubr.f32.vlgmr.msra.gmra.mrb[22].mxu0 %v8948_v24  ;;  %2908 = vmatmul.mubr.f32.vlgmr.msra.gmra.mrb[22].mxu1 %v8948_v24 }
 0xbcc   :  { %6377 = vmatpush1.bf16.msra.mxu0 %v8697_v54  ;;  %6409 = vmatpush1.bf16.msra.mxu1 %v8700_v60 }
 0xbcd   :  { %6379 = vmatprep.subr.bf16.mxu0 %v8705_v10  ;;  %6411 = vmatprep.subr.bf16.mxu1 %v8707_v37 }
 0xbce   :  { %3006 = vmatprep.mubr.f32.mxu0 %v8003_v0  ;;  %3077 = vmatprep.mubr.f32.mxu1 %v8003_v0 }
 0xbd0   :  { %6381 = vmatpush1.bf16.msra.mxu0 %v8709_v23  ;;  %6413 = vmatpush1.bf16.msra.mxu1 %v8712_v36 }
 0xbd1   :  { %6383 = vmatprep.subr.bf16.mxu0 %v8717_v49  ;;  %6415 = vmatprep.subr.bf16.mxu1 %v8719_v5 }
 0xbd4   :  { %6385 = vmatpush1.bf16.msra.mxu0 %v8721_v9  ;;  %6417 = vmatpush1.bf16.msra.mxu1 %v8724_v46 }
 0xbd5   :  { %6387 = vmatprep.subr.bf16.mxu0 %v8729_v6  ;;  %6419 = vmatprep.subr.bf16.mxu1 %v8731_v8 }
 0xbd8   :  { %6389 = vmatpush1.bf16.msra.mxu0 %v8733_v59  ;;  %6421 = vmatpush1.bf16.msra.mxu1 %v8736_v21 }
 0xbd9   :  { %6391 = vmatprep.subr.bf16.mxu0 %v8741_v39  ;;  %6423 = vmatprep.subr.bf16.mxu1 %v8743_v44 }
 0xbdc   :  { %6393 = vmatpush1.bf16.msra.mxu0 %v8745_v61  ;;  %6425 = vmatpush1.bf16.msra.mxu1 %v8748_v47 }
 0xbdd   :  { %6395 = vmatprep.subr.bf16.mxu0 %v8752_v4  ;;  %6427 = vmatprep.subr.bf16.mxu1 %v8755_v20 }
 0xbe0   :  { %6397 = vmatpush1.bf16.msra.mxu0 %v8757_v27  ;;  %6429 = vmatpush1.bf16.msra.mxu1 %v8760_v45 }
 0xbe1   :  { %6399 = vmatprep.subr.bf16.mxu0 %v8763_v13  ;;  %6431 = vmatprep.subr.bf16.mxu1 %v8765_v18 }
 0xbe4   :  { %6401 = vmatpush1.bf16.msra.mxu0 %v8768_v2  ;;  %6433 = vmatpush1.bf16.msra.mxu1 %v8772_v29 }
 0xbe5   :  { %6403 = vmatprep.subr.bf16.mxu0 %v8777_v15  ;;  %6435 = vmatprep.subr.bf16.mxu1 %v8779_v52 }
 0xbe8   :  { %6405 = vmatpush1.bf16.msra.mxu0 %v8781_v38  ;;  %6437 = vmatpush1.bf16.msra.mxu1 %v8784_v57 }
 0xbe9   :  { %6439 = vmatprep.subr.bf16.mxu0 %v8693_v35  ;;  %6471 = vmatprep.subr.bf16.mxu1 %v8695_v50 }
 0xc9e   :  { %v2838_v31 = vpop.f32.mrb[22].mxu0  ;;  %v2909_v56 = vpop.f32.mrb[22].mxu1 }
 0xc9f   :  { %v7244_v48 = vadd.f32 %v2838_v31, %v8838_v32  ;;  %v2840_v55 = vpop.f32.mrb[23].mxu0  ;;  %v2911_v42 = vpop.f32.mrb[23].mxu1  ;;  %v7260_v40 = vadd.f32 %v2909_v56, %v8850_v19 }
 0xca0   :  { %v7245_v12 = vadd.f32 %v2840_v55, %v8841_v41  ;;  %v7261_v14 = vadd.f32 %v2911_v42, %v8846_v30 }
 0xca1   :  { %v5479_v1 = vmul.f32 -1.442695, %v7244_v48 }
 0xca2   :  { %v5480_v7 = vmul.f32 -1.442695, %v7245_v12  ;;  %v5481_v17 = vmul.f32 -1.442695, %v7261_v14 }
 0xca3   :  { %7615 = vpow2.f32 %v5479_v1 }
 0xca4   :  { %7617 = vpow2.f32 %v5480_v7 }
 0xca5   :  { %7619 = vpow2.f32 %v5481_v17 }
 0xca6   :  { %7621 = vtanh.f32 %v7260_v40 }
 0xcad   :  { %v7616_v53 = vpop.eup %7615 }
 0xcae   :  { %v7618_v63 = vpop.eup %7617  ;;  %v2921_v43 = vadd.f32 1.0, %v7616_v53 }
 0xcaf   :  { %v2927_v3 = vadd.f32 1.0, %v7618_v63  ;;  %v7620_v16 = vpop.eup %7619 }
 0xcb0   :  { %7623 = vrcp.f32 %v2921_v43  ;;  %v7622_v28 = vpop.eup %7621  ;;  %v2934_v48 = vadd.f32 1.0, %v7620_v16 }
 0xcb1   :  { %7625 = vrcp.f32 %v2927_v3 }
 0xcb2   :  { %7627 = vrcp.f32 %v2934_v48 }
 0xcba   :  { %v7624_v26 = vpop.eup %7623 }
 0xcbb   :  { %v7626_v62 = vpop.eup %7625  ;;  %v2938_v31 = vmul.f32 %v7624_v26, %v7622_v28 }
 0xcbc   :  { %v2937_v55 = vmul.f32 %v7626_v62, %v8945_v34  ;;  %v7628_v56 = vpop.eup %7627 }
 0xcbe   :  { %v8991_v42 = vadd.f32 %v2938_v31, %v2937_v55 }
 0xcc0   :  { %7629 = vtanh.f32 %v8991_v42 }
 0xcca   :  { %v7630_v12 = vpop.eup %7629 }
 0xccb   :  { %v8994_v1 = vmul.f32 %v7630_v12, %v7628_v56 }
 0xccd   :  { %3007 = vmatmul.mubr.f32.vlgmr.msra.gmra.mrb[24].mxu0 %v8994_v1  ;;  %3078 = vmatmul.mubr.f32.vlgmr.msra.gmra.mrb[24].mxu1 %v8994_v1 }
 0xcce   :  { %6441 = vmatpush1.bf16.msra.mxu0 %v8697_v54  ;;  %6473 = vmatpush1.bf16.msra.mxu1 %v8700_v60 }
 0xccf   :  { %6443 = vmatprep.subr.bf16.mxu0 %v8705_v10  ;;  %6475 = vmatprep.subr.bf16.mxu1 %v8707_v37 }
 0xcd0   :  { %3176 = vmatprep.mubr.f32.mxu0 %v8003_v0  ;;  %3247 = vmatprep.mubr.f32.mxu1 %v8003_v0 }
 0xcd2   :  { %6445 = vmatpush1.bf16.msra.mxu0 %v8709_v23  ;;  %6477 = vmatpush1.bf16.msra.mxu1 %v8712_v36 }
 0xcd3   :  { %6447 = vmatprep.subr.bf16.mxu0 %v8717_v49  ;;  %6479 = vmatprep.subr.bf16.mxu1 %v8719_v5 }
 0xcd6   :  { %6449 = vmatpush1.bf16.msra.mxu0 %v8721_v9  ;;  %6481 = vmatpush1.bf16.msra.mxu1 %v8724_v46 }
 0xcd7   :  { %6451 = vmatprep.subr.bf16.mxu0 %v8729_v6  ;;  %6483 = vmatprep.subr.bf16.mxu1 %v8731_v8 }
 0xcda   :  { %6453 = vmatpush1.bf16.msra.mxu0 %v8733_v59  ;;  %6485 = vmatpush1.bf16.msra.mxu1 %v8736_v21 }
 0xcdb   :  { %6455 = vmatprep.subr.bf16.mxu0 %v8741_v39  ;;  %6487 = vmatprep.subr.bf16.mxu1 %v8743_v44 }
 0xcde   :  { %6457 = vmatpush1.bf16.msra.mxu0 %v8745_v61  ;;  %6489 = vmatpush1.bf16.msra.mxu1 %v8748_v47 }
 0xcdf   :  { %6459 = vmatprep.subr.bf16.mxu0 %v8752_v4  ;;  %6491 = vmatprep.subr.bf16.mxu1 %v8755_v20 }
 0xce2   :  { %6461 = vmatpush1.bf16.msra.mxu0 %v8757_v27  ;;  %6493 = vmatpush1.bf16.msra.mxu1 %v8760_v45 }
 0xce3   :  { %6463 = vmatprep.subr.bf16.mxu0 %v8763_v13  ;;  %6495 = vmatprep.subr.bf16.mxu1 %v8765_v18 }
 0xce6   :  { %6465 = vmatpush1.bf16.msra.mxu0 %v8768_v2  ;;  %6497 = vmatpush1.bf16.msra.mxu1 %v8772_v29 }
 0xce7   :  { %6467 = vmatprep.subr.bf16.mxu0 %v8777_v15  ;;  %6499 = vmatprep.subr.bf16.mxu1 %v8779_v52 }
 0xcea   :  { %6469 = vmatpush1.bf16.msra.mxu0 %v8781_v38  ;;  %6501 = vmatpush1.bf16.msra.mxu1 %v8784_v57 }
 0xceb   :  { %6503 = vmatprep.subr.bf16.mxu0 %v8693_v35  ;;  %6535 = vmatprep.subr.bf16.mxu1 %v8695_v50 }
 0xda0   :  { %v3008_v34 = vpop.f32.mrb[24].mxu0  ;;  %v3079_v7 = vpop.f32.mrb[24].mxu1 }
 0xda1   :  { %v7246_v14 = vadd.f32 %v3008_v34, %v8838_v32  ;;  %v3010_v17 = vpop.f32.mrb[25].mxu0  ;;  %v3081_v40 = vpop.f32.mrb[25].mxu1  ;;  %v7262_v28 = vadd.f32 %v3079_v7, %v8850_v19 }
 0xda2   :  { %v7247_v53 = vadd.f32 %v3010_v17, %v8841_v41  ;;  %v7263_v3 = vadd.f32 %v3081_v40, %v8846_v30 }
 0xda3   :  { %v5482_v63 = vmul.f32 -1.442695, %v7246_v14 }
 0xda4   :  { %v5483_v43 = vmul.f32 -1.442695, %v7247_v53  ;;  %v5484_v16 = vmul.f32 -1.442695, %v7263_v3 }
 0xda5   :  { %7631 = vpow2.f32 %v5482_v63 }
 0xda6   :  { %7633 = vpow2.f32 %v5483_v43 }
 0xda7   :  { %7635 = vpow2.f32 %v5484_v16 }
 0xda8   :  { %7637 = vtanh.f32 %v7262_v28 }
 0xdaf   :  { %v7632_v26 = vpop.eup %7631 }
 0xdb0   :  { %v7634_v62 = vpop.eup %7633  ;;  %v3091_v31 = vadd.f32 1.0, %v7632_v26 }
 0xdb1   :  { %v3097_v48 = vadd.f32 1.0, %v7634_v62  ;;  %v7636_v55 = vpop.eup %7635 }
 0xdb2   :  { %7639 = vrcp.f32 %v3091_v31  ;;  %v7638_v56 = vpop.eup %7637  ;;  %v3104_v17 = vadd.f32 1.0, %v7636_v55 }
 0xdb3   :  { %7641 = vrcp.f32 %v3097_v48 }
 0xdb4   :  { %7643 = vrcp.f32 %v3104_v17 }
 0xdbc   :  { %v7640_v12 = vpop.eup %7639 }
 0xdbd   :  { %v7642_v34 = vpop.eup %7641  ;;  %v3108_v14 = vmul.f32 %v7640_v12, %v7638_v56 }
 0xdbe   :  { %v3107_v53 = vmul.f32 %v7642_v34, %v8991_v42  ;;  %v7644_v7 = vpop.eup %7643 }
 0xdc0   :  { %v9037_v40 = vadd.f32 %v3108_v14, %v3107_v53 }
 0xdc2   :  { %7645 = vtanh.f32 %v9037_v40 }
 0xdcc   :  { %v7646_v63 = vpop.eup %7645 }
 0xdcd   :  { %v9040_v43 = vmul.f32 %v7646_v63, %v7644_v7 }
 0xdcf   :  { %3177 = vmatmul.mubr.f32.vlgmr.msra.gmra.mrb[26].mxu0 %v9040_v43  ;;  %3248 = vmatmul.mubr.f32.vlgmr.msra.gmra.mrb[26].mxu1 %v9040_v43 }
 0xdd0   :  { %6505 = vmatpush1.bf16.msra.mxu0 %v8697_v54  ;;  %6537 = vmatpush1.bf16.msra.mxu1 %v8700_v60 }
 0xdd1   :  { %6507 = vmatprep.subr.bf16.mxu0 %v8705_v10  ;;  %6539 = vmatprep.subr.bf16.mxu1 %v8707_v37 }
 0xdd2   :  { %3346 = vmatprep.mubr.f32.mxu0 %v8003_v0  ;;  %3417 = vmatprep.mubr.f32.mxu1 %v8003_v0 }
 0xdd4   :  { %6509 = vmatpush1.bf16.msra.mxu0 %v8709_v23  ;;  %6541 = vmatpush1.bf16.msra.mxu1 %v8712_v36 }
 0xdd5   :  { %6511 = vmatprep.subr.bf16.mxu0 %v8717_v49  ;;  %6543 = vmatprep.subr.bf16.mxu1 %v8719_v5 }
 0xdd8   :  { %6513 = vmatpush1.bf16.msra.mxu0 %v8721_v9  ;;  %6545 = vmatpush1.bf16.msra.mxu1 %v8724_v46 }
 0xdd9   :  { %6515 = vmatprep.subr.bf16.mxu0 %v8729_v6  ;;  %6547 = vmatprep.subr.bf16.mxu1 %v8731_v8 }
 0xddc   :  { %6517 = vmatpush1.bf16.msra.mxu0 %v8733_v59  ;;  %6549 = vmatpush1.bf16.msra.mxu1 %v8736_v21 }
 0xddd   :  { %6519 = vmatprep.subr.bf16.mxu0 %v8741_v39  ;;  %6551 = vmatprep.subr.bf16.mxu1 %v8743_v44 }
 0xde0   :  { %6521 = vmatpush1.bf16.msra.mxu0 %v8745_v61  ;;  %6553 = vmatpush1.bf16.msra.mxu1 %v8748_v47 }
 0xde1   :  { %6523 = vmatprep.subr.bf16.mxu0 %v8752_v4  ;;  %6555 = vmatprep.subr.bf16.mxu1 %v8755_v20 }
 0xde4   :  { %6525 = vmatpush1.bf16.msra.mxu0 %v8757_v27  ;;  %6557 = vmatpush1.bf16.msra.mxu1 %v8760_v45 }
 0xde5   :  { %6527 = vmatprep.subr.bf16.mxu0 %v8763_v13  ;;  %6559 = vmatprep.subr.bf16.mxu1 %v8765_v18 }
 0xde8   :  { %6529 = vmatpush1.bf16.msra.mxu0 %v8768_v2  ;;  %6561 = vmatpush1.bf16.msra.mxu1 %v8772_v29 }
 0xde9   :  { %6531 = vmatprep.subr.bf16.mxu0 %v8777_v15  ;;  %6563 = vmatprep.subr.bf16.mxu1 %v8779_v52 }
 0xdec   :  { %6533 = vmatpush1.bf16.msra.mxu0 %v8781_v38  ;;  %6565 = vmatpush1.bf16.msra.mxu1 %v8784_v57 }
 0xded   :  { %6567 = vmatprep.subr.bf16.mxu0 %v8693_v35  ;;  %6599 = vmatprep.subr.bf16.mxu1 %v8695_v50 }
 0xea2   :  { %v3178_v42 = vpop.f32.mrb[26].mxu0  ;;  %v3249_v3 = vpop.f32.mrb[26].mxu1 }
 0xea3   :  { %v7248_v16 = vadd.f32 %v3178_v42, %v8838_v32  ;;  %v3180_v28 = vpop.f32.mrb[27].mxu0  ;;  %v3251_v26 = vpop.f32.mrb[27].mxu1  ;;  %v7264_v12 = vadd.f32 %v3249_v3, %v8850_v19 }
 0xea4   :  { %v7249_v62 = vadd.f32 %v3180_v28, %v8841_v41  ;;  %v7265_v55 = vadd.f32 %v3251_v26, %v8846_v30 }
 0xea5   :  { %v5485_v31 = vmul.f32 -1.442695, %v7248_v16 }
 0xea6   :  { %v5486_v48 = vmul.f32 -1.442695, %v7249_v62  ;;  %v5487_v56 = vmul.f32 -1.442695, %v7265_v55  ;;  %v3676_v55 = vld [vmem:[#allocation9 + $0x30] sm:$0xff] }
 0xea7   :  { %7647 = vpow2.f32 %v5485_v31 }
 0xea8   :  { %7649 = vpow2.f32 %v5486_v48  ;;  %v3672_v48 = vld [vmem:[#allocation9 + $0x10] sm:$0xff] }
 0xea9   :  { %7651 = vpow2.f32 %v5487_v56  ;;  %v3679_v56 = vld [vmem:[#allocation9 + $0x48] sm:$0xff] }
 0xeaa   :  { %7653 = vtanh.f32 %v7264_v12  ;;  %v3683_v12 = vld [vmem:[#allocation9 + $0x68] sm:$0xff] }
 0xeb1   :  { %v7648_v35 = vpop.eup %7647 }
 0xeb2   :  { %v7650_v34 = vpop.eup %7649  ;;  %v3261_v50 = vadd.f32 1.0, %v7648_v35  ;;  %v3681_v35 = vld [vmem:[#allocation9 + $0x58] sm:$0xff] }
 0xeb3   :  { %v3267_v14 = vadd.f32 1.0, %v7650_v34  ;;  %v7652_v17 = vpop.eup %7651  ;;  %v3685_v34 = vld [vmem:[#allocation9 + $0x78] sm:$0xff] }
 0xeb4   :  { %7655 = vrcp.f32 %v3261_v50  ;;  %v7654_v53 = vpop.eup %7653  ;;  %v3274_v16 = vadd.f32 1.0, %v7652_v17 }
 0xeb5   :  { %7657 = vrcp.f32 %v3267_v14 }
 0xeb6   :  { %7659 = vrcp.f32 %v3274_v16  ;;  %v6634_v16 = vpack.c.bf16 %v3683_v12, %v3679_v56 }
 0xebe   :  { %v7656_v7 = vpop.eup %7655 }
 0xebf   :  { %v7658_v63 = vpop.eup %7657  ;;  %v3278_v42 = vmul.f32 %v7656_v7, %v7654_v53  ;;  %v6664_v53 = vpack.c.bf16 %v3676_v55, %v3672_v48  ;;  %v3678_v7 = vld [vmem:[#allocation9 + $0x40] sm:$0xff] }
 0xec0   :  { %v3277_v28 = vmul.f32 %v7658_v63, %v9037_v40  ;;  %v7660_v3 = vpop.eup %7659  ;;  %v3674_v40 = vld [vmem:[#allocation9 + $0x20] sm:$0xff] }
 0xec1   :  { %v3682_v63 = vld [vmem:[#allocation9 + $0x60] sm:$0xff] }
 0xec2   :  { %v9083_v26 = vadd.f32 %v3278_v42, %v3277_v28  ;;  %v6666_v28 = vpack.c.bf16 %v3685_v34, %v3681_v35  ;;  %v3702_v48 = vld [vmem:[#allocation9 + $0x100] sm:$0xff]  ;;  %v3704_v35 = vld [vmem:[#allocation9 + $0x110] sm:$0xff] }
 0xec3   :  { %v3706_v55 = vld [vmem:[#allocation9 + $0x120] sm:$0xff]  ;;  %v3708_v34 = vld [vmem:[#allocation9 + $0x130] sm:$0xff] }
 0xec4   :  { %7661 = vtanh.f32 %v9083_v26 }
 0xece   :  { %v7662_v62 = vpop.eup %7661 }
 0xecf   :  { %v9086_v31 = vmul.f32 %v7662_v62, %v7660_v3  ;;  %v3684_v3 = vld [vmem:[#allocation9 + $0x70] sm:$0xff]  ;;  %v3687_v62 = vld [vmem:[#allocation9 + $0x88] sm:$0xff] }
 0xed1   :  { %3347 = vmatmul.mubr.f32.vlgmr.msra.gmra.mrb[28].mxu0 %v9086_v31  ;;  %3418 = vmatmul.mubr.f32.vlgmr.msra.gmra.mrb[28].mxu1 %v9086_v31 }
 0xed2   :  { %6569 = vmatpush1.bf16.msra.mxu0 %v8697_v54  ;;  %6601 = vmatpush1.bf16.msra.mxu1 %v8700_v60  ;;  %v3671_v54 = vld [vmem:[#allocation9 + $0x8] sm:$0xff] }
 0xed3   :  { %6571 = vmatprep.subr.bf16.mxu0 %v8705_v10  ;;  %6603 = vmatprep.subr.bf16.mxu1 %v8707_v37  ;;  %v3675_v60 = vld [vmem:[#allocation9 + $0x28] sm:$0xff]  ;;  %v3673_v10 = vld [vmem:[#allocation9 + $0x18] sm:$0xff] }
 0xed4   :  { %3516 = vmatprep.mubr.f32.mxu0 %v8003_v0  ;;  %3587 = vmatprep.mubr.f32.mxu1 %v8003_v0  ;;  %v6630_v37 = vpack.c.bf16 %v3675_v60, %v3671_v54  ;;  %v3691_v54 = vld [vmem:[#allocation9 + $0xa8] sm:$0xff]  ;;  %v3689_v60 = vld [vmem:[#allocation9 + $0x98] sm:$0xff] }
 0xed6   :  { %6573 = vmatpush1.bf16.msra.mxu0 %v8709_v23  ;;  %6605 = vmatpush1.bf16.msra.mxu1 %v8712_v36  ;;  %v3677_v23 = vld [vmem:[#allocation9 + $0x38] sm:$0xff] }
 0xed7   :  { %6575 = vmatprep.subr.bf16.mxu0 %v8717_v49  ;;  %6607 = vmatprep.subr.bf16.mxu1 %v8719_v5  ;;  %v6662_v36 = vpack.c.bf16 %v3677_v23, %v3673_v10  ;;  %v3693_v10 = vld [vmem:[#allocation9 + $0xb8] sm:$0xff]  ;;  %v6636_v23 = vpack.c.bf16 %v3682_v63, %v3678_v7  ;;  %v5497_v7 = vmul.f32 -1.442695, %v8994_v1  ;;  %v6680_v63 = vpack.c.bf16 %v3708_v34, %v3704_v35 }
 0xed8   :  { %v5498_v1 = vmul.f32 -1.442695, %v9040_v43  ;;  %v5499_v43 = vmul.f32 -1.442695, %v9086_v31 }
 0xeda   :  { %6577 = vmatpush1.bf16.msra.mxu0 %v8721_v9  ;;  %6609 = vmatpush1.bf16.msra.mxu1 %v8724_v46 }
 0xedb   :  { %6579 = vmatprep.subr.bf16.mxu0 %v8729_v6  ;;  %6611 = vmatprep.subr.bf16.mxu1 %v8731_v8 }
 0xede   :  { %6581 = vmatpush1.bf16.msra.mxu0 %v8733_v59  ;;  %6613 = vmatpush1.bf16.msra.mxu1 %v8736_v21 }
 0xedf   :  { %6583 = vmatprep.subr.bf16.mxu0 %v8741_v39  ;;  %6615 = vmatprep.subr.bf16.mxu1 %v8743_v44 }
 0xee2   :  { %6585 = vmatpush1.bf16.msra.mxu0 %v8745_v61  ;;  %6617 = vmatpush1.bf16.msra.mxu1 %v8748_v47 }
 0xee3   :  { %6587 = vmatprep.subr.bf16.mxu0 %v8752_v4  ;;  %6619 = vmatprep.subr.bf16.mxu1 %v8755_v20 }
 0xee6   :  { %6589 = vmatpush1.bf16.msra.mxu0 %v8757_v27  ;;  %6621 = vmatpush1.bf16.msra.mxu1 %v8760_v45 }
 0xee7   :  { %6591 = vmatprep.subr.bf16.mxu0 %v8763_v13  ;;  %6623 = vmatprep.subr.bf16.mxu1 %v8765_v18 }
 0xeea   :  { %6593 = vmatpush1.bf16.msra.mxu0 %v8768_v2  ;;  %6625 = vmatpush1.bf16.msra.mxu1 %v8772_v29 }
 0xeeb   :  { %6595 = vmatprep.subr.bf16.mxu0 %v8777_v15  ;;  %6627 = vmatprep.subr.bf16.mxu1 %v8779_v52 }
 0xeee   :  { %6597 = vmatpush1.bf16.msra.mxu0 %v8781_v38  ;;  %6629 = vmatpush1.bf16.msra.mxu1 %v8784_v57  ;;  %v3670_v57 = vld [vmem:[#allocation9] sm:$0xff] }
 0xeef   :  { %6631 = vmatprep.subr.bf16.mxu0 %v6630_v37  ;;  %6663 = vmatprep.subr.bf16.mxu1 %v6662_v36  ;;  %v6632_v17 = vpack.c.bf16 %v3674_v40, %v3670_v57  ;;  %v5494_v37 = vmul.f32 -1.442695, %v8856_v58  ;;  %v3701_v58 = vld [vmem:[#allocation9 + $0xf8] sm:$0xff]  ;;  %v5496_v57 = vmul.f32 -1.442695, %v8948_v24  ;;  %v6648_v24 = vpack.c.bf16 %v3706_v55, %v3702_v48 }
 0xfa4   :  { %v3348_v49 = vpop.f32.mrb[28].mxu0  ;;  %v3419_v5 = vpop.f32.mrb[28].mxu1 }
 0xfa5   :  { %v7250_v9 = vadd.f32 %v3348_v49, %v8838_v32  ;;  %v3350_v46 = vpop.f32.mrb[29].mxu0  ;;  %v3421_v6 = vpop.f32.mrb[29].mxu1  ;;  %v7266_v61 = vadd.f32 %v3419_v5, %v8850_v19  ;;  %v3686_v49 = vld [vmem:[#allocation9 + $0x80] sm:$0xff] }
 0xfa6   :  { %v7251_v8 = vadd.f32 %v3350_v46, %v8841_v41  ;;  %v7267_v39 = vadd.f32 %v3421_v6, %v8846_v30  ;;  %v3690_v5 = vld [vmem:[#allocation9 + $0xa0] sm:$0xff]  ;;  %v6670_v46 = vpack.c.bf16 %v3693_v10, %v3689_v60  ;;  %v3688_v6 = vld [vmem:[#allocation9 + $0x90] sm:$0xff]  ;;  %v3719_v10 = vld [vmem:[#allocation9 + $0x188] sm:$0xff] }
 0xfa7   :  { %v5488_v59 = vmul.f32 -1.442695, %v7250_v9  ;;  %v6638_v9 = vpack.c.bf16 %v3691_v54, %v3687_v62  ;;  %v3712_v54 = vld [vmem:[#allocation9 + $0x150] sm:$0xff] }
 0xfa8   :  { %v5489_v21 = vmul.f32 -1.442695, %v7251_v8  ;;  %v5490_v44 = vmul.f32 -1.442695, %v7267_v39  ;;  %v3692_v8 = vld [vmem:[#allocation9 + $0xb0] sm:$0xff]  ;;  %v3697_v39 = vld [vmem:[#allocation9 + $0xd8] sm:$0xff] }
 0xfa9   :  { %7663 = vpow2.f32 %v5488_v59  ;;  %v3695_v59 = vld [vmem:[#allocation9 + $0xc8] sm:$0xff]  ;;  %v3716_v60 = vld [vmem:[#allocation9 + $0x170] sm:$0xff] }
 0xfaa   :  { %7665 = vpow2.f32 %v5489_v21  ;;  %v3699_v21 = vld [vmem:[#allocation9 + $0xe8] sm:$0xff] }
 0xfab   :  { %7667 = vpow2.f32 %v5490_v44  ;;  %v5495_v44 = vmul.f32 -1.442695, %v8902_v11 }
 0xfac   :  { %7669 = vtanh.f32 %v7266_v61  ;;  %v6640_v61 = vpack.c.bf16 %v3690_v5, %v3686_v49 }
 0xfb3   :  { %v7664_v47 = vpop.eup %7663 }
 0xfb4   :  { %v7666_v4 = vpop.eup %7665  ;;  %v3431_v20 = vadd.f32 1.0, %v7664_v47  ;;  %v6672_v47 = vpack.c.bf16 %v3692_v8, %v3688_v6  ;;  %v3722_v6 = vld [vmem:[#allocation9 + $0x1a0] sm:$0xff] }
 0xfb5   :  { %v3437_v27 = vadd.f32 1.0, %v7666_v4  ;;  %v7668_v45 = vpop.eup %7667  ;;  %v3694_v4 = vld [vmem:[#allocation9 + $0xc0] sm:$0xff] }
 0xfb6   :  { %7671 = vrcp.f32 %v3431_v20  ;;  %v7670_v13 = vpop.eup %7669  ;;  %v3444_v15 = vadd.f32 1.0, %v7668_v45  ;;  %v3698_v20 = vld [vmem:[#allocation9 + $0xe0] sm:$0xff]  ;;  %v6674_v45 = vpack.c.bf16 %v3701_v58, %v3697_v39  ;;  %v3720_v39 = vld [vmem:[#allocation9 + $0x190] sm:$0xff] }
 0xfb7   :  { %7673 = vrcp.f32 %v3437_v27  ;;  %v6642_v27 = vpack.c.bf16 %v3699_v21, %v3695_v59  ;;  %v6644_v11 = vpack.c.bf16 %v3698_v20, %v3694_v4  ;;  %v3724_v58 = vld [vmem:[#allocation9 + $0x1b0] sm:$0xff]  ;;  %v3733_v4 = vld [vmem:[#allocation9 + $0x1f8] sm:$0xff] }
 0xfb8   :  { %7675 = vrcp.f32 %v3444_v15  ;;  %v3705_v15 = vld [vmem:[#allocation9 + $0x118] sm:$0xff] }
 0xfc0   :  { %v7672_v18 = vpop.eup %7671 }
 0xfc1   :  { %v7674_v2 = vpop.eup %7673  ;;  %v3448_v29 = vmul.f32 %v7672_v18, %v7670_v13  ;;  %v3696_v13 = vld [vmem:[#allocation9 + $0xd0] sm:$0xff] }
 0xfc2   :  { %v3447_v52 = vmul.f32 %v7674_v2, %v9083_v26  ;;  %v7676_v50 = vpop.eup %7675  ;;  %v3680_v26 = vld [vmem:[#allocation9 + $0x50] sm:$0xff]  ;;  %v3703_v2 = vld [vmem:[#allocation9 + $0x108] sm:$0xff] }
 0xfc3   :  { %v6668_v36 = vpack.c.bf16 %v3684_v3, %v3680_v26  ;;  %v3700_v18 = vld [vmem:[#allocation9 + $0xf0] sm:$0xff] }
 0xfc4   :  { %v9127_v38 = vadd.f32 %v3448_v29, %v3447_v52  ;;  %v3707_v29 = vld [vmem:[#allocation9 + $0x128] sm:$0xff]  ;;  %v3709_v52 = vld [vmem:[#allocation9 + $0x138] sm:$0xff]  ;;  %v6676_v40 = vpack.c.bf16 %v3700_v18, %v3696_v13  ;;  %v3726_v13 = vld [vmem:[#allocation9 + $0x1c0] sm:$0xff] }
 0xfc5   :  { %v6646_v56 = vpack.c.bf16 %v3707_v29, %v3703_v2  ;;  %v6678_v12 = vpack.c.bf16 %v3709_v52, %v3705_v15  ;;  %v3730_v15 = vld [vmem:[#allocation9 + $0x1e0] sm:$0xff]  ;;  %v3728_v52 = vld [vmem:[#allocation9 + $0x1d0] sm:$0xff] }
 0xfc6   :  { %7677 = vtanh.f32 %v9127_v38 }
 0xfc7   :  { %7679 = vpow2.f32 %v5494_v37  ;;  %v3723_v37 = vld [vmem:[#allocation9 + $0x1a8] sm:$0xff] }
 0xfc8   :  { %7681 = vpow2.f32 %v5495_v44  ;;  %v6654_v59 = vpack.c.bf16 %v3723_v37, %v3719_v10  ;;  %v3727_v44 = vld [vmem:[#allocation9 + $0x1c8] sm:$0xff]  ;;  %v3734_v10 = vld [vmem:[#allocation10] sm:$0xff] }
 0xfc9   :  { %7683 = vpow2.f32 %v5496_v57  ;;  %v3732_v57 = vld [vmem:[#allocation9 + $0x1f0] sm:$0xff]  ;;  %v3738_v37 = vld [vmem:[#allocation10 + $0x20] sm:$0xff] }
 0xfca   :  { %7685 = vpow2.f32 %v5497_v7  ;;  %v6692_v48 = vpack.c.bf16 %v3732_v57, %v3728_v52  ;;  %v3752_v52 = vld [vmem:[#allocation10 + $0x90] sm:$0xff] }
 0xfcb   :  { %7687 = vpow2.f32 %v5498_v1  ;;  %v3736_v1 = vld [vmem:[#allocation10 + $0x10] sm:$0xff] }
 0xfcc   :  { %v3756_v57 = vld [vmem:[#allocation10 + $0xb0] sm:$0xff] }
 0xfd0   :  { %v7678_v14 = vpop.eup %7677 }
 0xfd1   :  { %v9130_v42 = vmul.f32 %v7678_v14, %v7676_v50  ;;  %v3711_v50 = vld [vmem:[#allocation9 + $0x148] sm:$0xff]  ;;  %v7680_v26 = vpop.eup %7679 }
 0xfd2   :  { %v3715_v14 = vld [vmem:[#allocation9 + $0x168] sm:$0xff]  ;;  %v3646_v49 = vadd.f32 1.0, %v7680_v26  ;;  %v7682_v8 = vpop.eup %7681 }
 0xfd3   :  { %3517 = vmatmul.mubr.f32.vlgmr.msra.gmra.mrb[30].mxu0 %v9130_v42  ;;  %3588 = vmatmul.mubr.f32.vlgmr.msra.gmra.mrb[30].mxu1 %v9130_v42  ;;  %v6650_v3 = vpack.c.bf16 %v3715_v14, %v3711_v50  ;;  %v3647_v20 = vadd.f32 1.0, %v7682_v8  ;;  %v7684_v18 = vpop.eup %7683  ;;  %v3735_v26 = vld [vmem:[#allocation10 + $0x8] sm:$0xff] }
 0xfd4   :  { %6633 = vmatpush1.bf16.msra.mxu0 %v6632_v17  ;;  %6665 = vmatpush1.bf16.msra.mxu1 %v6664_v53  ;;  %v3713_v17 = vld [vmem:[#allocation9 + $0x158] sm:$0xff]  ;;  %7689 = vrcp.f32 %v3646_v49  ;;  %v3648_v31 = vadd.f32 1.0, %v7684_v18  ;;  %v7686_v55 = vpop.eup %7685  ;;  %v3740_v49 = vld [vmem:[#allocation10 + $0x30] sm:$0xff]  ;;  %v3750_v18 = vld [vmem:[#allocation10 + $0x80] sm:$0xff] }
 0xfd5   :  { %6635 = vmatprep.subr.bf16.mxu0 %v6634_v16  ;;  %6667 = vmatprep.subr.bf16.mxu1 %v6666_v28  ;;  %v3717_v53 = vld [vmem:[#allocation9 + $0x178] sm:$0xff]  ;;  %v3710_v16 = vld [vmem:[#allocation9 + $0x140] sm:$0xff]  ;;  %7691 = vpow2.f32 %v5499_v43  ;;  %v3751_v43 = vld [vmem:[#allocation10 + $0x88] sm:$0xff] }
 0xfd6   :  { %3884 = vmatprep.mubr.f32.mxu0 %v8003_v0  ;;  %3997 = vmatprep.mubr.f32.mxu1 %v8003_v0  ;;  %v3714_v28 = vld [vmem:[#allocation9 + $0x160] sm:$0xff]  ;;  %v6682_v62 = vpack.c.bf16 %v3717_v53, %v3713_v17  ;;  %7693 = vrcp.f32 %v3647_v20  ;;  %v3755_v20 = vld [vmem:[#allocation10 + $0xa8] sm:$0xff] }
 0xfd7   :  { %v6652_v5 = vpack.c.bf16 %v3714_v28, %v3710_v16 }
 0xfd8   :  { %6637 = vmatpush1.bf16.msra.mxu0 %v6636_v23  ;;  %6669 = vmatpush1.bf16.msra.mxu1 %v6668_v36  ;;  %v3721_v23 = vld [vmem:[#allocation9 + $0x198] sm:$0xff] }
 0xfd9   :  { %6639 = vmatprep.subr.bf16.mxu0 %v6638_v9  ;;  %6671 = vmatprep.subr.bf16.mxu1 %v6670_v46  ;;  %v3725_v36 = vld [vmem:[#allocation9 + $0x1b8] sm:$0xff]  ;;  %v6684_v9 = vpack.c.bf16 %v3716_v60, %v3712_v54  ;;  %v3718_v46 = vld [vmem:[#allocation9 + $0x180] sm:$0xff] }
 0xfda   :  { %v6686_v21 = vpack.c.bf16 %v3725_v36, %v3721_v23  ;;  %v3741_v60 = vld [vmem:[#allocation10 + $0x38] sm:$0xff]  ;;  %v9161_v36 = vpack.c.bf16 %v3738_v37, %v3734_v10  ;;  %v3772_v10 = vld [vmem:[#allocation10 + $0x130] sm:$0xff] }
 0xfdc   :  { %6641 = vmatpush1.bf16.msra.mxu0 %v6640_v61  ;;  %6673 = vmatpush1.bf16.msra.mxu1 %v6672_v47  ;;  %v3731_v61 = vld [vmem:[#allocation9 + $0x1e8] sm:$0xff]  ;;  %v3729_v47 = vld [vmem:[#allocation9 + $0x1d8] sm:$0xff] }
 0xfdd   :  { %6643 = vmatprep.subr.bf16.mxu0 %v6642_v27  ;;  %6675 = vmatprep.subr.bf16.mxu1 %v6674_v45  ;;  %v6656_v27 = vpack.c.bf16 %v3722_v6, %v3718_v46  ;;  %v6688_v45 = vpack.c.bf16 %v3724_v58, %v3720_v39  ;;  %v6658_v2 = vpack.c.bf16 %v3731_v61, %v3727_v44  ;;  %v3747_v46 = vld [vmem:[#allocation10 + $0x68] sm:$0xff]  ;;  %v3745_v6 = vld [vmem:[#allocation10 + $0x58] sm:$0xff]  ;;  %v3746_v39 = vld [vmem:[#allocation10 + $0x60] sm:$0xff] }
 0xfde   :  { %v6690_v29 = vpack.c.bf16 %v3733_v4, %v3729_v47  ;;  %v3744_v61 = vld [vmem:[#allocation10 + $0x50] sm:$0xff] }
 0xfdf   :  { %v3748_v47 = vld [vmem:[#allocation10 + $0x70] sm:$0xff] }
 0xfe0   :  { %6645 = vmatpush1.bf16.msra.mxu0 %v6644_v11  ;;  %6677 = vmatpush1.bf16.msra.mxu1 %v6676_v40  ;;  %v5500_v11 = vmul.f32 -1.442695, %v9130_v42  ;;  %v6660_v40 = vpack.c.bf16 %v3730_v15, %v3726_v13  ;;  %v9176_v4 = vpack.c.bf16 %v3748_v47, %v3744_v61  ;;  %v3757_v13 = vld [vmem:[#allocation10 + $0xb8] sm:$0xff]  ;;  %v3776_v47 = vld [vmem:[#allocation10 + $0x150] sm:$0xff] }
 0xfe1   :  { %6647 = vmatprep.subr.bf16.mxu0 %v6646_v56  ;;  %6679 = vmatprep.subr.bf16.mxu1 %v6678_v12  ;;  %v3649_v56 = vadd.f32 1.0, %v7686_v55  ;;  %v7688_v12 = vpop.eup %7687 }
 0xfe2   :  { %7695 = vpow2.f32 %v5500_v11  ;;  %v7690_v35 = vpop.eup %7689  ;;  %v3650_v42 = vadd.f32 1.0, %v7688_v12  ;;  %v9188_v11 = vpack.c.bf16 %v3756_v57, %v3752_v52  ;;  %v3758_v12 = vld [vmem:[#allocation10 + $0xc0] sm:$0xff] }
 0xfe3   :  { %7697 = vrcp.f32 %v3648_v31  ;;  %v7692_v34 = vpop.eup %7691  ;;  %v3759_v31 = vld [vmem:[#allocation10 + $0xc8] sm:$0xff] }
 0xfe4   :  { %6649 = vmatpush1.bf16.msra.mxu0 %v6648_v24  ;;  %6681 = vmatpush1.bf16.msra.mxu1 %v6680_v63  ;;  %7699 = vrcp.f32 %v3649_v56  ;;  %v7694_v50 = vpop.eup %7693  ;;  %v3651_v14 = vadd.f32 1.0, %v7692_v34  ;;  %v3765_v56 = vld [vmem:[#allocation10 + $0xf8] sm:$0xff] }
 0xfe5   :  { %6651 = vmatprep.subr.bf16.mxu0 %v6650_v3  ;;  %6683 = vmatprep.subr.bf16.mxu1 %v6682_v62  ;;  %7701 = vrcp.f32 %v3650_v42  ;;  %v3739_v3 = vld [vmem:[#allocation10 + $0x28] sm:$0xff]  ;;  %v3737_v62 = vld [vmem:[#allocation10 + $0x18] sm:$0xff] }
 0xfe6   :  { %7703 = vrcp.f32 %v3651_v14  ;;  %v9157_v54 = vpack.c.bf16 %v3739_v3, %v3735_v26  ;;  %v9159_v23 = vpack.c.bf16 %v3741_v60, %v3737_v62  ;;  %v3764_v14 = vld [vmem:[#allocation10 + $0xf0] sm:$0xff]  ;;  %v3770_v26 = vld [vmem:[#allocation10 + $0x120] sm:$0xff] }
 0xfe7   :  { %v3768_v60 = vld [vmem:[#allocation10 + $0x110] sm:$0xff] }
 0xfe8   :  { %6653 = vmatpush1.bf16.msra.mxu0 %v6652_v5  ;;  %6685 = vmatpush1.bf16.msra.mxu1 %v6684_v9  ;;  %v9164_v5 = vpack.c.bf16 %v3740_v49, %v3736_v1  ;;  %v3743_v9 = vld [vmem:[#allocation10 + $0x48] sm:$0xff]  ;;  %v9212_v37 = vpack.c.bf16 %v3772_v10, %v3768_v60  ;;  %v3792_v10 = vld [vmem:[#allocation10 + $0x1d0] sm:$0xff] }
 0xfe9   :  { %6655 = vmatprep.subr.bf16.mxu0 %v6654_v59  ;;  %6687 = vmatprep.subr.bf16.mxu1 %v6686_v21  ;;  %v9169_v8 = vpack.c.bf16 %v3747_v46, %v3743_v9  ;;  %v3749_v59 = vld [vmem:[#allocation10 + $0x78] sm:$0xff]  ;;  %v3742_v21 = vld [vmem:[#allocation10 + $0x40] sm:$0xff]  ;;  %v3775_v1 = vld [vmem:[#allocation10 + $0x148] sm:$0xff] }
 0xfea   :  { %v9171_v58 = vpack.c.bf16 %v3749_v59, %v3745_v6  ;;  %v9173_v44 = vpack.c.bf16 %v3746_v39, %v3742_v21  ;;  %v3779_v49 = vld [vmem:[#allocation10 + $0x168] sm:$0xff]  ;;  %v3777_v9 = vld [vmem:[#allocation10 + $0x158] sm:$0xff]  ;;  %v3774_v59 = vld [vmem:[#allocation10 + $0x140] sm:$0xff] }
 0xfeb   :  { %v9216_v46 = vpack.c.bf16 %v3779_v49, %v3775_v1  ;;  %v3781_v6 = vld [vmem:[#allocation10 + $0x178] sm:$0xff]  ;;  %v3778_v21 = vld [vmem:[#allocation10 + $0x160] sm:$0xff]  ;;  %v3796_v1 = vld [vmem:[#allocation10 + $0x1f0] sm:$0xff] }
 0xfec   :  { %6657 = vmatpush1.bf16.msra.mxu0 %v6656_v27  ;;  %6689 = vmatpush1.bf16.msra.mxu1 %v6688_v45  ;;  %v7696_v17 = vpop.eup %7695  ;;  %v3753_v27 = vld [vmem:[#allocation10 + $0x98] sm:$0xff]  ;;  %v9181_v45 = vpack.c.bf16 %v3755_v20, %v3751_v43  ;;  %v9219_v39 = vpack.c.bf16 %v3781_v6, %v3777_v9  ;;  %v9221_v61 = vpack.c.bf16 %v3778_v21, %v3774_v59  ;;  %v3780_v43 = vld [vmem:[#allocation10 + $0x170] sm:$0xff]  ;;  %v3783_v20 = vld [vmem:[#allocation10 + $0x188] sm:$0xff] }
 0xfed   :  { %6659 = vmatprep.subr.bf16.mxu0 %v6658_v2  ;;  %6691 = vmatprep.subr.bf16.mxu1 %v6690_v29  ;;  %v7698_v53 = vpop.eup %7697  ;;  %v3652_v7 = vadd.f32 1.0, %v7696_v17  ;;  %v3754_v2 = vld [vmem:[#allocation10 + $0xa0] sm:$0xff]  ;;  %v9183_v29 = vpack.c.bf16 %v3757_v13, %v3753_v27  ;;  %v9224_v27 = vpack.c.bf16 %v3780_v43, %v3776_v47  ;;  %v3787_v13 = vld [vmem:[#allocation10 + $0x1a8] sm:$0xff]  ;;  %v9248_v49 = vpack.c.bf16 %v3796_v1, %v3792_v10 }
 0xfee   :  { %v7700_v24 = vpop.eup %7699  ;;  %v9185_v15 = vpack.c.bf16 %v3754_v2, %v3750_v18  ;;  %v3785_v18 = vld [vmem:[#allocation10 + $0x198] sm:$0xff]  ;;  %v9227_v52 = vpack.c.bf16 %v3787_v13, %v3783_v20 }
 0xfef   :  { %7705 = vrcp.f32 %v3652_v7  ;;  %v7702_v63 = vpop.eup %7701  ;;  %v3771_v7 = vld [vmem:[#allocation10 + $0x128] sm:$0xff]  ;;  %v3789_v2 = vld [vmem:[#allocation10 + $0x1b8] sm:$0xff] }
 0xff0   :  { %6661 = vmatpush1.bf16.msra.mxu0 %v6660_v40  ;;  %6693 = vmatpush1.bf16.msra.mxu1 %v6692_v48  ;;  %v7704_v16 = vpop.eup %7703  ;;  %v3763_v40 = vld [vmem:[#allocation10 + $0xe8] sm:$0xff]  ;;  %v3761_v48 = vld [vmem:[#allocation10 + $0xd8] sm:$0xff]  ;;  %v9229_v57 = vpack.c.bf16 %v3789_v2, %v3785_v18 }
 0xff1   :  { %6695 = vmatprep.subr.bf16.mxu0 %v9157_v54  ;;  %6727 = vmatprep.subr.bf16.mxu1 %v9159_v23  ;;  %v9193_v55 = vpack.c.bf16 %v3763_v40, %v3759_v31  ;;  %v9195_v42 = vpack.c.bf16 %v3765_v56, %v3761_v48  ;;  %v3782_v31 = vld [vmem:[#allocation10 + $0x180] sm:$0xff]  ;;  %v3784_v48 = vld [vmem:[#allocation10 + $0x190] sm:$0xff] }
 0xff2   :  { %v3786_v40 = vld [vmem:[#allocation10 + $0x1a0] sm:$0xff] }
 0xff3   :  { %3885 = vmatmul.mubr.f32.vlgmr.msra.gmra.mrb[32].mxu0 %v7690_v35  ;;  %3998 = vmatmul.mubr.f32.vlgmr.msra.gmra.mrb[32].mxu1 %v7690_v35  ;;  %v3762_v35 = vld [vmem:[#allocation10 + $0xe0] sm:$0xff]  ;;  %v9232_v56 = vpack.c.bf16 %v3786_v40, %v3782_v31 }
 0xff4   :  { %3890 = vmatprep.mubr.f32.mxu0 %v8003_v0  ;;  %4003 = vmatprep.mubr.f32.mxu1 %v8003_v0  ;;  %v9197_v34 = vpack.c.bf16 %v3762_v35, %v3758_v12  ;;  %v3788_v12 = vld [vmem:[#allocation10 + $0x1b0] sm:$0xff] }
 0xff5   :  { %6697 = vmatpush1.bf16.msra.mxu0 %v9161_v36  ;;  %6729 = vmatpush1.bf16.msra.mxu1 %v9164_v5  ;;  %v9236_v35 = vpack.c.bf16 %v3788_v12, %v3784_v48 }
 0xff6   :  { %6699 = vmatprep.subr.bf16.mxu0 %v9169_v8  ;;  %6731 = vmatprep.subr.bf16.mxu1 %v9171_v58 }
 0xff7   :  { %3891 = vmatmul.mubr.f32.gmra.mrb[34].mxu0 %v7694_v50  ;;  %4004 = vmatmul.mubr.f32.gmra.mrb[34].mxu1 %v7694_v50  ;;  %v3760_v50 = vld [vmem:[#allocation10 + $0xd0] sm:$0xff] }
 0xff8   :  { %3896 = vmatprep.mubr.f32.mxu0 %v8003_v0  ;;  %4009 = vmatprep.mubr.f32.mxu1 %v8003_v0  ;;  %v9200_v17 = vpack.c.bf16 %v3764_v14, %v3760_v50  ;;  %v3791_v50 = vld [vmem:[#allocation10 + $0x1c8] sm:$0xff] }
 0xff9   :  { %v7706_v28 = vpop.eup %7705  ;;  %6701 = vmatpush1.bf16.msra.mxu0 %v9173_v44  ;;  %6733 = vmatpush1.bf16.msra.mxu1 %v9176_v4  ;;  %v3795_v14 = vld [vmem:[#allocation10 + $0x1e8] sm:$0xff] }
 0xffa   :  { %6703 = vmatprep.subr.bf16.mxu0 %v9181_v45  ;;  %6735 = vmatprep.subr.bf16.mxu1 %v9183_v29 }
 0xffb   :  { %3897 = vmatmul.mubr.f32.gmra.mrb[36].mxu0 %v7698_v53  ;;  %4010 = vmatmul.mubr.f32.gmra.mrb[36].mxu1 %v7698_v53  ;;  %v3767_v53 = vld [vmem:[#allocation10 + $0x108] sm:$0xff] }
 0xffc   :  { %3902 = vmatprep.mubr.f32.mxu0 %v8003_v0  ;;  %4015 = vmatprep.mubr.f32.mxu1 %v8003_v0 }
 0xffd   :  { %6705 = vmatpush1.bf16.msra.mxu0 %v9185_v15  ;;  %6737 = vmatpush1.bf16.msra.mxu1 %v9188_v11 }
 0xffe   :  { %6707 = vmatprep.subr.bf16.mxu0 %v9193_v55  ;;  %6739 = vmatprep.subr.bf16.mxu1 %v9195_v42 }
 0xfff   :  { %3903 = vmatmul.mubr.f32.gmra.mrb[38].mxu0 %v7700_v24  ;;  %4016 = vmatmul.mubr.f32.gmra.mrb[38].mxu1 %v7700_v24  ;;  %v3769_v24 = vld [vmem:[#allocation10 + $0x118] sm:$0xff] }
0x1000   :  { %3908 = vmatprep.mubr.f32.mxu0 %v8003_v0  ;;  %4021 = vmatprep.mubr.f32.mxu1 %v8003_v0 }
0x1001   :  { %6709 = vmatpush1.bf16.msra.mxu0 %v9197_v34  ;;  %6741 = vmatpush1.bf16.msra.mxu1 %v9200_v17 }
0x1003   :  { %3909 = vmatmul.mubr.f32.gmra.mrb[40].mxu0 %v7702_v63  ;;  %4022 = vmatmul.mubr.f32.gmra.mrb[40].mxu1 %v7702_v63  ;;  %v9205_v63 = vpack.c.bf16 %v3771_v7, %v3767_v53  ;;  %v3793_v53 = vld [vmem:[#allocation10 + $0x1d8] sm:$0xff]  ;;  %v9241_v7 = vpack.c.bf16 %v3795_v14, %v3791_v50 }
0x1004   :  { %3914 = vmatprep.mubr.f32.mxu0 %v8003_v0  ;;  %4027 = vmatprep.mubr.f32.mxu1 %v8003_v0 }
0x1005   :  { %6711 = vmatprep.subr.bf16.mxu0 %v9205_v63 }
0x1007   :  { %3915 = vmatmul.mubr.f32.gmra.mrb[42].mxu0 %v7704_v16  ;;  %4028 = vmatmul.mubr.f32.gmra.mrb[42].mxu1 %v7704_v16  ;;  %v3773_v16 = vld [vmem:[#allocation10 + $0x138] sm:$0xff] }
0x1008   :  { %3920 = vmatprep.mubr.f32.mxu0 %v8003_v0  ;;  %4033 = vmatprep.mubr.f32.mxu1 %v8003_v0  ;;  %v9207_v3 = vpack.c.bf16 %v3773_v16, %v3769_v24  ;;  %v3797_v24 = vld [vmem:[#allocation10 + $0x1f8] sm:$0xff]  ;;  %v3790_v16 = vld [vmem:[#allocation10 + $0x1c0] sm:$0xff] }
0x100a   :  { %6743 = vmatprep.subr.bf16.mxu1 %v9207_v3 }
0x100b   :  { %3921 = vmatmul.mubr.f32.gmra.mrb[44].mxu0 %v7706_v28  ;;  %4034 = vmatmul.mubr.f32.gmra.mrb[44].mxu1 %v7706_v28  ;;  %v3766_v28 = vld [vmem:[#allocation10 + $0x100] sm:$0xff] }
0x100c   :  { %3926 = vmatprep.mubr.f32.mxu0 %v8003_v0  ;;  %4039 = vmatprep.mubr.f32.mxu1 %v8003_v0  ;;  %v9209_v62 = vpack.c.bf16 %v3770_v26, %v3766_v28  ;;  %v3794_v28 = vld [vmem:[#allocation10 + $0x1e0] sm:$0xff]  ;;  %v9243_v26 = vpack.c.bf16 %v3797_v24, %v3793_v53 }
0x100d   :  { %6745 = vmatpush1.bf16.msra.mxu1 %v9212_v37  ;;  %v9245_v60 = vpack.c.bf16 %v3794_v28, %v3790_v16 }
0x100e   :  { %6713 = vmatpush1.bf16.msra.mxu0 %v9209_v62  ;;  %6747 = vmatprep.subr.bf16.mxu1 %v9219_v39 }
0x100f   :  { %6715 = vmatprep.subr.bf16.mxu0 %v9216_v46 }
0x1011   :  { %6749 = vmatpush1.bf16.msra.mxu1 %v9224_v27 }
0x1012   :  { %6717 = vmatpush1.bf16.msra.mxu0 %v9221_v61  ;;  %6751 = vmatprep.subr.bf16.mxu1 %v9229_v57 }
0x1013   :  { %6719 = vmatprep.subr.bf16.mxu0 %v9227_v52 }
0x1015   :  { %6753 = vmatpush1.bf16.msra.mxu1 %v9236_v35 }
0x1016   :  { %6721 = vmatpush1.bf16.msra.mxu0 %v9232_v56  ;;  %6755 = vmatprep.subr.bf16.mxu1 %v9243_v26 }
0x1017   :  { %6723 = vmatprep.subr.bf16.mxu0 %v9241_v7 }
0x1019   :  { %6757 = vmatpush1.bf16.msra.mxu1 %v9248_v49 }
0x101a   :  { %6725 = vmatpush1.bf16.msra.mxu0 %v9245_v60  ;;  %6791 = vmatprep.subr.bf16.mxu1 %v9159_v23 }
0x101b   :  { %6759 = vmatprep.subr.bf16.mxu0 %v9157_v54 }
0x10a6   :  { %v3518_v9 = vpop.f32.mrb[30].mxu0  ;;  %v3589_v6 = vpop.f32.mrb[30].mxu1 }
0x10a7   :  { %v7252_v59 = vadd.f32 %v3518_v9, %v8838_v32  ;;  %v3520_v21 = vpop.f32.mrb[31].mxu0  ;;  %v3591_v47 = vpop.f32.mrb[31].mxu1  ;;  %v7268_v31 = vadd.f32 %v3589_v6, %v8850_v19 }
0x10a8   :  { %v7253_v43 = vadd.f32 %v3520_v21, %v8841_v41  ;;  %v7269_v18 = vadd.f32 %v3591_v47, %v8846_v30 }
0x10a9   :  { %v5491_v20 = vmul.f32 -1.442695, %v7252_v59 }
0x10aa   :  { %v5492_v13 = vmul.f32 -1.442695, %v7253_v43  ;;  %v5493_v2 = vmul.f32 -1.442695, %v7269_v18 }
0x10ab   :  { %7707 = vpow2.f32 %v5491_v20 }
0x10ac   :  { %7709 = vpow2.f32 %v5492_v13 }
0x10ad   :  { %7711 = vpow2.f32 %v5493_v2 }
0x10ae   :  { %7713 = vtanh.f32 %v7268_v31 }
0x10b5   :  { %v7708_v40 = vpop.eup %7707 }
0x10b6   :  { %v7710_v48 = vpop.eup %7709  ;;  %v3601_v12 = vadd.f32 1.0, %v7708_v40 }
0x10b7   :  { %v3607_v50 = vadd.f32 1.0, %v7710_v48  ;;  %v7712_v32 = vpop.eup %7711 }
0x10b8   :  { %7715 = vrcp.f32 %v3601_v12  ;;  %v7714_v14 = vpop.eup %7713  ;;  %v3614_v16 = vadd.f32 1.0, %v7712_v32 }
0x10b9   :  { %7717 = vrcp.f32 %v3607_v50 }
0x10ba   :  { %7719 = vrcp.f32 %v3614_v16 }
0x10c2   :  { %v7716_v41 = vpop.eup %7715 }
0x10c3   :  { %v7718_v53 = vpop.eup %7717  ;;  %v3618_v24 = vmul.f32 %v7716_v41, %v7714_v14 }
0x10c4   :  { %v3617_v28 = vmul.f32 %v7718_v53, %v9127_v38  ;;  %v7720_v19 = vpop.eup %7719  ;;  %v3798_v38 = vld [vmem:[%s9604_s9] sm:$0xf] }
0x10c5   :  { %v9302_v47 = vrot.slane %v3798_v38, %v8362_v22  ;;  %v9305_v43 = vrot.slane %v3798_v38, %v8367_v25  ;;  %v9310_v50 = vrot.slane %v3798_v38, %v8375_v33  ;;  %v9314_v25 = vrot.slane %v3798_v38, %v8382_v51 }
0x10c6   :  { %v3619_v30 = vadd.f32 %v3618_v24, %v3617_v28 }
0x10c8   :  { %7721 = vtanh.f32 %v3619_v30 }
0x10d2   :  { %v7722_v10 = vpop.eup %7721 }
0x10d3   :  { %v3621_v1 = vmul.f32 %v7722_v10, %v7720_v19 }
0x10d5   :  { %v5501_v9 = vmul.f32 -1.442695, %v3621_v1 }
0x10d7   :  { %7723 = vpow2.f32 %v5501_v9 }
0x10e1   :  { %v7724_v6 = vpop.eup %7723 }
0x10e2   :  { %v3653_v59 = vadd.f32 1.0, %v7724_v6 }
0x10e4   :  { %7725 = vrcp.f32 %v3653_v59 }
0x10ee   :  { %v7726_v21 = vpop.eup %7725 }
0x10ef   :  { %3927 = vmatmul.mubr.f32.gmra.mrb[46].mxu0 %v7726_v21  ;;  %4040 = vmatmul.mubr.f32.gmra.mrb[46].mxu1 %v7726_v21 }
0x10f0   :  { %4110 = vmatprep.mubr.f32.mxu0 %v8003_v0  ;;  %4181 = vmatprep.mubr.f32.mxu1 %v8003_v0 }
0x10f3   :  { %4111 = vmatmul.mubr.f32.vlgmr.msra.gmra.mrb[32].mxu0 %v8003_v0  ;;  %4182 = vmatmul.mubr.f32.vlgmr.msra.gmra.mrb[32].mxu1 %v8003_v0 }
0x10f4   :  { %6761 = vmatpush1.bf16.msra.mxu0 %v9161_v36  ;;  %6793 = vmatpush1.bf16.msra.mxu1 %v9164_v5 }
0x10f5   :  { %6763 = vmatprep.subr.bf16.mxu0 %v9169_v8  ;;  %6795 = vmatprep.subr.bf16.mxu1 %v9171_v58 }
0x10f6   :  { %4280 = vmatprep.mubr.f32.mxu0 %v8003_v0  ;;  %4351 = vmatprep.mubr.f32.mxu1 %v8003_v0 }
0x10f8   :  { %6765 = vmatpush1.bf16.msra.mxu0 %v9173_v44  ;;  %6797 = vmatpush1.bf16.msra.mxu1 %v9176_v4 }
0x10f9   :  { %6767 = vmatprep.subr.bf16.mxu0 %v9181_v45  ;;  %6799 = vmatprep.subr.bf16.mxu1 %v9183_v29 }
0x10fc   :  { %6769 = vmatpush1.bf16.msra.mxu0 %v9185_v15  ;;  %6801 = vmatpush1.bf16.msra.mxu1 %v9188_v11 }
0x10fd   :  { %6771 = vmatprep.subr.bf16.mxu0 %v9193_v55  ;;  %6803 = vmatprep.subr.bf16.mxu1 %v9195_v42 }
0x1100   :  { %6773 = vmatpush1.bf16.msra.mxu0 %v9197_v34  ;;  %6805 = vmatpush1.bf16.msra.mxu1 %v9200_v17 }
0x1101   :  { %6775 = vmatprep.subr.bf16.mxu0 %v9205_v63  ;;  %6807 = vmatprep.subr.bf16.mxu1 %v9207_v3 }
0x1104   :  { %6777 = vmatpush1.bf16.msra.mxu0 %v9209_v62  ;;  %6809 = vmatpush1.bf16.msra.mxu1 %v9212_v37 }
0x1105   :  { %6779 = vmatprep.subr.bf16.mxu0 %v9216_v46  ;;  %6811 = vmatprep.subr.bf16.mxu1 %v9219_v39 }
0x1108   :  { %6781 = vmatpush1.bf16.msra.mxu0 %v9221_v61  ;;  %6813 = vmatpush1.bf16.msra.mxu1 %v9224_v27 }
0x1109   :  { %6783 = vmatprep.subr.bf16.mxu0 %v9227_v52  ;;  %6815 = vmatprep.subr.bf16.mxu1 %v9229_v57 }
0x110c   :  { %6785 = vmatpush1.bf16.msra.mxu0 %v9232_v56  ;;  %6817 = vmatpush1.bf16.msra.mxu1 %v9236_v35 }
0x110d   :  { %6787 = vmatprep.subr.bf16.mxu0 %v9241_v7  ;;  %6819 = vmatprep.subr.bf16.mxu1 %v9243_v26 }
0x1110   :  { %6789 = vmatpush1.bf16.msra.mxu0 %v9245_v60  ;;  %6821 = vmatpush1.bf16.msra.mxu1 %v9248_v49 }
0x1111   :  { %6823 = vmatprep.subr.bf16.mxu0 %v9157_v54  ;;  %6855 = vmatprep.subr.bf16.mxu1 %v9159_v23 }
0x11c6   :  { %v4112_v20 = vpop.f32.mrb[32].mxu0  ;;  %v4183_v13 = vpop.f32.mrb[32].mxu1 }
0x11c7   :  { %v7270_v18 = vadd.f32 %v4112_v20, %v9302_v47  ;;  %v4114_v2 = vpop.f32.mrb[33].mxu0  ;;  %v4185_v31 = vpop.f32.mrb[33].mxu1  ;;  %v7286_v14 = vadd.f32 %v4183_v13, %v9314_v25 }
0x11c8   :  { %v7271_v40 = vadd.f32 %v4114_v2, %v9305_v43  ;;  %v7287_v22 = vadd.f32 %v4185_v31, %v9310_v50 }
0x11c9   :  { %v5502_v48 = vmul.f32 -1.442695, %v7270_v18 }
0x11ca   :  { %v5503_v12 = vmul.f32 -1.442695, %v7271_v40  ;;  %v5504_v32 = vmul.f32 -1.442695, %v7287_v22 }
0x11cb   :  { %7727 = vpow2.f32 %v5502_v48 }
0x11cc   :  { %7729 = vpow2.f32 %v5503_v12 }
0x11cd   :  { %7731 = vpow2.f32 %v5504_v32 }
0x11ce   :  { %7733 = vtanh.f32 %v7286_v14 }
0x11d5   :  { %v7728_v41 = vpop.eup %7727 }
0x11d6   :  { %v7730_v53 = vpop.eup %7729  ;;  %v4195_v24 = vadd.f32 1.0, %v7728_v41 }
0x11d7   :  { %v4201_v16 = vadd.f32 1.0, %v7730_v53  ;;  %v7732_v33 = vpop.eup %7731 }
0x11d8   :  { %7735 = vrcp.f32 %v4195_v24  ;;  %v7734_v28 = vpop.eup %7733  ;;  %v4208_v1 = vadd.f32 1.0, %v7732_v33 }
0x11d9   :  { %7737 = vrcp.f32 %v4201_v16 }
0x11da   :  { %7739 = vrcp.f32 %v4208_v1 }
0x11e2   :  { %v7736_v30 = vpop.eup %7735 }
0x11e3   :  { %v7738_v19 = vpop.eup %7737  ;;  %v4212_v10 = vmul.f32 %v7736_v30, %v7734_v28 }
0x11e4   :  { %v4211_v9 = vmul.f32 0.0, %v7738_v19  ;;  %v7740_v6 = vpop.eup %7739 }
0x11e6   :  { %v9317_v51 = vadd.f32 %v4212_v10, %v4211_v9 }
0x11e8   :  { %7741 = vtanh.f32 %v9317_v51 }
0x11f2   :  { %v7742_v59 = vpop.eup %7741 }
0x11f3   :  { %v4215_v21 = vmul.f32 %v7742_v59, %v7740_v6 }
0x11f5   :  { %4281 = vmatmul.mubr.f32.vlgmr.msra.gmra.mrb[34].mxu0 %v4215_v21  ;;  %5406 = vst [vmem:[%s9605_s10] sm:$0xff] %v4215_v21  ;;  %4352 = vmatmul.mubr.f32.vlgmr.msra.gmra.mrb[34].mxu1 %v4215_v21 }
0x11f6   :  { %6825 = vmatpush1.bf16.msra.mxu0 %v9161_v36  ;;  %6857 = vmatpush1.bf16.msra.mxu1 %v9164_v5 }
0x11f7   :  { %6827 = vmatprep.subr.bf16.mxu0 %v9169_v8  ;;  %6859 = vmatprep.subr.bf16.mxu1 %v9171_v58 }
0x11f8   :  { %4450 = vmatprep.mubr.f32.mxu0 %v8003_v0  ;;  %4521 = vmatprep.mubr.f32.mxu1 %v8003_v0 }
0x11fa   :  { %6829 = vmatpush1.bf16.msra.mxu0 %v9173_v44  ;;  %6861 = vmatpush1.bf16.msra.mxu1 %v9176_v4 }
0x11fb   :  { %6831 = vmatprep.subr.bf16.mxu0 %v9181_v45  ;;  %6863 = vmatprep.subr.bf16.mxu1 %v9183_v29 }
0x11fe   :  { %6833 = vmatpush1.bf16.msra.mxu0 %v9185_v15  ;;  %6865 = vmatpush1.bf16.msra.mxu1 %v9188_v11 }
0x11ff   :  { %6835 = vmatprep.subr.bf16.mxu0 %v9193_v55  ;;  %6867 = vmatprep.subr.bf16.mxu1 %v9195_v42 }
0x1202   :  { %6837 = vmatpush1.bf16.msra.mxu0 %v9197_v34  ;;  %6869 = vmatpush1.bf16.msra.mxu1 %v9200_v17 }
0x1203   :  { %6839 = vmatprep.subr.bf16.mxu0 %v9205_v63  ;;  %6871 = vmatprep.subr.bf16.mxu1 %v9207_v3 }
0x1206   :  { %6841 = vmatpush1.bf16.msra.mxu0 %v9209_v62  ;;  %6873 = vmatpush1.bf16.msra.mxu1 %v9212_v37 }
0x1207   :  { %6843 = vmatprep.subr.bf16.mxu0 %v9216_v46  ;;  %6875 = vmatprep.subr.bf16.mxu1 %v9219_v39 }
0x120a   :  { %6845 = vmatpush1.bf16.msra.mxu0 %v9221_v61  ;;  %6877 = vmatpush1.bf16.msra.mxu1 %v9224_v27 }
0x120b   :  { %6847 = vmatprep.subr.bf16.mxu0 %v9227_v52  ;;  %6879 = vmatprep.subr.bf16.mxu1 %v9229_v57 }
0x120e   :  { %6849 = vmatpush1.bf16.msra.mxu0 %v9232_v56  ;;  %6881 = vmatpush1.bf16.msra.mxu1 %v9236_v35 }
0x120f   :  { %6851 = vmatprep.subr.bf16.mxu0 %v9241_v7  ;;  %6883 = vmatprep.subr.bf16.mxu1 %v9243_v26 }
0x1212   :  { %6853 = vmatpush1.bf16.msra.mxu0 %v9245_v60  ;;  %6885 = vmatpush1.bf16.msra.mxu1 %v9248_v49 }
0x1213   :  { %6887 = vmatprep.subr.bf16.mxu0 %v9157_v54  ;;  %6919 = vmatprep.subr.bf16.mxu1 %v9159_v23 }
0x12c8   :  { %v4282_v38 = vpop.f32.mrb[34].mxu0  ;;  %v4353_v20 = vpop.f32.mrb[34].mxu1 }
0x12c9   :  { %v7272_v13 = vadd.f32 %v4282_v38, %v9302_v47  ;;  %v4284_v18 = vpop.f32.mrb[35].mxu0  ;;  %v4355_v2 = vpop.f32.mrb[35].mxu1  ;;  %v7288_v32 = vadd.f32 %v4353_v20, %v9314_v25 }
0x12ca   :  { %v7273_v31 = vadd.f32 %v4284_v18, %v9305_v43  ;;  %v7289_v12 = vadd.f32 %v4355_v2, %v9310_v50 }
0x12cb   :  { %v5505_v40 = vmul.f32 -1.442695, %v7272_v13 }
0x12cc   :  { %v5506_v48 = vmul.f32 -1.442695, %v7273_v31  ;;  %v5507_v22 = vmul.f32 -1.442695, %v7289_v12 }
0x12cd   :  { %7743 = vpow2.f32 %v5505_v40 }
0x12ce   :  { %7745 = vpow2.f32 %v5506_v48 }
0x12cf   :  { %7747 = vpow2.f32 %v5507_v22 }
0x12d0   :  { %7749 = vtanh.f32 %v7288_v32 }
0x12d7   :  { %v7744_v14 = vpop.eup %7743 }
0x12d8   :  { %v7746_v41 = vpop.eup %7745  ;;  %v4365_v53 = vadd.f32 1.0, %v7744_v14 }
0x12d9   :  { %v4371_v24 = vadd.f32 1.0, %v7746_v41  ;;  %v7748_v16 = vpop.eup %7747 }
0x12da   :  { %7751 = vrcp.f32 %v4365_v53  ;;  %v7750_v33 = vpop.eup %7749  ;;  %v4378_v10 = vadd.f32 1.0, %v7748_v16 }
0x12db   :  { %7753 = vrcp.f32 %v4371_v24 }
0x12dc   :  { %7755 = vrcp.f32 %v4378_v10 }
0x12e4   :  { %v7752_v28 = vpop.eup %7751 }
0x12e5   :  { %v7754_v30 = vpop.eup %7753  ;;  %v4382_v19 = vmul.f32 %v7752_v28, %v7750_v33 }
0x12e6   :  { %v4381_v1 = vmul.f32 %v7754_v30, %v9317_v51  ;;  %v7756_v6 = vpop.eup %7755 }
0x12e8   :  { %v9362_v9 = vadd.f32 %v4382_v19, %v4381_v1 }
0x12ea   :  { %7757 = vtanh.f32 %v9362_v9 }
0x12f4   :  { %v7758_v59 = vpop.eup %7757 }
0x12f5   :  { %v4385_v21 = vmul.f32 %v7758_v59, %v7756_v6 }
0x12f7   :  { %4451 = vmatmul.mubr.f32.vlgmr.msra.gmra.mrb[36].mxu0 %v4385_v21  ;;  %5407 = vst [vmem:[%s9605_s10 + $0x8] sm:$0xff] %v4385_v21  ;;  %4522 = vmatmul.mubr.f32.vlgmr.msra.gmra.mrb[36].mxu1 %v4385_v21 }
0x12f8   :  { %6889 = vmatpush1.bf16.msra.mxu0 %v9161_v36  ;;  %6921 = vmatpush1.bf16.msra.mxu1 %v9164_v5 }
0x12f9   :  { %6891 = vmatprep.subr.bf16.mxu0 %v9169_v8  ;;  %6923 = vmatprep.subr.bf16.mxu1 %v9171_v58 }
0x12fa   :  { %4620 = vmatprep.mubr.f32.mxu0 %v8003_v0  ;;  %4691 = vmatprep.mubr.f32.mxu1 %v8003_v0 }
0x12fc   :  { %6893 = vmatpush1.bf16.msra.mxu0 %v9173_v44  ;;  %6925 = vmatpush1.bf16.msra.mxu1 %v9176_v4 }
0x12fd   :  { %6895 = vmatprep.subr.bf16.mxu0 %v9181_v45  ;;  %6927 = vmatprep.subr.bf16.mxu1 %v9183_v29 }
0x1300   :  { %6897 = vmatpush1.bf16.msra.mxu0 %v9185_v15  ;;  %6929 = vmatpush1.bf16.msra.mxu1 %v9188_v11 }
0x1301   :  { %6899 = vmatprep.subr.bf16.mxu0 %v9193_v55  ;;  %6931 = vmatprep.subr.bf16.mxu1 %v9195_v42 }
0x1304   :  { %6901 = vmatpush1.bf16.msra.mxu0 %v9197_v34  ;;  %6933 = vmatpush1.bf16.msra.mxu1 %v9200_v17 }
0x1305   :  { %6903 = vmatprep.subr.bf16.mxu0 %v9205_v63  ;;  %6935 = vmatprep.subr.bf16.mxu1 %v9207_v3 }
0x1308   :  { %6905 = vmatpush1.bf16.msra.mxu0 %v9209_v62  ;;  %6937 = vmatpush1.bf16.msra.mxu1 %v9212_v37 }
0x1309   :  { %6907 = vmatprep.subr.bf16.mxu0 %v9216_v46  ;;  %6939 = vmatprep.subr.bf16.mxu1 %v9219_v39 }
0x130c   :  { %6909 = vmatpush1.bf16.msra.mxu0 %v9221_v61  ;;  %6941 = vmatpush1.bf16.msra.mxu1 %v9224_v27 }
0x130d   :  { %6911 = vmatprep.subr.bf16.mxu0 %v9227_v52  ;;  %6943 = vmatprep.subr.bf16.mxu1 %v9229_v57 }
0x1310   :  { %6913 = vmatpush1.bf16.msra.mxu0 %v9232_v56  ;;  %6945 = vmatpush1.bf16.msra.mxu1 %v9236_v35 }
0x1311   :  { %6915 = vmatprep.subr.bf16.mxu0 %v9241_v7  ;;  %6947 = vmatprep.subr.bf16.mxu1 %v9243_v26 }
0x1314   :  { %6917 = vmatpush1.bf16.msra.mxu0 %v9245_v60  ;;  %6949 = vmatpush1.bf16.msra.mxu1 %v9248_v49 }
0x1315   :  { %6951 = vmatprep.subr.bf16.mxu0 %v9157_v54  ;;  %6983 = vmatprep.subr.bf16.mxu1 %v9159_v23 }
0x13ca   :  { %v4452_v51 = vpop.f32.mrb[36].mxu0  ;;  %v4523_v38 = vpop.f32.mrb[36].mxu1 }
0x13cb   :  { %v7274_v20 = vadd.f32 %v4452_v51, %v9302_v47  ;;  %v4454_v13 = vpop.f32.mrb[37].mxu0  ;;  %v4525_v18 = vpop.f32.mrb[37].mxu1  ;;  %v7290_v22 = vadd.f32 %v4523_v38, %v9314_v25 }
0x13cc   :  { %v7275_v2 = vadd.f32 %v4454_v13, %v9305_v43  ;;  %v7291_v48 = vadd.f32 %v4525_v18, %v9310_v50 }
0x13cd   :  { %v5508_v31 = vmul.f32 -1.442695, %v7274_v20 }
0x13ce   :  { %v5509_v40 = vmul.f32 -1.442695, %v7275_v2  ;;  %v5510_v12 = vmul.f32 -1.442695, %v7291_v48 }
0x13cf   :  { %7759 = vpow2.f32 %v5508_v31 }
0x13d0   :  { %7761 = vpow2.f32 %v5509_v40 }
0x13d1   :  { %7763 = vpow2.f32 %v5510_v12 }
0x13d2   :  { %7765 = vtanh.f32 %v7290_v22 }
0x13d9   :  { %v7760_v32 = vpop.eup %7759 }
0x13da   :  { %v7762_v14 = vpop.eup %7761  ;;  %v4535_v41 = vadd.f32 1.0, %v7760_v32 }
0x13db   :  { %v4541_v53 = vadd.f32 1.0, %v7762_v14  ;;  %v7764_v24 = vpop.eup %7763 }
0x13dc   :  { %7767 = vrcp.f32 %v4535_v41  ;;  %v7766_v16 = vpop.eup %7765  ;;  %v4548_v19 = vadd.f32 1.0, %v7764_v24 }
0x13dd   :  { %7769 = vrcp.f32 %v4541_v53 }
0x13de   :  { %7771 = vrcp.f32 %v4548_v19 }
0x13e6   :  { %v7768_v33 = vpop.eup %7767 }
0x13e7   :  { %v7770_v28 = vpop.eup %7769  ;;  %v4552_v30 = vmul.f32 %v7768_v33, %v7766_v16 }
0x13e8   :  { %v4551_v10 = vmul.f32 %v7770_v28, %v9362_v9  ;;  %v7772_v6 = vpop.eup %7771 }
0x13ea   :  { %v9407_v1 = vadd.f32 %v4552_v30, %v4551_v10 }
0x13ec   :  { %7773 = vtanh.f32 %v9407_v1 }
0x13f6   :  { %v7774_v59 = vpop.eup %7773 }
0x13f7   :  { %v4555_v21 = vmul.f32 %v7774_v59, %v7772_v6 }
0x13f9   :  { %4621 = vmatmul.mubr.f32.vlgmr.msra.gmra.mrb[38].mxu0 %v4555_v21  ;;  %5408 = vst [vmem:[%s9605_s10 + $0x10] sm:$0xff] %v4555_v21  ;;  %4692 = vmatmul.mubr.f32.vlgmr.msra.gmra.mrb[38].mxu1 %v4555_v21 }
0x13fa   :  { %6953 = vmatpush1.bf16.msra.mxu0 %v9161_v36  ;;  %6985 = vmatpush1.bf16.msra.mxu1 %v9164_v5 }
0x13fb   :  { %6955 = vmatprep.subr.bf16.mxu0 %v9169_v8  ;;  %6987 = vmatprep.subr.bf16.mxu1 %v9171_v58 }
0x13fc   :  { %4790 = vmatprep.mubr.f32.mxu0 %v8003_v0  ;;  %4861 = vmatprep.mubr.f32.mxu1 %v8003_v0 }
0x13fe   :  { %6957 = vmatpush1.bf16.msra.mxu0 %v9173_v44  ;;  %6989 = vmatpush1.bf16.msra.mxu1 %v9176_v4 }
0x13ff   :  { %6959 = vmatprep.subr.bf16.mxu0 %v9181_v45  ;;  %6991 = vmatprep.subr.bf16.mxu1 %v9183_v29 }
0x1402   :  { %6961 = vmatpush1.bf16.msra.mxu0 %v9185_v15  ;;  %6993 = vmatpush1.bf16.msra.mxu1 %v9188_v11 }
0x1403   :  { %6963 = vmatprep.subr.bf16.mxu0 %v9193_v55  ;;  %6995 = vmatprep.subr.bf16.mxu1 %v9195_v42 }
0x1406   :  { %6965 = vmatpush1.bf16.msra.mxu0 %v9197_v34  ;;  %6997 = vmatpush1.bf16.msra.mxu1 %v9200_v17 }
0x1407   :  { %6967 = vmatprep.subr.bf16.mxu0 %v9205_v63  ;;  %6999 = vmatprep.subr.bf16.mxu1 %v9207_v3 }
0x140a   :  { %6969 = vmatpush1.bf16.msra.mxu0 %v9209_v62  ;;  %7001 = vmatpush1.bf16.msra.mxu1 %v9212_v37 }
0x140b   :  { %6971 = vmatprep.subr.bf16.mxu0 %v9216_v46  ;;  %7003 = vmatprep.subr.bf16.mxu1 %v9219_v39 }
0x140e   :  { %6973 = vmatpush1.bf16.msra.mxu0 %v9221_v61  ;;  %7005 = vmatpush1.bf16.msra.mxu1 %v9224_v27 }
0x140f   :  { %6975 = vmatprep.subr.bf16.mxu0 %v9227_v52  ;;  %7007 = vmatprep.subr.bf16.mxu1 %v9229_v57 }
0x1412   :  { %6977 = vmatpush1.bf16.msra.mxu0 %v9232_v56  ;;  %7009 = vmatpush1.bf16.msra.mxu1 %v9236_v35 }
0x1413   :  { %6979 = vmatprep.subr.bf16.mxu0 %v9241_v7  ;;  %7011 = vmatprep.subr.bf16.mxu1 %v9243_v26 }
0x1416   :  { %6981 = vmatpush1.bf16.msra.mxu0 %v9245_v60  ;;  %7013 = vmatpush1.bf16.msra.mxu1 %v9248_v49 }
0x1417   :  { %7015 = vmatprep.subr.bf16.mxu0 %v9157_v54  ;;  %7047 = vmatprep.subr.bf16.mxu1 %v9159_v23 }
0x14cc   :  { %v4622_v9 = vpop.f32.mrb[38].mxu0  ;;  %v4693_v51 = vpop.f32.mrb[38].mxu1 }
0x14cd   :  { %v7276_v38 = vadd.f32 %v4622_v9, %v9302_v47  ;;  %v4624_v20 = vpop.f32.mrb[39].mxu0  ;;  %v4695_v13 = vpop.f32.mrb[39].mxu1  ;;  %v7292_v12 = vadd.f32 %v4693_v51, %v9314_v25 }
0x14ce   :  { %v7277_v18 = vadd.f32 %v4624_v20, %v9305_v43  ;;  %v7293_v40 = vadd.f32 %v4695_v13, %v9310_v50 }
0x14cf   :  { %v5511_v2 = vmul.f32 -1.442695, %v7276_v38 }
0x14d0   :  { %v5512_v31 = vmul.f32 -1.442695, %v7277_v18  ;;  %v5513_v48 = vmul.f32 -1.442695, %v7293_v40 }
0x14d1   :  { %7775 = vpow2.f32 %v5511_v2 }
0x14d2   :  { %7777 = vpow2.f32 %v5512_v31 }
0x14d3   :  { %7779 = vpow2.f32 %v5513_v48 }
0x14d4   :  { %7781 = vtanh.f32 %v7292_v12 }
0x14db   :  { %v7776_v22 = vpop.eup %7775 }
0x14dc   :  { %v7778_v32 = vpop.eup %7777  ;;  %v4705_v14 = vadd.f32 1.0, %v7776_v22 }
0x14dd   :  { %v4711_v41 = vadd.f32 1.0, %v7778_v32  ;;  %v7780_v53 = vpop.eup %7779 }
0x14de   :  { %7783 = vrcp.f32 %v4705_v14  ;;  %v7782_v24 = vpop.eup %7781  ;;  %v4718_v30 = vadd.f32 1.0, %v7780_v53 }
0x14df   :  { %7785 = vrcp.f32 %v4711_v41 }
0x14e0   :  { %7787 = vrcp.f32 %v4718_v30 }
0x14e8   :  { %v7784_v16 = vpop.eup %7783 }
0x14e9   :  { %v7786_v33 = vpop.eup %7785  ;;  %v4722_v28 = vmul.f32 %v7784_v16, %v7782_v24 }
0x14ea   :  { %v4721_v19 = vmul.f32 %v7786_v33, %v9407_v1  ;;  %v7788_v6 = vpop.eup %7787 }
0x14ec   :  { %v9452_v10 = vadd.f32 %v4722_v28, %v4721_v19 }
0x14ee   :  { %7789 = vtanh.f32 %v9452_v10 }
0x14f8   :  { %v7790_v59 = vpop.eup %7789 }
0x14f9   :  { %v4725_v21 = vmul.f32 %v7790_v59, %v7788_v6 }
0x14fb   :  { %4791 = vmatmul.mubr.f32.vlgmr.msra.gmra.mrb[40].mxu0 %v4725_v21  ;;  %5409 = vst [vmem:[%s9605_s10 + $0x18] sm:$0xff] %v4725_v21  ;;  %4862 = vmatmul.mubr.f32.vlgmr.msra.gmra.mrb[40].mxu1 %v4725_v21 }
0x14fc   :  { %7017 = vmatpush1.bf16.msra.mxu0 %v9161_v36  ;;  %7049 = vmatpush1.bf16.msra.mxu1 %v9164_v5 }
0x14fd   :  { %7019 = vmatprep.subr.bf16.mxu0 %v9169_v8  ;;  %7051 = vmatprep.subr.bf16.mxu1 %v9171_v58 }
0x14fe   :  { %4960 = vmatprep.mubr.f32.mxu0 %v8003_v0  ;;  %5031 = vmatprep.mubr.f32.mxu1 %v8003_v0 }
0x1500   :  { %7021 = vmatpush1.bf16.msra.mxu0 %v9173_v44  ;;  %7053 = vmatpush1.bf16.msra.mxu1 %v9176_v4 }
0x1501   :  { %7023 = vmatprep.subr.bf16.mxu0 %v9181_v45  ;;  %7055 = vmatprep.subr.bf16.mxu1 %v9183_v29 }
0x1504   :  { %7025 = vmatpush1.bf16.msra.mxu0 %v9185_v15  ;;  %7057 = vmatpush1.bf16.msra.mxu1 %v9188_v11 }
0x1505   :  { %7027 = vmatprep.subr.bf16.mxu0 %v9193_v55  ;;  %7059 = vmatprep.subr.bf16.mxu1 %v9195_v42 }
0x1508   :  { %7029 = vmatpush1.bf16.msra.mxu0 %v9197_v34  ;;  %7061 = vmatpush1.bf16.msra.mxu1 %v9200_v17 }
0x1509   :  { %7031 = vmatprep.subr.bf16.mxu0 %v9205_v63  ;;  %7063 = vmatprep.subr.bf16.mxu1 %v9207_v3 }
0x150c   :  { %7033 = vmatpush1.bf16.msra.mxu0 %v9209_v62  ;;  %7065 = vmatpush1.bf16.msra.mxu1 %v9212_v37 }
0x150d   :  { %7035 = vmatprep.subr.bf16.mxu0 %v9216_v46  ;;  %7067 = vmatprep.subr.bf16.mxu1 %v9219_v39 }
0x1510   :  { %7037 = vmatpush1.bf16.msra.mxu0 %v9221_v61  ;;  %7069 = vmatpush1.bf16.msra.mxu1 %v9224_v27 }
0x1511   :  { %7039 = vmatprep.subr.bf16.mxu0 %v9227_v52  ;;  %7071 = vmatprep.subr.bf16.mxu1 %v9229_v57 }
0x1514   :  { %7041 = vmatpush1.bf16.msra.mxu0 %v9232_v56  ;;  %7073 = vmatpush1.bf16.msra.mxu1 %v9236_v35 }
0x1515   :  { %7043 = vmatprep.subr.bf16.mxu0 %v9241_v7  ;;  %7075 = vmatprep.subr.bf16.mxu1 %v9243_v26 }
0x1518   :  { %7045 = vmatpush1.bf16.msra.mxu0 %v9245_v60  ;;  %7077 = vmatpush1.bf16.msra.mxu1 %v9248_v49 }
0x1519   :  { %7079 = vmatprep.subr.bf16.mxu0 %v9157_v54  ;;  %7111 = vmatprep.subr.bf16.mxu1 %v9159_v23 }
0x15ce   :  { %v4792_v1 = vpop.f32.mrb[40].mxu0  ;;  %v4863_v9 = vpop.f32.mrb[40].mxu1 }
0x15cf   :  { %v7278_v51 = vadd.f32 %v4792_v1, %v9302_v47  ;;  %v4794_v38 = vpop.f32.mrb[41].mxu0  ;;  %v4865_v20 = vpop.f32.mrb[41].mxu1  ;;  %v7294_v48 = vadd.f32 %v4863_v9, %v9314_v25 }
0x15d0   :  { %v7279_v13 = vadd.f32 %v4794_v38, %v9305_v43  ;;  %v7295_v31 = vadd.f32 %v4865_v20, %v9310_v50 }
0x15d1   :  { %v5514_v18 = vmul.f32 -1.442695, %v7278_v51 }
0x15d2   :  { %v5515_v2 = vmul.f32 -1.442695, %v7279_v13  ;;  %v5516_v40 = vmul.f32 -1.442695, %v7295_v31 }
0x15d3   :  { %7791 = vpow2.f32 %v5514_v18 }
0x15d4   :  { %7793 = vpow2.f32 %v5515_v2 }
0x15d5   :  { %7795 = vpow2.f32 %v5516_v40 }
0x15d6   :  { %7797 = vtanh.f32 %v7294_v48 }
0x15dd   :  { %v7792_v12 = vpop.eup %7791 }
0x15de   :  { %v7794_v22 = vpop.eup %7793  ;;  %v4875_v32 = vadd.f32 1.0, %v7792_v12 }
0x15df   :  { %v4881_v14 = vadd.f32 1.0, %v7794_v22  ;;  %v7796_v41 = vpop.eup %7795 }
0x15e0   :  { %7799 = vrcp.f32 %v4875_v32  ;;  %v7798_v53 = vpop.eup %7797  ;;  %v4888_v28 = vadd.f32 1.0, %v7796_v41 }
0x15e1   :  { %7801 = vrcp.f32 %v4881_v14 }
0x15e2   :  { %7803 = vrcp.f32 %v4888_v28 }
0x15ea   :  { %v7800_v24 = vpop.eup %7799 }
0x15eb   :  { %v7802_v16 = vpop.eup %7801  ;;  %v4892_v33 = vmul.f32 %v7800_v24, %v7798_v53 }
0x15ec   :  { %v4891_v30 = vmul.f32 %v7802_v16, %v9452_v10  ;;  %v7804_v6 = vpop.eup %7803 }
0x15ee   :  { %v9497_v19 = vadd.f32 %v4892_v33, %v4891_v30 }
0x15f0   :  { %7805 = vtanh.f32 %v9497_v19 }
0x15fa   :  { %v7806_v59 = vpop.eup %7805 }
0x15fb   :  { %v4895_v21 = vmul.f32 %v7806_v59, %v7804_v6 }
0x15fd   :  { %4961 = vmatmul.mubr.f32.vlgmr.msra.gmra.mrb[42].mxu0 %v4895_v21  ;;  %5410 = vst [vmem:[%s9605_s10 + $0x20] sm:$0xff] %v4895_v21  ;;  %5032 = vmatmul.mubr.f32.vlgmr.msra.gmra.mrb[42].mxu1 %v4895_v21 }
0x15fe   :  { %7081 = vmatpush1.bf16.msra.mxu0 %v9161_v36  ;;  %7113 = vmatpush1.bf16.msra.mxu1 %v9164_v5 }
0x15ff   :  { %7083 = vmatprep.subr.bf16.mxu0 %v9169_v8  ;;  %7115 = vmatprep.subr.bf16.mxu1 %v9171_v58 }
0x1600   :  { %5130 = vmatprep.mubr.f32.mxu0 %v8003_v0  ;;  %5201 = vmatprep.mubr.f32.mxu1 %v8003_v0 }
0x1602   :  { %7085 = vmatpush1.bf16.msra.mxu0 %v9173_v44  ;;  %7117 = vmatpush1.bf16.msra.mxu1 %v9176_v4 }
0x1603   :  { %7087 = vmatprep.subr.bf16.mxu0 %v9181_v45  ;;  %7119 = vmatprep.subr.bf16.mxu1 %v9183_v29 }
0x1606   :  { %7089 = vmatpush1.bf16.msra.mxu0 %v9185_v15  ;;  %7121 = vmatpush1.bf16.msra.mxu1 %v9188_v11 }
0x1607   :  { %7091 = vmatprep.subr.bf16.mxu0 %v9193_v55  ;;  %7123 = vmatprep.subr.bf16.mxu1 %v9195_v42 }
0x160a   :  { %7093 = vmatpush1.bf16.msra.mxu0 %v9197_v34  ;;  %7125 = vmatpush1.bf16.msra.mxu1 %v9200_v17 }
0x160b   :  { %7095 = vmatprep.subr.bf16.mxu0 %v9205_v63  ;;  %7127 = vmatprep.subr.bf16.mxu1 %v9207_v3 }
0x160e   :  { %7097 = vmatpush1.bf16.msra.mxu0 %v9209_v62  ;;  %7129 = vmatpush1.bf16.msra.mxu1 %v9212_v37 }
0x160f   :  { %7099 = vmatprep.subr.bf16.mxu0 %v9216_v46  ;;  %7131 = vmatprep.subr.bf16.mxu1 %v9219_v39 }
0x1612   :  { %7101 = vmatpush1.bf16.msra.mxu0 %v9221_v61  ;;  %7133 = vmatpush1.bf16.msra.mxu1 %v9224_v27 }
0x1613   :  { %7103 = vmatprep.subr.bf16.mxu0 %v9227_v52  ;;  %7135 = vmatprep.subr.bf16.mxu1 %v9229_v57 }
0x1616   :  { %7105 = vmatpush1.bf16.msra.mxu0 %v9232_v56  ;;  %7137 = vmatpush1.bf16.msra.mxu1 %v9236_v35 }
0x1617   :  { %7107 = vmatprep.subr.bf16.mxu0 %v9241_v7  ;;  %7139 = vmatprep.subr.bf16.mxu1 %v9243_v26 }
0x161a   :  { %7109 = vmatpush1.bf16.msra.mxu0 %v9245_v60  ;;  %7141 = vmatpush1.bf16.msra.mxu1 %v9248_v49 }
0x161b   :  { %7143 = vmatprep.subr.bf16.mxu0 %v9157_v54  ;;  %7175 = vmatprep.subr.bf16.mxu1 %v9159_v23 }
0x16d0   :  { %v4962_v10 = vpop.f32.mrb[42].mxu0  ;;  %v5033_v1 = vpop.f32.mrb[42].mxu1 }
0x16d1   :  { %v7280_v9 = vadd.f32 %v4962_v10, %v9302_v47  ;;  %v4964_v51 = vpop.f32.mrb[43].mxu0  ;;  %v5035_v38 = vpop.f32.mrb[43].mxu1  ;;  %v7296_v40 = vadd.f32 %v5033_v1, %v9314_v25 }
0x16d2   :  { %v7281_v20 = vadd.f32 %v4964_v51, %v9305_v43  ;;  %v7297_v2 = vadd.f32 %v5035_v38, %v9310_v50 }
0x16d3   :  { %v5517_v13 = vmul.f32 -1.442695, %v7280_v9 }
0x16d4   :  { %v5518_v18 = vmul.f32 -1.442695, %v7281_v20  ;;  %v5519_v31 = vmul.f32 -1.442695, %v7297_v2 }
0x16d5   :  { %7807 = vpow2.f32 %v5517_v13 }
0x16d6   :  { %7809 = vpow2.f32 %v5518_v18 }
0x16d7   :  { %7811 = vpow2.f32 %v5519_v31 }
0x16d8   :  { %7813 = vtanh.f32 %v7296_v40 }
0x16df   :  { %v7808_v54 = vpop.eup %7807 }
0x16e0   :  { %v7810_v48 = vpop.eup %7809  ;;  %v5045_v23 = vadd.f32 1.0, %v7808_v54 }
0x16e1   :  { %v5051_v12 = vadd.f32 1.0, %v7810_v48  ;;  %v7812_v22 = vpop.eup %7811 }
0x16e2   :  { %7815 = vrcp.f32 %v5045_v23  ;;  %v7814_v32 = vpop.eup %7813  ;;  %v5058_v24 = vadd.f32 1.0, %v7812_v22 }
0x16e3   :  { %7817 = vrcp.f32 %v5051_v12 }
0x16e4   :  { %7819 = vrcp.f32 %v5058_v24 }
0x16ec   :  { %v7816_v14 = vpop.eup %7815 }
0x16ed   :  { %v7818_v41 = vpop.eup %7817  ;;  %v5062_v53 = vmul.f32 %v7816_v14, %v7814_v32 }
0x16ee   :  { %v5061_v16 = vmul.f32 %v7818_v41, %v9497_v19  ;;  %v7820_v28 = vpop.eup %7819 }
0x16f0   :  { %v9542_v33 = vadd.f32 %v5062_v53, %v5061_v16 }
0x16f2   :  { %7821 = vtanh.f32 %v9542_v33 }
0x16fc   :  { %v7822_v30 = vpop.eup %7821 }
0x16fd   :  { %v5065_v6 = vmul.f32 %v7822_v30, %v7820_v28 }
0x16ff   :  { %5131 = vmatmul.mubr.f32.vlgmr.msra.gmra.mrb[44].mxu0 %v5065_v6  ;;  %5411 = vst [vmem:[%s9605_s10 + $0x28] sm:$0xff] %v5065_v6  ;;  %5202 = vmatmul.mubr.f32.vlgmr.msra.gmra.mrb[44].mxu1 %v5065_v6 }
0x1700   :  { %7145 = vmatpush1.bf16.msra.mxu0 %v9161_v36  ;;  %7177 = vmatpush1.bf16.msra.mxu1 %v9164_v5 }
0x1701   :  { %7147 = vmatprep.subr.bf16.mxu0 %v9169_v8  ;;  %7179 = vmatprep.subr.bf16.mxu1 %v9171_v58 }
0x1702   :  { %5300 = vmatprep.mubr.f32.mxu0 %v8003_v0  ;;  %5371 = vmatprep.mubr.f32.mxu1 %v8003_v0 }
0x1704   :  { %7149 = vmatpush1.bf16.msra.mxu0 %v9173_v44  ;;  %7181 = vmatpush1.bf16.msra.mxu1 %v9176_v4 }
0x1705   :  { %7151 = vmatprep.subr.bf16.mxu0 %v9181_v45  ;;  %7183 = vmatprep.subr.bf16.mxu1 %v9183_v29 }
0x1708   :  { %7153 = vmatpush1.bf16.msra.mxu0 %v9185_v15  ;;  %7185 = vmatpush1.bf16.msra.mxu1 %v9188_v11 }
0x1709   :  { %7155 = vmatprep.subr.bf16.mxu0 %v9193_v55  ;;  %7187 = vmatprep.subr.bf16.mxu1 %v9195_v42 }
0x170c   :  { %7157 = vmatpush1.bf16.msra.mxu0 %v9197_v34  ;;  %7189 = vmatpush1.bf16.msra.mxu1 %v9200_v17 }
0x170d   :  { %7159 = vmatprep.subr.bf16.mxu0 %v9205_v63  ;;  %7191 = vmatprep.subr.bf16.mxu1 %v9207_v3 }
0x1710   :  { %7161 = vmatpush1.bf16.msra.mxu0 %v9209_v62  ;;  %7193 = vmatpush1.bf16.msra.mxu1 %v9212_v37 }
0x1711   :  { %7163 = vmatprep.subr.bf16.mxu0 %v9216_v46  ;;  %7195 = vmatprep.subr.bf16.mxu1 %v9219_v39 }
0x1714   :  { %7165 = vmatpush1.bf16.msra.mxu0 %v9221_v61  ;;  %7197 = vmatpush1.bf16.msra.mxu1 %v9224_v27 }
0x1715   :  { %7167 = vmatprep.subr.bf16.mxu0 %v9227_v52  ;;  %7199 = vmatprep.subr.bf16.mxu1 %v9229_v57 }
0x1718   :  { %7169 = vmatpush1.bf16.msra.mxu0 %v9232_v56  ;;  %7201 = vmatpush1.bf16.msra.mxu1 %v9236_v35 }
0x1719   :  { %7171 = vmatprep.subr.bf16.mxu0 %v9241_v7  ;;  %7203 = vmatprep.subr.bf16.mxu1 %v9243_v26 }
0x171c   :  { %7173 = vmatpush1.bf16.msra.mxu0 %v9245_v60  ;;  %7205 = vmatpush1.bf16.msra.mxu1 %v9248_v49 }
0x17d2   :  { %v5132_v0 = vpop.f32.mrb[44].mxu0  ;;  %v5203_v36 = vpop.f32.mrb[44].mxu1 }
0x17d3   :  { %v7282_v5 = vadd.f32 %v5132_v0, %v9302_v47  ;;  %v5134_v8 = vpop.f32.mrb[45].mxu0  ;;  %v5205_v58 = vpop.f32.mrb[45].mxu1  ;;  %v7298_v11 = vadd.f32 %v5203_v36, %v9314_v25 }
0x17d4   :  { %v7283_v44 = vadd.f32 %v5134_v8, %v9305_v43  ;;  %v7299_v29 = vadd.f32 %v5205_v58, %v9310_v50 }
0x17d5   :  { %v5520_v4 = vmul.f32 -1.442695, %v7282_v5 }
0x17d6   :  { %v5521_v45 = vmul.f32 -1.442695, %v7283_v44  ;;  %v5522_v15 = vmul.f32 -1.442695, %v7299_v29 }
0x17d7   :  { %7823 = vpow2.f32 %v5520_v4 }
0x17d8   :  { %7825 = vpow2.f32 %v5521_v45 }
0x17d9   :  { %7827 = vpow2.f32 %v5522_v15 }
0x17da   :  { %7829 = vtanh.f32 %v7298_v11 }
0x17e1   :  { %v7824_v55 = vpop.eup %7823 }
0x17e2   :  { %v7826_v42 = vpop.eup %7825  ;;  %v5215_v34 = vadd.f32 1.0, %v7824_v55 }
0x17e3   :  { %v5221_v17 = vadd.f32 1.0, %v7826_v42  ;;  %v7828_v63 = vpop.eup %7827 }
0x17e4   :  { %7831 = vrcp.f32 %v5215_v34  ;;  %v7830_v3 = vpop.eup %7829  ;;  %v5228_v39 = vadd.f32 1.0, %v7828_v63 }
0x17e5   :  { %7833 = vrcp.f32 %v5221_v17 }
0x17e6   :  { %7835 = vrcp.f32 %v5228_v39 }
0x17ee   :  { %v7832_v62 = vpop.eup %7831 }
0x17ef   :  { %v7834_v37 = vpop.eup %7833  ;;  %v5232_v46 = vmul.f32 %v7832_v62, %v7830_v3 }
0x17f0   :  { %v5231_v61 = vmul.f32 %v7834_v37, %v9542_v33  ;;  %v7836_v52 = vpop.eup %7835 }
0x17f2   :  { %v5233_v27 = vadd.f32 %v5232_v46, %v5231_v61 }
0x17f4   :  { %7837 = vtanh.f32 %v5233_v27 }
0x17fe   :  { %v7838_v57 = vpop.eup %7837 }
0x17ff   :  { %v5235_v56 = vmul.f32 %v7838_v57, %v7836_v52 }
0x1801   :  { %5301 = vmatmul.mubr.f32.vlgmr.msra.gmra.mrb[46].mxu0 %v5235_v56  ;;  %5412 = vst [vmem:[%s9605_s10 + $0x30] sm:$0xff] %v5235_v56  ;;  %5372 = vmatmul.mubr.f32.vlgmr.msra.gmra.mrb[46].mxu1 %v5235_v56 }
0x18d4   :  { %v5302_v35 = vpop.f32.mrb[46].mxu0  ;;  %v5373_v7 = vpop.f32.mrb[46].mxu1 }
0x18d5   :  { %v7284_v26 = vadd.f32 %v5302_v35, %v9302_v47  ;;  %v5304_v60 = vpop.f32.mrb[47].mxu0  ;;  %v5375_v49 = vpop.f32.mrb[47].mxu1  ;;  %v7300_v9 = vadd.f32 %v5373_v7, %v9314_v25 }
0x18d6   :  { %v7285_v19 = vadd.f32 %v5304_v60, %v9305_v43  ;;  %v7301_v10 = vadd.f32 %v5375_v49, %v9310_v50 }
0x18d7   :  { %v5523_v59 = vmul.f32 -1.442695, %v7284_v26 }
0x18d8   :  { %v5524_v21 = vmul.f32 -1.442695, %v7285_v19  ;;  %v5525_v1 = vmul.f32 -1.442695, %v7301_v10 }
0x18d9   :  { %7839 = vpow2.f32 %v5523_v59 }
0x18da   :  { %7841 = vpow2.f32 %v5524_v21 }
0x18db   :  { %7843 = vpow2.f32 %v5525_v1 }
0x18dc   :  { %7845 = vtanh.f32 %v7300_v9 }
0x18e3   :  { %v7840_v51 = vpop.eup %7839 }
0x18e4   :  { %v7842_v38 = vpop.eup %7841  ;;  %v5385_v20 = vadd.f32 1.0, %v7840_v51 }
0x18e5   :  { %v5391_v13 = vadd.f32 1.0, %v7842_v38  ;;  %v7844_v47 = vpop.eup %7843 }
0x18e6   :  { %7847 = vrcp.f32 %v5385_v20  ;;  %v7846_v18 = vpop.eup %7845  ;;  %v5398_v40 = vadd.f32 1.0, %v7844_v47 }
0x18e7   :  { %7849 = vrcp.f32 %v5391_v13 }
0x18e8   :  { %7851 = vrcp.f32 %v5398_v40 }
0x18f0   :  { %v7848_v43 = vpop.eup %7847 }
0x18f1   :  { %v7850_v2 = vpop.eup %7849  ;;  %v5402_v31 = vmul.f32 %v7848_v43, %v7846_v18 }
0x18f2   :  { %v5401_v54 = vmul.f32 %v7850_v2, %v5233_v27  ;;  %v7852_v50 = vpop.eup %7851 }
0x18f4   :  { %v5403_v48 = vadd.f32 %v5402_v31, %v5401_v54 }
0x18f6   :  { %7853 = vtanh.f32 %v5403_v48 }
0x1900   :  { %v7854_v25 = vpop.eup %7853 }
0x1901   :  { %v5405_v23 = vmul.f32 %v7854_v25, %v7852_v50 }
0x1903   :  { %5413 = vst [vmem:[%s9605_s10 + $0x38] sm:$0xff] %v5405_v23 }
0x1904   :  { %5418 = vsyncpa [#allocation3], 1 }
0x1905   :  { %5419 = vsyncpa [#allocation5], 1 }
0x1906   :  { %5420 = vsyncpa [#allocation8], 1 }
0x1907   :  { %5421 = vsyncpa [#allocation11], 1 }

</bundles_post_ra>
